<compile_context>
chip_gen: v7x
topology: tpu7x:2x2x1
jax: 0.10.0
libtpu: 0.0.40
codegen_flags: <defaults>
</compile_context>

<pallas_src>
import functools
import math

import numpy as np
import jax
import jax.numpy as jnp
from jax import lax
from jax.experimental import pallas as pl
from jax.experimental.pallas import tpu as pltpu


# ---------------------------------------------------------------------------
# host-side precompute (runs once per (model, batch-block) configuration)
# ---------------------------------------------------------------------------

def _ceil_div(a, b):
    return -(-a // b)


def _interp_1d_matrix(in_size, out_size, mode):
    """(in_size, out_size) 1-D interpolation matrix (nn.Upsample semantics)."""
    m = np.zeros((in_size, out_size), np.float32)
    scale = in_size / out_size
    if mode == "nearest":
        for o in range(out_size):
            m[min(int(math.floor(o * scale)), in_size - 1), o] = 1.0
        return m
    # 'bilinear' with align_corners=False (nn.Upsample default)
    for o in range(out_size):
        src = max((o + 0.5) * scale - 0.5, 0.0)
        i0 = min(int(math.floor(src)), in_size - 1)
        frac = src - i0
        i1 = min(i0 + 1, in_size - 1)
        m[i0, o] += 1.0 - frac
        m[i1, o] += frac
    return m


def _upsample_matrix(hin, win, hout, wout, bblk, mode):
    """Flat upsample matrix for the batch-interleaved (h, bblk, w) layout."""
    mh = _interp_1d_matrix(hin, hout, mode)
    mw = _interp_1d_matrix(win, wout, mode)
    eye = np.eye(bblk, dtype=np.float32)
    return np.kron(mh, np.kron(eye, mw)).astype(np.float32)


def _pool_anchor_matrix(h, w, ho, wo, p, bblk):
    """0/1 anchor-selection matrix (h*bblk*w, ho*bblk*wo) for MaxPool2d(p, ceil)."""
    m = np.zeros((h * bblk * w, ho * bblk * wo), np.float32)
    for yo in range(ho):
        for b in range(bblk):
            for xo in range(wo):
                m[(yo * p) * bblk * w + b * w + xo * p,
                  yo * bblk * wo + b * wo + xo] = 1.0
    return m


def _live_taps(h, w, k):
    """Taps of an odd k x k 'same' conv that can actually touch an (h, w) image."""
    pad = k // 2
    return tuple((oy, ox)
                 for oy in range(-pad, pad + 1)
                 for ox in range(-pad, pad + 1)
                 if abs(oy) < h and abs(ox) < w)


# ---------------------------------------------------------------------------
# in-kernel building blocks (activations laid out as (C, h*bblk*w) f32)
# ---------------------------------------------------------------------------

def _xcol(n, w):
    """Per-lane column-within-image index for the batch-interleaved flat layout."""
    col = lax.broadcasted_iota(jnp.int32, (1, n), 1)
    if w & (w - 1) == 0:
        return col & (w - 1)
    return col % w


def _conv_relu(a, w_ref, b_ref, h, w, bblk, taps):
    """'same' conv (stride 1, odd k) + bias + ReLU on the flat layout.

    Only live taps are materialised.  Each tap is a zero-filled lane-offset slice
    of the activation; the per-column mask (hoisted, one per distinct ox) stops
    horizontal shifts from leaking across image columns, and vertical
    out-of-range reads land in the zero margin.  Because the batch is interleaved
    between the row and column axes, images never mix.
    """
    cin, n = a.shape
    bw = bblk * w
    if len(taps) == 1:                         # 1x1 image: only the centre tap lives
        patches = a
    else:
        maxoff = max(abs(oy) * bw + abs(ox) for oy, ox in taps)
        zpad = jnp.zeros((cin, maxoff), a.dtype)
        apad = jnp.concatenate([zpad, a, zpad], axis=1)
        xcol = _xcol(n, w)
        keep = {ox: ((xcol >= -ox) if ox < 0 else (xcol < w - ox))
                for ox in sorted({t[1] for t in taps}) if ox != 0}
        pieces = []
        for oy, ox in taps:
            if (oy, ox) == (0, 0):
                piece = a
            else:
                off = maxoff + oy * bw + ox
                piece = apad[:, off:off + n]
                if ox != 0:
                    piece = jnp.where(keep[ox], piece, 0.0)
            pieces.append(piece)
        patches = jnp.concatenate(pieces, axis=0)           # (nlive*Cin, n)
    y = jnp.dot(w_ref[...], patches.astype(jnp.bfloat16),   # bf16 MXU, f32 accum
                preferred_element_type=jnp.float32) + b_ref[...]
    return jnp.maximum(y, 0.0)


def _maxpool(a, sel_ref, h, w, bblk, p):
    """MaxPool2d(p, ceil_mode=True): (p-1)+(p-1) shifted maxes + ONE anchor-select
    matmul (instead of p*p selection matmuls).  Out-of-range taps contribute 0,
    valid because `a` is post-ReLU (>= 0)."""
    c, n = a.shape
    bw = bblk * w
    hsh = [dx for dx in range(1, p) if dx < w]
    vsh = [dy for dy in range(1, p) if dy < h]
    hm = a
    if hsh:
        ap = jnp.concatenate([a, jnp.zeros((c, max(hsh)), a.dtype)], axis=1)
        xcol = _xcol(n, w)
        for dx in hsh:
            hm = jnp.maximum(hm, jnp.where(xcol < w - dx, ap[:, dx:dx + n], 0.0))
    vm = hm
    if vsh:
        hp = jnp.concatenate([hm, jnp.zeros((c, max(vsh) * bw), a.dtype)], axis=1)
        for dy in vsh:
            vm = jnp.maximum(vm, hp[:, dy * bw:dy * bw + n])
    return jnp.dot(vm, sel_ref[...], preferred_element_type=jnp.float32)


def _dincae_kernel(*refs, plan):
    """Fused DINCAE_like forward for one block of `bblk` batch elements.

    refs = [x] + interleaved parameters (consumed in forward order) + [out]."""
    x_ref, o_ref = refs[0], refs[-1]
    it = iter(refs[1:-1])
    bblk, spatial, nst = plan["bblk"], plan["spatial"], plan["nstage"]

    a = x_ref[0]                                       # (Cin, H*bblk*W) f32
    skips = []
    for i in range(nst):                               # enc_i = pool(relu(conv(.)))
        hh, ww = spatial[i]
        w_ref, b_ref = next(it), next(it)
        a = _conv_relu(a, w_ref, b_ref, hh, ww, bblk, plan["enc_taps"][i])
        if plan["pool_live"][i]:
            a = _maxpool(a, next(it), hh, ww, bblk, plan["pool_sizes"][i])
        skips.append(a)

    x = skips[nst - 1]                                 # enc_n
    for j in range(nst):                               # dec_j = relu(conv(up(x)))
        hh, ww = spatial[nst - 1 - j]
        if plan["ups_live"][j]:
            x = jnp.dot(x, next(it)[...], preferred_element_type=jnp.float32)
        w_ref, b_ref = next(it), next(it)
        x = _conv_relu(x, w_ref, b_ref, hh, ww, bblk, plan["dec_taps"][j])
        if j < nst - 1:
            x = x + skips[nst - 2 - j]
    o_ref[0] = x.astype(o_ref.dtype)


# ---------------------------------------------------------------------------
# single-buffering probe for grid-invariant parameter blocks
# ---------------------------------------------------------------------------

def _probe_kernel(x_ref, o_ref):
    o_ref[...] = x_ref[...]


@functools.lru_cache(maxsize=None)
def _single_buffer_mode():
    """pl.Buffered(1) lets constant (grid-invariant) parameter blocks be fetched
    once without reserving a second pipeline buffer.  Probe once; fall back to
    default double-buffering if this JAX build rejects pipeline_mode here."""
    try:
        spec = pl.BlockSpec((8, 128), lambda i: (0, 0), pipeline_mode=pl.Buffered(1))
        fn = pl.pallas_call(
            _probe_kernel,
            out_shape=jax.ShapeDtypeStruct((8, 128), jnp.float32),
            grid_spec=pl.GridSpec(grid=(1,), in_specs=[spec],
                                  out_specs=pl.BlockSpec((8, 128), lambda i: (0, 0))),
        )
        jax.block_until_ready(fn(jnp.zeros((8, 128), jnp.float32)))
        return pl.Buffered(1)
    except Exception:
        return None


# ---------------------------------------------------------------------------
# model wrapper (mirrors the PyTorch DINCAE_like forward semantics)
# ---------------------------------------------------------------------------

class DINCAELikePallas:
    def __init__(self, key, n_channels=4, image_nrows=16, image_ncols=16,
                 middle_channels=(8, 8, 8, 8, 8), kernel_sizes=(3, 3, 3, 3, 3),
                 pooling_sizes=(2, 2, 2, 2, 2), interp_mode="bilinear",
                 max_batch_block=4):
        assert len(middle_channels) == len(kernel_sizes) == len(pooling_sizes) == 5
        # TODO(synk): even kernel_sizes (PyTorch asymmetric 'same' padding) not implemented.
        assert all(k % 2 == 1 for k in kernel_sizes), "odd kernel sizes only"

        self.n_channels = n_channels
        self.output_size = n_channels            # module sets output_size = n_channels
        self.middle_channels = tuple(middle_channels)
        self.kernel_sizes = tuple(kernel_sizes)
        self.pooling_sizes = tuple(pooling_sizes)
        self.interp_mode = interp_mode
        self.image_nrows, self.image_ncols = image_nrows, image_ncols
        # images folded onto the lane axis per grid step; the anchor-select /
        # upsample matrices grow ~ bblk**2, so keep this modest (grid handles the rest).
        self.max_batch_block = max_batch_block

        # spatial sizes after each pooling stage (== module _calculate_sizes + pool5)
        spatial = [(image_nrows, image_ncols)]
        for p in pooling_sizes:
            ph, pw = spatial[-1]
            spatial.append((_ceil_div(ph, p), _ceil_div(pw, p)))
        self.spatial = tuple(spatial)

        mc = self.middle_channels
        enc_io = [(n_channels if i == 0 else mc[i - 1], mc[i], kernel_sizes[i])
                  for i in range(5)]
        dec_io = [(mc[4 - j], mc[3 - j] if j < 4 else self.output_size,
                   kernel_sizes[4 - j]) for j in range(5)]

        keys = iter(jax.random.split(key, 10))

        def init_conv(cin, cout, k):
            kw, kb = jax.random.split(next(keys))
            bound = 1.0 / math.sqrt(cin * k * k)
            w = jax.random.uniform(kw, (cout, cin, k, k), jnp.float32, -bound, bound)
            b = jax.random.uniform(kb, (cout,), jnp.float32, -bound, bound)
            return w, b

        self._enc_w, self._enc_b, self._dec_w, self._dec_b = [], [], [], []
        for cin, cout, k in enc_io:
            w, b = init_conv(cin, cout, k)
            self._enc_w.append(w)
            self._enc_b.append(b)
        for cin, cout, k in dec_io:
            w, b = init_conv(cin, cout, k)
            self._dec_w.append(w)
            self._dec_b.append(b)

        self._cache = {}

    # -- host-side packing ---------------------------------------------------

    @staticmethod
    def _pack_weight(w, taps):
        """(Cout,Cin,K,K) -> (Cout, nlive*Cin) bf16, column order == patch-stack order."""
        pad = w.shape[-1] // 2
        cols = [w[:, :, oy + pad, ox + pad] for (oy, ox) in taps]
        return jnp.concatenate(cols, axis=1).astype(jnp.bfloat16)

    def _build(self, bblk):
        spatial, ks, ps = self.spatial, self.kernel_sizes, self.pooling_sizes
        params, enc_taps, dec_taps, pool_live, ups_live = [], [], [], [], []

        for i in range(5):
            hh, ww = spatial[i]
            taps = _live_taps(hh, ww, ks[i])
            enc_taps.append(taps)
            params.append(self._pack_weight(self._enc_w[i], taps))
            params.append(self._enc_b[i].reshape(-1, 1))
            live = not (ps[i] == 1 or (hh == 1 and ww == 1))   # identity pool -> pruned
            pool_live.append(live)
            if live:
                ho, wo = spatial[i + 1]
                params.append(jnp.asarray(
                    _pool_anchor_matrix(hh, ww, ho, wo, ps[i], bblk)))

        for j in range(5):
            hin, win = spatial[5 - j]
            hout, wout = spatial[4 - j]
            live = (hin, win) != (hout, wout)                  # identity upsample -> pruned
            ups_live.append(live)
            if live:
                params.append(jnp.asarray(
                    _upsample_matrix(hin, win, hout, wout, bblk, self.interp_mode)))
            taps = _live_taps(hout, wout, ks[4 - j])
            dec_taps.append(taps)
            params.append(self._pack_weight(self._dec_w[j], taps))
            params.append(self._dec_b[j].reshape(-1, 1))

        params = tuple(params)
        plan = dict(bblk=bblk, nstage=5, spatial=spatial, pool_sizes=ps,
                    enc_taps=tuple(enc_taps), dec_taps=tuple(dec_taps),
                    pool_live=tuple(pool_live), ups_live=tuple(ups_live))
        kernel = functools.partial(_dincae_kernel, plan=plan)

        cin, cout = self.n_channels, self.output_size
        H, W = self.image_nrows, self.image_ncols
        n0 = H * bblk * W
        buf = _single_buffer_mode()

        def param_spec(shape):
            if buf is not None:
                return pl.BlockSpec(shape, lambda g: (0, 0), pipeline_mode=buf)
            return pl.BlockSpec(shape, lambda g: (0, 0))

        in_specs = [pl.BlockSpec((1, cin, n0), lambda g: (g, 0, 0))]
        in_specs += [param_spec(p.shape) for p in params]
        out_spec = pl.BlockSpec((1, cout, n0), lambda g: (g, 0, 0))

        def forward(x_nchw, prm):
            B = x_nchw.shape[0]
            G = _ceil_div(B, bblk)
            Bp = G * bblk
            xf = x_nchw.astype(jnp.float32)
            if Bp != B:
                xf = jnp.pad(xf, ((0, Bp - B), (0, 0), (0, 0), (0, 0)))
            # NCHW -> batch-interleaved rows: (G, C, H, bblk, W) -> (G, C, H*bblk*W).
            # Lanes hold a full image row of bblk images side by side (lane-dense).
            xi = xf.reshape(G, bblk, cin, H, W).transpose(0, 2, 3, 1, 4)
            xi = xi.reshape(G, cin, n0)
            out = pl.pallas_call(
                kernel,
                out_shape=jax.ShapeDtypeStruct((G, cout, n0), jnp.float32),
                grid_spec=pl.GridSpec(grid=(G,), in_specs=in_specs,
                                      out_specs=out_spec),
                compiler_params=pltpu.CompilerParams(
                    dimension_semantics=("parallel",)),
            )(xi, *prm)
            y = out.reshape(G, cout, H, bblk, W).transpose(0, 3, 1, 2, 4)
            return y.reshape(Bp, cout, H, W)[:B]

        return {"fn": jax.jit(forward), "params": params, "bblk": bblk}

    def __call__(self, x_nchw):
        B, C, H, W = x_nchw.shape
        assert C == self.n_channels and (H, W) == (self.image_nrows, self.image_ncols)
        bblk = max(1, min(B, self.max_batch_block))
        entry = self._cache.get(bblk)
        if entry is None:
            entry = self._build(bblk)
            self._cache[bblk] = entry
        return entry["fn"](x_nchw, entry["params"])

    # -- plain-XLA reference (same math / precision choices), validation only --

    def reference_forward(self, x_nchw):
        def conv(a, w, b):
            y = lax.conv_general_dilated(
                a.astype(jnp.bfloat16), w.astype(jnp.bfloat16), (1, 1), "SAME",
                dimension_numbers=("NCHW", "OIHW", "NCHW"),
                preferred_element_type=jnp.float32)
            return jnp.maximum(y + b.reshape(1, -1, 1, 1), 0.0)

        def pool(a, p):
            n, c, h, w = a.shape
            ho, wo = _ceil_div(h, p), _ceil_div(w, p)
            a = jnp.pad(a, ((0, 0), (0, 0), (0, ho * p - h), (0, wo * p - w)))
            return a.reshape(n, c, ho, p, wo, p).max(axis=(3, 5))  # >=0 post-ReLU

        def upsample(a, hout, wout):
            n, c, h, w = a.shape
            if (h, w) == (hout, wout):
                return a
            u = jnp.asarray(np.kron(_interp_1d_matrix(h, hout, self.interp_mode),
                                    _interp_1d_matrix(w, wout, self.interp_mode)))
            return (a.reshape(n, c, h * w) @ u).reshape(n, c, hout, wout)

        a = x_nchw.astype(jnp.float32)
        skips = []
        for i in range(5):
            a = pool(conv(a, self._enc_w[i], self._enc_b[i]), self.pooling_sizes[i])
            skips.append(a)
        y = skips[4]
        for j in range(5):
            hout, wout = self.spatial[4 - j]
            y = conv(upsample(y, hout, wout), self._dec_w[j], self._dec_b[j])
            if j < 4:
                y = y + skips[3 - j]
        return y


if __name__ == "__main__":
    key = jax.random.PRNGKey(0)
    k_params, k_x = jax.random.split(key)
    model = DINCAELikePallas(
        k_params,
        n_channels=4, image_nrows=16, image_ncols=16,
        middle_channels=(8, 8, 8, 8, 8),
        kernel_sizes=(3, 3, 3, 3, 3),
        pooling_sizes=(2, 2, 2, 2, 2),
        interp_mode="bilinear",
    )
    x = jax.random.normal(k_x, (2, 4, 16, 16), jnp.float32)     # NCHW, like PyTorch
    y = model(x)
    jax.block_until_ready(y)
    assert y.shape == (2, 4, 16, 16)
    assert bool(jnp.all(jnp.isfinite(y)))
    assert bool(jnp.all(y >= 0.0))                              # final ReLU
    y_ref = model.reference_forward(x)
    assert bool(jnp.allclose(y, y_ref, rtol=1e-2, atol=1e-2)), (
        "max |err| = %f" % float(jnp.max(jnp.abs(y - y_ref))))
    print("KERNEL_OK")
</pallas_src>

<mosaic_0001>
module attributes {stable_mosaic.version = 11 : i64} {
  func.func @_probe_kernel(%arg0: i32, %arg1: memref<8x128xf32, #tpu.memory_space<vmem>>, %arg2: memref<8x128xf32, #tpu.memory_space<vmem>>) attributes {dimension_semantics = [#tpu.dimension_semantics<arbitrary>], iteration_bounds = array<i64: 1>, scalar_prefetch = 0 : i64, scratch_operands = 0 : i64, tpu.core_type = #tpu.core_type<tc>, window_params = [{pipeline_mode = #tpu.pipeline_mode<synchronous>, transform_indices = @transform_0, window_bounds = array<i64: 8, 128>}, {pipeline_mode = #tpu.pipeline_mode<synchronous>, transform_indices = @transform_1, window_bounds = array<i64: 8, 128>}]} {
    %c0 = arith.constant 0 : index
    %c0_0 = arith.constant 0 : index
    %0 = vector.load %arg1[%c0, %c0_0] : memref<8x128xf32, #tpu.memory_space<vmem>>, vector<8x128xf32>
    %c0_1 = arith.constant 0 : index
    %c0_2 = arith.constant 0 : index
    %1 = vector.load %arg2[%c0_1, %c0_2] : memref<8x128xf32, #tpu.memory_space<vmem>>, vector<8x128xf32>
    tpu.vector_store %arg2[%c0_1, %c0_2], %0 {strides = array<i32>} : memref<8x128xf32, #tpu.memory_space<vmem>>, vector<8x128xf32>,
    return
  }
  func.func @transform_0(%arg0: i32) -> (i32, i32) {
    %c0_i32 = arith.constant 0 : i32
    %c0_i32_0 = arith.constant 0 : i32
    %c0_i32_1 = arith.constant 0 : i32
    return %c0_i32, %c0_i32_0 : i32, i32
  }
  func.func @transform_1(%arg0: i32) -> (i32, i32) {
    %c0_i32 = arith.constant 0 : i32
    %c0_i32_0 = arith.constant 0 : i32
    %c0_i32_1 = arith.constant 0 : i32
    return %c0_i32, %c0_i32_0 : i32, i32
  }
}

module attributes {stable_mosaic.version = 11 : i64} {
  func.func @_dincae_kernel(%arg0: i32, %arg1: memref<1x4x512xf32, #tpu.memory_space<vmem>>, %arg2: memref<8x36xbf16, #tpu.memory_space<vmem>>, %arg3: memref<8x1xf32, #tpu.memory_space<vmem>>, %arg4: memref<512x128xf32, #tpu.memory_space<vmem>>, %arg5: memref<8x72xbf16, #tpu.memory_space<vmem>>, %arg6: memref<8x1xf32, #tpu.memory_space<vmem>>, %arg7: memref<128x32xf32, #tpu.memory_space<vmem>>, %arg8: memref<8x72xbf16, #tpu.memory_space<vmem>>, %arg9: memref<8x1xf32, #tpu.memory_space<vmem>>, %arg10: memref<32x8xf32, #tpu.memory_space<vmem>>, %arg11: memref<8x72xbf16, #tpu.memory_space<vmem>>, %arg12: memref<8x1xf32, #tpu.memory_space<vmem>>, %arg13: memref<8x2xf32, #tpu.memory_space<vmem>>, %arg14: memref<8x8xbf16, #tpu.memory_space<vmem>>, %arg15: memref<8x1xf32, #tpu.memory_space<vmem>>, %arg16: memref<8x8xbf16, #tpu.memory_space<vmem>>, %arg17: memref<8x1xf32, #tpu.memory_space<vmem>>, %arg18: memref<2x8xf32, #tpu.memory_space<vmem>>, %arg19: memref<8x72xbf16, #tpu.memory_space<vmem>>, %arg20: memref<8x1xf32, #tpu.memory_space<vmem>>, %arg21: memref<8x32xf32, #tpu.memory_space<vmem>>, %arg22: memref<8x72xbf16, #tpu.memory_space<vmem>>, %arg23: memref<8x1xf32, #tpu.memory_space<vmem>>, %arg24: memref<32x128xf32, #tpu.memory_space<vmem>>, %arg25: memref<8x72xbf16, #tpu.memory_space<vmem>>, %arg26: memref<8x1xf32, #tpu.memory_space<vmem>>, %arg27: memref<128x512xf32, #tpu.memory_space<vmem>>, %arg28: memref<4x72xbf16, #tpu.memory_space<vmem>>, %arg29: memref<4x1xf32, #tpu.memory_space<vmem>>, %arg30: memref<1x4x512xf32, #tpu.memory_space<vmem>>) attributes {dimension_semantics = [#tpu.dimension_semantics<parallel>], iteration_bounds = array<i64: 1>, scalar_prefetch = 0 : i64, scratch_operands = 0 : i64, tpu.core_type = #tpu.core_type<tc>, window_params = [{transform_indices = @transform_0, window_bounds = array<i64: 1, 4, 512>}, {pipeline_mode = #tpu.pipeline_mode<synchronous>, transform_indices = @transform_1, window_bounds = array<i64: 8, 36>}, {pipeline_mode = #tpu.pipeline_mode<synchronous>, transform_indices = @transform_2, window_bounds = array<i64: 8, 1>}, {pipeline_mode = #tpu.pipeline_mode<synchronous>, transform_indices = @transform_3, window_bounds = array<i64: 512, 128>}, {pipeline_mode = #tpu.pipeline_mode<synchronous>, transform_indices = @transform_4, window_bounds = array<i64: 8, 72>}, {pipeline_mode = #tpu.pipeline_mode<synchronous>, transform_indices = @transform_5, window_bounds = array<i64: 8, 1>}, {pipeline_mode = #tpu.pipeline_mode<synchronous>, transform_indices = @transform_6, window_bounds = array<i64: 128, 32>}, {pipeline_mode = #tpu.pipeline_mode<synchronous>, transform_indices = @transform_7, window_bounds = array<i64: 8, 72>}, {pipeline_mode = #tpu.pipeline_mode<synchronous>, transform_indices = @transform_8, window_bounds = array<i64: 8, 1>}, {pipeline_mode = #tpu.pipeline_mode<synchronous>, transform_indices = @transform_9, window_bounds = array<i64: 32, 8>}, {pipeline_mode = #tpu.pipeline_mode<synchronous>, transform_indices = @transform_10, window_bounds = array<i64: 8, 72>}, {pipeline_mode = #tpu.pipeline_mode<synchronous>, transform_indices = @transform_11, window_bounds = array<i64: 8, 1>}, {pipeline_mode = #tpu.pipeline_mode<synchronous>, transform_indices = @transform_12, window_bounds = array<i64: 8, 2>}, {pipeline_mode = #tpu.pipeline_mode<synchronous>, transform_indices = @transform_13, window_bounds = array<i64: 8, 8>}, {pipeline_mode = #tpu.pipeline_mode<synchronous>, transform_indices = @transform_14, window_bounds = array<i64: 8, 1>}, {pipeline_mode = #tpu.pipeline_mode<synchronous>, transform_indices = @transform_15, window_bounds = array<i64: 8, 8>}, {pipeline_mode = #tpu.pipeline_mode<synchronous>, transform_indices = @transform_16, window_bounds = array<i64: 8, 1>}, {pipeline_mode = #tpu.pipeline_mode<synchronous>, transform_indices = @transform_17, window_bounds = array<i64: 2, 8>}, {pipeline_mode = #tpu.pipeline_mode<synchronous>, transform_indices = @transform_18, window_bounds = array<i64: 8, 72>}, {pipeline_mode = #tpu.pipeline_mode<synchronous>, transform_indices = @transform_19, window_bounds = array<i64: 8, 1>}, {pipeline_mode = #tpu.pipeline_mode<synchronous>, transform_indices = @transform_20, window_bounds = array<i64: 8, 32>}, {pipeline_mode = #tpu.pipeline_mode<synchronous>, transform_indices = @transform_21, window_bounds = array<i64: 8, 72>}, {pipeline_mode = #tpu.pipeline_mode<synchronous>, transform_indices = @transform_22, window_bounds = array<i64: 8, 1>}, {pipeline_mode = #tpu.pipeline_mode<synchronous>, transform_indices = @transform_23, window_bounds = array<i64: 32, 128>}, {pipeline_mode = #tpu.pipeline_mode<synchronous>, transform_indices = @transform_24, window_bounds = array<i64: 8, 72>}, {pipeline_mode = #tpu.pipeline_mode<synchronous>, transform_indices = @transform_25, window_bounds = array<i64: 8, 1>}, {pipeline_mode = #tpu.pipeline_mode<synchronous>, transform_indices = @transform_26, window_bounds = array<i64: 128, 512>}, {pipeline_mode = #tpu.pipeline_mode<synchronous>, transform_indices = @transform_27, window_bounds = array<i64: 4, 72>}, {pipeline_mode = #tpu.pipeline_mode<synchronous>, transform_indices = @transform_28, window_bounds = array<i64: 4, 1>}, {transform_indices = @transform_29, window_bounds = array<i64: 1, 4, 512>}]} {
    %c0 = arith.constant 0 : index
    %c0_0 = arith.constant 0 : index
    %c0_1 = arith.constant 0 : index
    %0 = vector.load %arg1[%c0, %c0_0, %c0_1] : memref<1x4x512xf32, #tpu.memory_space<vmem>>, vector<1x4x512xf32>
    %1 = vector.shape_cast %0 : vector<1x4x512xf32> to vector<4x512xf32>
    %cst = arith.constant 0.000000e+00 : f32
    %2 = vector.broadcast %cst : f32 to vector<4x33xf32>
    %3 = tpu.concatenate %2, %1, %2 in 1 : vector<4x33xf32>, vector<4x512xf32>, vector<4x33xf32> -> vector<4x578xf32>
    %4 = tpu.iota {dimensions = array<i32: 1>} : vector<1x512xi32>
    %c15_i32 = arith.constant 15 : i32
    %5 = vector.broadcast %c15_i32 : i32 to vector<1x512xi32>
    %6 = arith.andi %4, %5 : vector<1x512xi32>
    %c1_i32 = arith.constant 1 : i32
    %7 = vector.broadcast %c1_i32 : i32 to vector<1x512xi32>
    %8 = arith.cmpi sge, %6, %7 : vector<1x512xi32>
    %c15_i32_2 = arith.constant 15 : i32
    %9 = vector.broadcast %c15_i32_2 : i32 to vector<1x512xi32>
    %10 = arith.cmpi slt, %6, %9 : vector<1x512xi32>
    %11 = vector.extract_strided_slice %3 {offsets = [0, 0], sizes = [4, 512], strides = [1, 1]} : vector<4x578xf32> to vector<4x512xf32>
    %cst_3 = arith.constant 0.000000e+00 : f32
    %12 = vector.shape_cast %8 : vector<1x512xi1> to vector<1x512xi1>
    %13 = vector.broadcast %12 : vector<1x512xi1> to vector<4x512xi1>
    %14 = vector.broadcast %cst_3 : f32 to vector<4x512xf32>
    %15 = arith.select %13, %11, %14 : vector<4x512xi1>, vector<4x512xf32>
    %16 = vector.extract_strided_slice %3 {offsets = [0, 1], sizes = [4, 512], strides = [1, 1]} : vector<4x578xf32> to vector<4x512xf32>
    %17 = vector.extract_strided_slice %3 {offsets = [0, 2], sizes = [4, 512], strides = [1, 1]} : vector<4x578xf32> to vector<4x512xf32>
    %cst_4 = arith.constant 0.000000e+00 : f32
    %18 = vector.shape_cast %10 : vector<1x512xi1> to vector<1x512xi1>
    %19 = vector.broadcast %18 : vector<1x512xi1> to vector<4x512xi1>
    %20 = vector.broadcast %cst_4 : f32 to vector<4x512xf32>
    %21 = arith.select %19, %17, %20 : vector<4x512xi1>, vector<4x512xf32>
    %22 = vector.extract_strided_slice %3 {offsets = [0, 32], sizes = [4, 512], strides = [1, 1]} : vector<4x578xf32> to vector<4x512xf32>
    %cst_5 = arith.constant 0.000000e+00 : f32
    %23 = vector.shape_cast %8 : vector<1x512xi1> to vector<1x512xi1>
    %24 = vector.broadcast %23 : vector<1x512xi1> to vector<4x512xi1>
    %25 = vector.broadcast %cst_5 : f32 to vector<4x512xf32>
    %26 = arith.select %24, %22, %25 : vector<4x512xi1>, vector<4x512xf32>
    %27 = vector.extract_strided_slice %3 {offsets = [0, 34], sizes = [4, 512], strides = [1, 1]} : vector<4x578xf32> to vector<4x512xf32>
    %cst_6 = arith.constant 0.000000e+00 : f32
    %28 = vector.shape_cast %10 : vector<1x512xi1> to vector<1x512xi1>
    %29 = vector.broadcast %28 : vector<1x512xi1> to vector<4x512xi1>
    %30 = vector.broadcast %cst_6 : f32 to vector<4x512xf32>
    %31 = arith.select %29, %27, %30 : vector<4x512xi1>, vector<4x512xf32>
    %32 = vector.extract_strided_slice %3 {offsets = [0, 64], sizes = [4, 512], strides = [1, 1]} : vector<4x578xf32> to vector<4x512xf32>
    %cst_7 = arith.constant 0.000000e+00 : f32
    %33 = vector.shape_cast %8 : vector<1x512xi1> to vector<1x512xi1>
    %34 = vector.broadcast %33 : vector<1x512xi1> to vector<4x512xi1>
    %35 = vector.broadcast %cst_7 : f32 to vector<4x512xf32>
    %36 = arith.select %34, %32, %35 : vector<4x512xi1>, vector<4x512xf32>
    %37 = vector.extract_strided_slice %3 {offsets = [0, 65], sizes = [4, 512], strides = [1, 1]} : vector<4x578xf32> to vector<4x512xf32>
    %38 = vector.extract_strided_slice %3 {offsets = [0, 66], sizes = [4, 512], strides = [1, 1]} : vector<4x578xf32> to vector<4x512xf32>
    %cst_8 = arith.constant 0.000000e+00 : f32
    %39 = vector.shape_cast %10 : vector<1x512xi1> to vector<1x512xi1>
    %40 = vector.broadcast %39 : vector<1x512xi1> to vector<4x512xi1>
    %41 = vector.broadcast %cst_8 : f32 to vector<4x512xf32>
    %42 = arith.select %40, %38, %41 : vector<4x512xi1>, vector<4x512xf32>
    %43 = tpu.concatenate %15, %16, %21, %26, %1, %31, %36, %37, %42 in 0 : vector<4x512xf32>, vector<4x512xf32>, vector<4x512xf32>, vector<4x512xf32>, vector<4x512xf32>, vector<4x512xf32>, vector<4x512xf32>, vector<4x512xf32>, vector<4x512xf32> -> vector<36x512xf32>
    %c0_9 = arith.constant 0 : index
    %c0_10 = arith.constant 0 : index
    %44 = vector.load %arg2[%c0_9, %c0_10] : memref<8x36xbf16, #tpu.memory_space<vmem>>, vector<8x36xbf16>
    %45 = arith.truncf %43 : vector<36x512xf32> to vector<36x512xbf16>
    %cst_11 = arith.constant dense<0.000000e+00> : vector<8x512xf32>
    %46 = tpu.matmul %44, %45, %cst_11 {dimension_numbers = #tpu.dot_dimension_numbers<[1], [0], [0], [1], [0, 0, 1, 1], [], []>} : vector<8x36xbf16>, vector<36x512xbf16>, vector<8x512xf32> -> vector<8x512xf32>
    %c0_12 = arith.constant 0 : index
    %c0_13 = arith.constant 0 : index
    %47 = vector.load %arg3[%c0_12, %c0_13] : memref<8x1xf32, #tpu.memory_space<vmem>>, vector<8x1xf32>
    %48 = vector.broadcast %47 : vector<8x1xf32> to vector<8x512xf32>
    %49 = arith.addf %46, %48 : vector<8x512xf32>
    %cst_14 = arith.constant 0.000000e+00 : f32
    %50 = vector.broadcast %cst_14 : f32 to vector<8x512xf32>
    %51 = arith.maximumf %49, %50 : vector<8x512xf32>
    %cst_15 = arith.constant 0.000000e+00 : f32
    %52 = vector.broadcast %cst_15 : f32 to vector<8x1xf32>
    %53 = tpu.concatenate %51, %52 in 1 : vector<8x512xf32>, vector<8x1xf32> -> vector<8x513xf32>
    %54 = tpu.iota {dimensions = array<i32: 1>} : vector<1x512xi32>
    %c15_i32_16 = arith.constant 15 : i32
    %55 = vector.broadcast %c15_i32_16 : i32 to vector<1x512xi32>
    %56 = arith.andi %54, %55 : vector<1x512xi32>
    %c15_i32_17 = arith.constant 15 : i32
    %57 = vector.broadcast %c15_i32_17 : i32 to vector<1x512xi32>
    %58 = arith.cmpi slt, %56, %57 : vector<1x512xi32>
    %59 = vector.extract_strided_slice %53 {offsets = [0, 1], sizes = [8, 512], strides = [1, 1]} : vector<8x513xf32> to vector<8x512xf32>
    %cst_18 = arith.constant 0.000000e+00 : f32
    %60 = vector.shape_cast %58 : vector<1x512xi1> to vector<1x512xi1>
    %61 = vector.broadcast %60 : vector<1x512xi1> to vector<8x512xi1>
    %62 = vector.broadcast %cst_18 : f32 to vector<8x512xf32>
    %63 = arith.select %61, %59, %62 : vector<8x512xi1>, vector<8x512xf32>
    %64 = arith.maximumf %51, %63 : vector<8x512xf32>
    %cst_19 = arith.constant 0.000000e+00 : f32
    %65 = vector.broadcast %cst_19 : f32 to vector<8x32xf32>
    %66 = tpu.concatenate %64, %65 in 1 : vector<8x512xf32>, vector<8x32xf32> -> vector<8x544xf32>
    %67 = vector.extract_strided_slice %66 {offsets = [0, 32], sizes = [8, 512], strides = [1, 1]} : vector<8x544xf32> to vector<8x512xf32>
    %68 = arith.maximumf %64, %67 : vector<8x512xf32>
    %c0_20 = arith.constant 0 : index
    %c0_21 = arith.constant 0 : index
    %69 = vector.load %arg4[%c0_20, %c0_21] : memref<512x128xf32, #tpu.memory_space<vmem>>, vector<512x128xf32>
    %cst_22 = arith.constant dense<0.000000e+00> : vector<8x128xf32>
    %70 = tpu.matmul %68, %69, %cst_22 {dimension_numbers = #tpu.dot_dimension_numbers<[1], [0], [0], [1], [0, 0, 1, 1], [], []>} : vector<8x512xf32>, vector<512x128xf32>, vector<8x128xf32> -> vector<8x128xf32>
    %cst_23 = arith.constant 0.000000e+00 : f32
    %71 = vector.broadcast %cst_23 : f32 to vector<8x17xf32>
    %72 = tpu.concatenate %71, %70, %71 in 1 : vector<8x17xf32>, vector<8x128xf32>, vector<8x17xf32> -> vector<8x162xf32>
    %73 = tpu.iota {dimensions = array<i32: 1>} : vector<1x128xi32>
    %c7_i32 = arith.constant 7 : i32
    %74 = vector.broadcast %c7_i32 : i32 to vector<1x128xi32>
    %75 = arith.andi %73, %74 : vector<1x128xi32>
    %c1_i32_24 = arith.constant 1 : i32
    %76 = vector.broadcast %c1_i32_24 : i32 to vector<1x128xi32>
    %77 = arith.cmpi sge, %75, %76 : vector<1x128xi32>
    %c7_i32_25 = arith.constant 7 : i32
    %78 = vector.broadcast %c7_i32_25 : i32 to vector<1x128xi32>
    %79 = arith.cmpi slt, %75, %78 : vector<1x128xi32>
    %80 = vector.extract_strided_slice %72 {offsets = [0, 0], sizes = [8, 128], strides = [1, 1]} : vector<8x162xf32> to vector<8x128xf32>
    %cst_26 = arith.constant 0.000000e+00 : f32
    %81 = vector.shape_cast %77 : vector<1x128xi1> to vector<1x128xi1>
    %82 = vector.broadcast %81 : vector<1x128xi1> to vector<8x128xi1>
    %83 = vector.broadcast %cst_26 : f32 to vector<8x128xf32>
    %84 = arith.select %82, %80, %83 : vector<8x128xi1>, vector<8x128xf32>
    %85 = vector.extract_strided_slice %72 {offsets = [0, 1], sizes = [8, 128], strides = [1, 1]} : vector<8x162xf32> to vector<8x128xf32>
    %86 = vector.extract_strided_slice %72 {offsets = [0, 2], sizes = [8, 128], strides = [1, 1]} : vector<8x162xf32> to vector<8x128xf32>
    %cst_27 = arith.constant 0.000000e+00 : f32
    %87 = vector.shape_cast %79 : vector<1x128xi1> to vector<1x128xi1>
    %88 = vector.broadcast %87 : vector<1x128xi1> to vector<8x128xi1>
    %89 = vector.broadcast %cst_27 : f32 to vector<8x128xf32>
    %90 = arith.select %88, %86, %89 : vector<8x128xi1>, vector<8x128xf32>
    %91 = vector.extract_strided_slice %72 {offsets = [0, 16], sizes = [8, 128], strides = [1, 1]} : vector<8x162xf32> to vector<8x128xf32>
    %cst_28 = arith.constant 0.000000e+00 : f32
    %92 = vector.shape_cast %77 : vector<1x128xi1> to vector<1x128xi1>
    %93 = vector.broadcast %92 : vector<1x128xi1> to vector<8x128xi1>
    %94 = vector.broadcast %cst_28 : f32 to vector<8x128xf32>
    %95 = arith.select %93, %91, %94 : vector<8x128xi1>, vector<8x128xf32>
    %96 = vector.extract_strided_slice %72 {offsets = [0, 18], sizes = [8, 128], strides = [1, 1]} : vector<8x162xf32> to vector<8x128xf32>
    %cst_29 = arith.constant 0.000000e+00 : f32
    %97 = vector.shape_cast %79 : vector<1x128xi1> to vector<1x128xi1>
    %98 = vector.broadcast %97 : vector<1x128xi1> to vector<8x128xi1>
    %99 = vector.broadcast %cst_29 : f32 to vector<8x128xf32>
    %100 = arith.select %98, %96, %99 : vector<8x128xi1>, vector<8x128xf32>
    %101 = vector.extract_strided_slice %72 {offsets = [0, 32], sizes = [8, 128], strides = [1, 1]} : vector<8x162xf32> to vector<8x128xf32>
    %cst_30 = arith.constant 0.000000e+00 : f32
    %102 = vector.shape_cast %77 : vector<1x128xi1> to vector<1x128xi1>
    %103 = vector.broadcast %102 : vector<1x128xi1> to vector<8x128xi1>
    %104 = vector.broadcast %cst_30 : f32 to vector<8x128xf32>
    %105 = arith.select %103, %101, %104 : vector<8x128xi1>, vector<8x128xf32>
    %106 = vector.extract_strided_slice %72 {offsets = [0, 33], sizes = [8, 128], strides = [1, 1]} : vector<8x162xf32> to vector<8x128xf32>
    %107 = vector.extract_strided_slice %72 {offsets = [0, 34], sizes = [8, 128], strides = [1, 1]} : vector<8x162xf32> to vector<8x128xf32>
    %cst_31 = arith.constant 0.000000e+00 : f32
    %108 = vector.shape_cast %79 : vector<1x128xi1> to vector<1x128xi1>
    %109 = vector.broadcast %108 : vector<1x128xi1> to vector<8x128xi1>
    %110 = vector.broadcast %cst_31 : f32 to vector<8x128xf32>
    %111 = arith.select %109, %107, %110 : vector<8x128xi1>, vector<8x128xf32>
    %112 = tpu.concatenate %84, %85, %90, %95, %70, %100, %105, %106, %111 in 0 : vector<8x128xf32>, vector<8x128xf32>, vector<8x128xf32>, vector<8x128xf32>, vector<8x128xf32>, vector<8x128xf32>, vector<8x128xf32>, vector<8x128xf32>, vector<8x128xf32> -> vector<72x128xf32>
    %c0_32 = arith.constant 0 : index
    %c0_33 = arith.constant 0 : index
    %113 = vector.load %arg5[%c0_32, %c0_33] : memref<8x72xbf16, #tpu.memory_space<vmem>>, vector<8x72xbf16>
    %114 = arith.truncf %112 : vector<72x128xf32> to vector<72x128xbf16>
    %cst_34 = arith.constant dense<0.000000e+00> : vector<8x128xf32>
    %115 = tpu.matmul %113, %114, %cst_34 {dimension_numbers = #tpu.dot_dimension_numbers<[1], [0], [0], [1], [0, 0, 1, 1], [], []>} : vector<8x72xbf16>, vector<72x128xbf16>, vector<8x128xf32> -> vector<8x128xf32>
    %c0_35 = arith.constant 0 : index
    %c0_36 = arith.constant 0 : index
    %116 = vector.load %arg6[%c0_35, %c0_36] : memref<8x1xf32, #tpu.memory_space<vmem>>, vector<8x1xf32>
    %117 = vector.broadcast %116 : vector<8x1xf32> to vector<8x128xf32>
    %118 = arith.addf %115, %117 : vector<8x128xf32>
    %cst_37 = arith.constant 0.000000e+00 : f32
    %119 = vector.broadcast %cst_37 : f32 to vector<8x128xf32>
    %120 = arith.maximumf %118, %119 : vector<8x128xf32>
    %cst_38 = arith.constant 0.000000e+00 : f32
    %121 = vector.broadcast %cst_38 : f32 to vector<8x1xf32>
    %122 = tpu.concatenate %120, %121 in 1 : vector<8x128xf32>, vector<8x1xf32> -> vector<8x129xf32>
    %123 = tpu.iota {dimensions = array<i32: 1>} : vector<1x128xi32>
    %c7_i32_39 = arith.constant 7 : i32
    %124 = vector.broadcast %c7_i32_39 : i32 to vector<1x128xi32>
    %125 = arith.andi %123, %124 : vector<1x128xi32>
    %c7_i32_40 = arith.constant 7 : i32
    %126 = vector.broadcast %c7_i32_40 : i32 to vector<1x128xi32>
    %127 = arith.cmpi slt, %125, %126 : vector<1x128xi32>
    %128 = vector.extract_strided_slice %122 {offsets = [0, 1], sizes = [8, 128], strides = [1, 1]} : vector<8x129xf32> to vector<8x128xf32>
    %cst_41 = arith.constant 0.000000e+00 : f32
    %129 = vector.shape_cast %127 : vector<1x128xi1> to vector<1x128xi1>
    %130 = vector.broadcast %129 : vector<1x128xi1> to vector<8x128xi1>
    %131 = vector.broadcast %cst_41 : f32 to vector<8x128xf32>
    %132 = arith.select %130, %128, %131 : vector<8x128xi1>, vector<8x128xf32>
    %133 = arith.maximumf %120, %132 : vector<8x128xf32>
    %cst_42 = arith.constant 0.000000e+00 : f32
    %134 = vector.broadcast %cst_42 : f32 to vector<8x16xf32>
    %135 = tpu.concatenate %133, %134 in 1 : vector<8x128xf32>, vector<8x16xf32> -> vector<8x144xf32>
    %136 = vector.extract_strided_slice %135 {offsets = [0, 16], sizes = [8, 128], strides = [1, 1]} : vector<8x144xf32> to vector<8x128xf32>
    %137 = arith.maximumf %133, %136 : vector<8x128xf32>
    %c0_43 = arith.constant 0 : index
    %c0_44 = arith.constant 0 : index
    %138 = vector.load %arg7[%c0_43, %c0_44] : memref<128x32xf32, #tpu.memory_space<vmem>>, vector<128x32xf32>
    %cst_45 = arith.constant dense<0.000000e+00> : vector<8x32xf32>
    %139 = tpu.matmul %137, %138, %cst_45 {dimension_numbers = #tpu.dot_dimension_numbers<[1], [0], [0], [1], [0, 0, 1, 1], [], []>} : vector<8x128xf32>, vector<128x32xf32>, vector<8x32xf32> -> vector<8x32xf32>
    %cst_46 = arith.constant 0.000000e+00 : f32
    %140 = vector.broadcast %cst_46 : f32 to vector<8x9xf32>
    %141 = tpu.concatenate %140, %139, %140 in 1 : vector<8x9xf32>, vector<8x32xf32>, vector<8x9xf32> -> vector<8x50xf32>
    %142 = tpu.iota {dimensions = array<i32: 1>} : vector<1x32xi32>
    %c3_i32 = arith.constant 3 : i32
    %143 = vector.broadcast %c3_i32 : i32 to vector<1x32xi32>
    %144 = arith.andi %142, %143 : vector<1x32xi32>
    %c1_i32_47 = arith.constant 1 : i32
    %145 = vector.broadcast %c1_i32_47 : i32 to vector<1x32xi32>
    %146 = arith.cmpi sge, %144, %145 : vector<1x32xi32>
    %c3_i32_48 = arith.constant 3 : i32
    %147 = vector.broadcast %c3_i32_48 : i32 to vector<1x32xi32>
    %148 = arith.cmpi slt, %144, %147 : vector<1x32xi32>
    %149 = vector.extract_strided_slice %141 {offsets = [0, 0], sizes = [8, 32], strides = [1, 1]} : vector<8x50xf32> to vector<8x32xf32>
    %cst_49 = arith.constant 0.000000e+00 : f32
    %150 = vector.shape_cast %146 : vector<1x32xi1> to vector<1x32xi1>
    %151 = vector.broadcast %150 : vector<1x32xi1> to vector<8x32xi1>
    %152 = vector.broadcast %cst_49 : f32 to vector<8x32xf32>
    %153 = arith.select %151, %149, %152 : vector<8x32xi1>, vector<8x32xf32>
    %154 = vector.extract_strided_slice %141 {offsets = [0, 1], sizes = [8, 32], strides = [1, 1]} : vector<8x50xf32> to vector<8x32xf32>
    %155 = vector.extract_strided_slice %141 {offsets = [0, 2], sizes = [8, 32], strides = [1, 1]} : vector<8x50xf32> to vector<8x32xf32>
    %cst_50 = arith.constant 0.000000e+00 : f32
    %156 = vector.shape_cast %148 : vector<1x32xi1> to vector<1x32xi1>
    %157 = vector.broadcast %156 : vector<1x32xi1> to vector<8x32xi1>
    %158 = vector.broadcast %cst_50 : f32 to vector<8x32xf32>
    %159 = arith.select %157, %155, %158 : vector<8x32xi1>, vector<8x32xf32>
    %160 = vector.extract_strided_slice %141 {offsets = [0, 8], sizes = [8, 32], strides = [1, 1]} : vector<8x50xf32> to vector<8x32xf32>
    %cst_51 = arith.constant 0.000000e+00 : f32
    %161 = vector.shape_cast %146 : vector<1x32xi1> to vector<1x32xi1>
    %162 = vector.broadcast %161 : vector<1x32xi1> to vector<8x32xi1>
    %163 = vector.broadcast %cst_51 : f32 to vector<8x32xf32>
    %164 = arith.select %162, %160, %163 : vector<8x32xi1>, vector<8x32xf32>
    %165 = vector.extract_strided_slice %141 {offsets = [0, 10], sizes = [8, 32], strides = [1, 1]} : vector<8x50xf32> to vector<8x32xf32>
    %cst_52 = arith.constant 0.000000e+00 : f32
    %166 = vector.shape_cast %148 : vector<1x32xi1> to vector<1x32xi1>
    %167 = vector.broadcast %166 : vector<1x32xi1> to vector<8x32xi1>
    %168 = vector.broadcast %cst_52 : f32 to vector<8x32xf32>
    %169 = arith.select %167, %165, %168 : vector<8x32xi1>, vector<8x32xf32>
    %170 = vector.extract_strided_slice %141 {offsets = [0, 16], sizes = [8, 32], strides = [1, 1]} : vector<8x50xf32> to vector<8x32xf32>
    %cst_53 = arith.constant 0.000000e+00 : f32
    %171 = vector.shape_cast %146 : vector<1x32xi1> to vector<1x32xi1>
    %172 = vector.broadcast %171 : vector<1x32xi1> to vector<8x32xi1>
    %173 = vector.broadcast %cst_53 : f32 to vector<8x32xf32>
    %174 = arith.select %172, %170, %173 : vector<8x32xi1>, vector<8x32xf32>
    %175 = vector.extract_strided_slice %141 {offsets = [0, 17], sizes = [8, 32], strides = [1, 1]} : vector<8x50xf32> to vector<8x32xf32>
    %176 = vector.extract_strided_slice %141 {offsets = [0, 18], sizes = [8, 32], strides = [1, 1]} : vector<8x50xf32> to vector<8x32xf32>
    %cst_54 = arith.constant 0.000000e+00 : f32
    %177 = vector.shape_cast %148 : vector<1x32xi1> to vector<1x32xi1>
    %178 = vector.broadcast %177 : vector<1x32xi1> to vector<8x32xi1>
    %179 = vector.broadcast %cst_54 : f32 to vector<8x32xf32>
    %180 = arith.select %178, %176, %179 : vector<8x32xi1>, vector<8x32xf32>
    %181 = tpu.concatenate %153, %154, %159, %164, %139, %169, %174, %175, %180 in 0 : vector<8x32xf32>, vector<8x32xf32>, vector<8x32xf32>, vector<8x32xf32>, vector<8x32xf32>, vector<8x32xf32>, vector<8x32xf32>, vector<8x32xf32>, vector<8x32xf32> -> vector<72x32xf32>
    %c0_55 = arith.constant 0 : index
    %c0_56 = arith.constant 0 : index
    %182 = vector.load %arg8[%c0_55, %c0_56] : memref<8x72xbf16, #tpu.memory_space<vmem>>, vector<8x72xbf16>
    %183 = arith.truncf %181 : vector<72x32xf32> to vector<72x32xbf16>
    %cst_57 = arith.constant dense<0.000000e+00> : vector<8x32xf32>
    %184 = tpu.matmul %182, %183, %cst_57 {dimension_numbers = #tpu.dot_dimension_numbers<[1], [0], [0], [1], [0, 0, 1, 1], [], []>} : vector<8x72xbf16>, vector<72x32xbf16>, vector<8x32xf32> -> vector<8x32xf32>
    %c0_58 = arith.constant 0 : index
    %c0_59 = arith.constant 0 : index
    %185 = vector.load %arg9[%c0_58, %c0_59] : memref<8x1xf32, #tpu.memory_space<vmem>>, vector<8x1xf32>
    %186 = vector.broadcast %185 : vector<8x1xf32> to vector<8x32xf32>
    %187 = arith.addf %184, %186 : vector<8x32xf32>
    %cst_60 = arith.constant 0.000000e+00 : f32
    %188 = vector.broadcast %cst_60 : f32 to vector<8x32xf32>
    %189 = arith.maximumf %187, %188 : vector<8x32xf32>
    %cst_61 = arith.constant 0.000000e+00 : f32
    %190 = vector.broadcast %cst_61 : f32 to vector<8x1xf32>
    %191 = tpu.concatenate %189, %190 in 1 : vector<8x32xf32>, vector<8x1xf32> -> vector<8x33xf32>
    %192 = tpu.iota {dimensions = array<i32: 1>} : vector<1x32xi32>
    %c3_i32_62 = arith.constant 3 : i32
    %193 = vector.broadcast %c3_i32_62 : i32 to vector<1x32xi32>
    %194 = arith.andi %192, %193 : vector<1x32xi32>
    %c3_i32_63 = arith.constant 3 : i32
    %195 = vector.broadcast %c3_i32_63 : i32 to vector<1x32xi32>
    %196 = arith.cmpi slt, %194, %195 : vector<1x32xi32>
    %197 = vector.extract_strided_slice %191 {offsets = [0, 1], sizes = [8, 32], strides = [1, 1]} : vector<8x33xf32> to vector<8x32xf32>
    %cst_64 = arith.constant 0.000000e+00 : f32
    %198 = vector.shape_cast %196 : vector<1x32xi1> to vector<1x32xi1>
    %199 = vector.broadcast %198 : vector<1x32xi1> to vector<8x32xi1>
    %200 = vector.broadcast %cst_64 : f32 to vector<8x32xf32>
    %201 = arith.select %199, %197, %200 : vector<8x32xi1>, vector<8x32xf32>
    %202 = arith.maximumf %189, %201 : vector<8x32xf32>
    %cst_65 = arith.constant 0.000000e+00 : f32
    %203 = vector.broadcast %cst_65 : f32 to vector<8x8xf32>
    %204 = tpu.concatenate %202, %203 in 1 : vector<8x32xf32>, vector<8x8xf32> -> vector<8x40xf32>
    %205 = vector.extract_strided_slice %204 {offsets = [0, 8], sizes = [8, 32], strides = [1, 1]} : vector<8x40xf32> to vector<8x32xf32>
    %206 = arith.maximumf %202, %205 : vector<8x32xf32>
    %c0_66 = arith.constant 0 : index
    %c0_67 = arith.constant 0 : index
    %207 = vector.load %arg10[%c0_66, %c0_67] : memref<32x8xf32, #tpu.memory_space<vmem>>, vector<32x8xf32>
    %cst_68 = arith.constant dense<0.000000e+00> : vector<8x8xf32>
    %208 = tpu.matmul %206, %207, %cst_68 {dimension_numbers = #tpu.dot_dimension_numbers<[1], [0], [0], [1], [0, 0, 1, 1], [], []>} : vector<8x32xf32>, vector<32x8xf32>, vector<8x8xf32> -> vector<8x8xf32>
    %cst_69 = arith.constant 0.000000e+00 : f32
    %209 = vector.broadcast %cst_69 : f32 to vector<8x5xf32>
    %210 = tpu.concatenate %209, %208, %209 in 1 : vector<8x5xf32>, vector<8x8xf32>, vector<8x5xf32> -> vector<8x18xf32>
    %211 = tpu.iota {dimensions = array<i32: 1>} : vector<1x8xi32>
    %c1_i32_70 = arith.constant 1 : i32
    %212 = vector.broadcast %c1_i32_70 : i32 to vector<1x8xi32>
    %213 = arith.andi %211, %212 : vector<1x8xi32>
    %c1_i32_71 = arith.constant 1 : i32
    %214 = vector.broadcast %c1_i32_71 : i32 to vector<1x8xi32>
    %215 = arith.cmpi sge, %213, %214 : vector<1x8xi32>
    %c1_i32_72 = arith.constant 1 : i32
    %216 = vector.broadcast %c1_i32_72 : i32 to vector<1x8xi32>
    %217 = arith.cmpi slt, %213, %216 : vector<1x8xi32>
    %218 = vector.extract_strided_slice %210 {offsets = [0, 0], sizes = [8, 8], strides = [1, 1]} : vector<8x18xf32> to vector<8x8xf32>
    %cst_73 = arith.constant 0.000000e+00 : f32
    %219 = vector.shape_cast %215 : vector<1x8xi1> to vector<1x8xi1>
    %220 = vector.broadcast %219 : vector<1x8xi1> to vector<8x8xi1>
    %221 = vector.broadcast %cst_73 : f32 to vector<8x8xf32>
    %222 = arith.select %220, %218, %221 : vector<8x8xi1>, vector<8x8xf32>
    %223 = vector.extract_strided_slice %210 {offsets = [0, 1], sizes = [8, 8], strides = [1, 1]} : vector<8x18xf32> to vector<8x8xf32>
    %224 = vector.extract_strided_slice %210 {offsets = [0, 2], sizes = [8, 8], strides = [1, 1]} : vector<8x18xf32> to vector<8x8xf32>
    %cst_74 = arith.constant 0.000000e+00 : f32
    %225 = vector.shape_cast %217 : vector<1x8xi1> to vector<1x8xi1>
    %226 = vector.broadcast %225 : vector<1x8xi1> to vector<8x8xi1>
    %227 = vector.broadcast %cst_74 : f32 to vector<8x8xf32>
    %228 = arith.select %226, %224, %227 : vector<8x8xi1>, vector<8x8xf32>
    %229 = vector.extract_strided_slice %210 {offsets = [0, 4], sizes = [8, 8], strides = [1, 1]} : vector<8x18xf32> to vector<8x8xf32>
    %cst_75 = arith.constant 0.000000e+00 : f32
    %230 = vector.shape_cast %215 : vector<1x8xi1> to vector<1x8xi1>
    %231 = vector.broadcast %230 : vector<1x8xi1> to vector<8x8xi1>
    %232 = vector.broadcast %cst_75 : f32 to vector<8x8xf32>
    %233 = arith.select %231, %229, %232 : vector<8x8xi1>, vector<8x8xf32>
    %234 = vector.extract_strided_slice %210 {offsets = [0, 6], sizes = [8, 8], strides = [1, 1]} : vector<8x18xf32> to vector<8x8xf32>
    %cst_76 = arith.constant 0.000000e+00 : f32
    %235 = vector.shape_cast %217 : vector<1x8xi1> to vector<1x8xi1>
    %236 = vector.broadcast %235 : vector<1x8xi1> to vector<8x8xi1>
    %237 = vector.broadcast %cst_76 : f32 to vector<8x8xf32>
    %238 = arith.select %236, %234, %237 : vector<8x8xi1>, vector<8x8xf32>
    %239 = vector.extract_strided_slice %210 {offsets = [0, 8], sizes = [8, 8], strides = [1, 1]} : vector<8x18xf32> to vector<8x8xf32>
    %cst_77 = arith.constant 0.000000e+00 : f32
    %240 = vector.shape_cast %215 : vector<1x8xi1> to vector<1x8xi1>
    %241 = vector.broadcast %240 : vector<1x8xi1> to vector<8x8xi1>
    %242 = vector.broadcast %cst_77 : f32 to vector<8x8xf32>
    %243 = arith.select %241, %239, %242 : vector<8x8xi1>, vector<8x8xf32>
    %244 = vector.extract_strided_slice %210 {offsets = [0, 9], sizes = [8, 8], strides = [1, 1]} : vector<8x18xf32> to vector<8x8xf32>
    %245 = vector.extract_strided_slice %210 {offsets = [0, 10], sizes = [8, 8], strides = [1, 1]} : vector<8x18xf32> to vector<8x8xf32>
    %cst_78 = arith.constant 0.000000e+00 : f32
    %246 = vector.shape_cast %217 : vector<1x8xi1> to vector<1x8xi1>
    %247 = vector.broadcast %246 : vector<1x8xi1> to vector<8x8xi1>
    %248 = vector.broadcast %cst_78 : f32 to vector<8x8xf32>
    %249 = arith.select %247, %245, %248 : vector<8x8xi1>, vector<8x8xf32>
    %250 = tpu.concatenate %222, %223, %228, %233, %208, %238, %243, %244, %249 in 0 : vector<8x8xf32>, vector<8x8xf32>, vector<8x8xf32>, vector<8x8xf32>, vector<8x8xf32>, vector<8x8xf32>, vector<8x8xf32>, vector<8x8xf32>, vector<8x8xf32> -> vector<72x8xf32>
    %c0_79 = arith.constant 0 : index
    %c0_80 = arith.constant 0 : index
    %251 = vector.load %arg11[%c0_79, %c0_80] : memref<8x72xbf16, #tpu.memory_space<vmem>>, vector<8x72xbf16>
    %252 = arith.truncf %250 : vector<72x8xf32> to vector<72x8xbf16>
    %cst_81 = arith.constant dense<0.000000e+00> : vector<8x8xf32>
    %253 = tpu.matmul %251, %252, %cst_81 {dimension_numbers = #tpu.dot_dimension_numbers<[1], [0], [0], [1], [0, 0, 1, 1], [], []>} : vector<8x72xbf16>, vector<72x8xbf16>, vector<8x8xf32> -> vector<8x8xf32>
    %c0_82 = arith.constant 0 : index
    %c0_83 = arith.constant 0 : index
    %254 = vector.load %arg12[%c0_82, %c0_83] : memref<8x1xf32, #tpu.memory_space<vmem>>, vector<8x1xf32>
    %255 = vector.broadcast %254 : vector<8x1xf32> to vector<8x8xf32>
    %256 = arith.addf %253, %255 : vector<8x8xf32>
    %cst_84 = arith.constant 0.000000e+00 : f32
    %257 = vector.broadcast %cst_84 : f32 to vector<8x8xf32>
    %258 = arith.maximumf %256, %257 : vector<8x8xf32>
    %cst_85 = arith.constant 0.000000e+00 : f32
    %259 = vector.broadcast %cst_85 : f32 to vector<8x1xf32>
    %260 = tpu.concatenate %258, %259 in 1 : vector<8x8xf32>, vector<8x1xf32> -> vector<8x9xf32>
    %261 = tpu.iota {dimensions = array<i32: 1>} : vector<1x8xi32>
    %c1_i32_86 = arith.constant 1 : i32
    %262 = vector.broadcast %c1_i32_86 : i32 to vector<1x8xi32>
    %263 = arith.andi %261, %262 : vector<1x8xi32>
    %c1_i32_87 = arith.constant 1 : i32
    %264 = vector.broadcast %c1_i32_87 : i32 to vector<1x8xi32>
    %265 = arith.cmpi slt, %263, %264 : vector<1x8xi32>
    %266 = vector.extract_strided_slice %260 {offsets = [0, 1], sizes = [8, 8], strides = [1, 1]} : vector<8x9xf32> to vector<8x8xf32>
    %cst_88 = arith.constant 0.000000e+00 : f32
    %267 = vector.shape_cast %265 : vector<1x8xi1> to vector<1x8xi1>
    %268 = vector.broadcast %267 : vector<1x8xi1> to vector<8x8xi1>
    %269 = vector.broadcast %cst_88 : f32 to vector<8x8xf32>
    %270 = arith.select %268, %266, %269 : vector<8x8xi1>, vector<8x8xf32>
    %271 = arith.maximumf %258, %270 : vector<8x8xf32>
    %cst_89 = arith.constant 0.000000e+00 : f32
    %272 = vector.broadcast %cst_89 : f32 to vector<8x4xf32>
    %273 = tpu.concatenate %271, %272 in 1 : vector<8x8xf32>, vector<8x4xf32> -> vector<8x12xf32>
    %274 = vector.extract_strided_slice %273 {offsets = [0, 4], sizes = [8, 8], strides = [1, 1]} : vector<8x12xf32> to vector<8x8xf32>
    %275 = arith.maximumf %271, %274 : vector<8x8xf32>
    %c0_90 = arith.constant 0 : index
    %c0_91 = arith.constant 0 : index
    %276 = vector.load %arg13[%c0_90, %c0_91] : memref<8x2xf32, #tpu.memory_space<vmem>>, vector<8x2xf32>
    %cst_92 = arith.constant dense<0.000000e+00> : vector<8x2xf32>
    %277 = tpu.matmul %275, %276, %cst_92 {dimension_numbers = #tpu.dot_dimension_numbers<[1], [0], [0], [1], [0, 0, 1, 1], [], []>} : vector<8x8xf32>, vector<8x2xf32>, vector<8x2xf32> -> vector<8x2xf32>
    %c0_93 = arith.constant 0 : index
    %c0_94 = arith.constant 0 : index
    %278 = vector.load %arg14[%c0_93, %c0_94] : memref<8x8xbf16, #tpu.memory_space<vmem>>, vector<8x8xbf16>
    %279 = arith.truncf %277 : vector<8x2xf32> to vector<8x2xbf16>
    %cst_95 = arith.constant dense<0.000000e+00> : vector<8x2xf32>
    %280 = tpu.matmul %278, %279, %cst_95 {dimension_numbers = #tpu.dot_dimension_numbers<[1], [0], [0], [1], [0, 0, 1, 1], [], []>} : vector<8x8xbf16>, vector<8x2xbf16>, vector<8x2xf32> -> vector<8x2xf32>
    %c0_96 = arith.constant 0 : index
    %c0_97 = arith.constant 0 : index
    %281 = vector.load %arg15[%c0_96, %c0_97] : memref<8x1xf32, #tpu.memory_space<vmem>>, vector<8x1xf32>
    %282 = vector.broadcast %281 : vector<8x1xf32> to vector<8x2xf32>
    %283 = arith.addf %280, %282 : vector<8x2xf32>
    %cst_98 = arith.constant 0.000000e+00 : f32
    %284 = vector.broadcast %cst_98 : f32 to vector<8x2xf32>
    %285 = arith.maximumf %283, %284 : vector<8x2xf32>
    %c0_99 = arith.constant 0 : index
    %c0_100 = arith.constant 0 : index
    %286 = vector.load %arg16[%c0_99, %c0_100] : memref<8x8xbf16, #tpu.memory_space<vmem>>, vector<8x8xbf16>
    %287 = arith.truncf %285 : vector<8x2xf32> to vector<8x2xbf16>
    %cst_101 = arith.constant dense<0.000000e+00> : vector<8x2xf32>
    %288 = tpu.matmul %286, %287, %cst_101 {dimension_numbers = #tpu.dot_dimension_numbers<[1], [0], [0], [1], [0, 0, 1, 1], [], []>} : vector<8x8xbf16>, vector<8x2xbf16>, vector<8x2xf32> -> vector<8x2xf32>
    %c0_102 = arith.constant 0 : index
    %c0_103 = arith.constant 0 : index
    %289 = vector.load %arg17[%c0_102, %c0_103] : memref<8x1xf32, #tpu.memory_space<vmem>>, vector<8x1xf32>
    %290 = vector.broadcast %289 : vector<8x1xf32> to vector<8x2xf32>
    %291 = arith.addf %288, %290 : vector<8x2xf32>
    %cst_104 = arith.constant 0.000000e+00 : f32
    %292 = vector.broadcast %cst_104 : f32 to vector<8x2xf32>
    %293 = arith.maximumf %291, %292 : vector<8x2xf32>
    %294 = arith.addf %293, %277 : vector<8x2xf32>
    %c0_105 = arith.constant 0 : index
    %c0_106 = arith.constant 0 : index
    %295 = vector.load %arg18[%c0_105, %c0_106] : memref<2x8xf32, #tpu.memory_space<vmem>>, vector<2x8xf32>
    %cst_107 = arith.constant dense<0.000000e+00> : vector<8x8xf32>
    %296 = tpu.matmul %294, %295, %cst_107 {dimension_numbers = #tpu.dot_dimension_numbers<[1], [0], [0], [1], [0, 0, 1, 1], [], []>} : vector<8x2xf32>, vector<2x8xf32>, vector<8x8xf32> -> vector<8x8xf32>
    %cst_108 = arith.constant 0.000000e+00 : f32
    %297 = vector.broadcast %cst_108 : f32 to vector<8x5xf32>
    %298 = tpu.concatenate %297, %296, %297 in 1 : vector<8x5xf32>, vector<8x8xf32>, vector<8x5xf32> -> vector<8x18xf32>
    %299 = tpu.iota {dimensions = array<i32: 1>} : vector<1x8xi32>
    %c1_i32_109 = arith.constant 1 : i32
    %300 = vector.broadcast %c1_i32_109 : i32 to vector<1x8xi32>
    %301 = arith.andi %299, %300 : vector<1x8xi32>
    %c1_i32_110 = arith.constant 1 : i32
    %302 = vector.broadcast %c1_i32_110 : i32 to vector<1x8xi32>
    %303 = arith.cmpi sge, %301, %302 : vector<1x8xi32>
    %c1_i32_111 = arith.constant 1 : i32
    %304 = vector.broadcast %c1_i32_111 : i32 to vector<1x8xi32>
    %305 = arith.cmpi slt, %301, %304 : vector<1x8xi32>
    %306 = vector.extract_strided_slice %298 {offsets = [0, 0], sizes = [8, 8], strides = [1, 1]} : vector<8x18xf32> to vector<8x8xf32>
    %cst_112 = arith.constant 0.000000e+00 : f32
    %307 = vector.shape_cast %303 : vector<1x8xi1> to vector<1x8xi1>
    %308 = vector.broadcast %307 : vector<1x8xi1> to vector<8x8xi1>
    %309 = vector.broadcast %cst_112 : f32 to vector<8x8xf32>
    %310 = arith.select %308, %306, %309 : vector<8x8xi1>, vector<8x8xf32>
    %311 = vector.extract_strided_slice %298 {offsets = [0, 1], sizes = [8, 8], strides = [1, 1]} : vector<8x18xf32> to vector<8x8xf32>
    %312 = vector.extract_strided_slice %298 {offsets = [0, 2], sizes = [8, 8], strides = [1, 1]} : vector<8x18xf32> to vector<8x8xf32>
    %cst_113 = arith.constant 0.000000e+00 : f32
    %313 = vector.shape_cast %305 : vector<1x8xi1> to vector<1x8xi1>
    %314 = vector.broadcast %313 : vector<1x8xi1> to vector<8x8xi1>
    %315 = vector.broadcast %cst_113 : f32 to vector<8x8xf32>
    %316 = arith.select %314, %312, %315 : vector<8x8xi1>, vector<8x8xf32>
    %317 = vector.extract_strided_slice %298 {offsets = [0, 4], sizes = [8, 8], strides = [1, 1]} : vector<8x18xf32> to vector<8x8xf32>
    %cst_114 = arith.constant 0.000000e+00 : f32
    %318 = vector.shape_cast %303 : vector<1x8xi1> to vector<1x8xi1>
    %319 = vector.broadcast %318 : vector<1x8xi1> to vector<8x8xi1>
    %320 = vector.broadcast %cst_114 : f32 to vector<8x8xf32>
    %321 = arith.select %319, %317, %320 : vector<8x8xi1>, vector<8x8xf32>
    %322 = vector.extract_strided_slice %298 {offsets = [0, 6], sizes = [8, 8], strides = [1, 1]} : vector<8x18xf32> to vector<8x8xf32>
    %cst_115 = arith.constant 0.000000e+00 : f32
    %323 = vector.shape_cast %305 : vector<1x8xi1> to vector<1x8xi1>
    %324 = vector.broadcast %323 : vector<1x8xi1> to vector<8x8xi1>
    %325 = vector.broadcast %cst_115 : f32 to vector<8x8xf32>
    %326 = arith.select %324, %322, %325 : vector<8x8xi1>, vector<8x8xf32>
    %327 = vector.extract_strided_slice %298 {offsets = [0, 8], sizes = [8, 8], strides = [1, 1]} : vector<8x18xf32> to vector<8x8xf32>
    %cst_116 = arith.constant 0.000000e+00 : f32
    %328 = vector.shape_cast %303 : vector<1x8xi1> to vector<1x8xi1>
    %329 = vector.broadcast %328 : vector<1x8xi1> to vector<8x8xi1>
    %330 = vector.broadcast %cst_116 : f32 to vector<8x8xf32>
    %331 = arith.select %329, %327, %330 : vector<8x8xi1>, vector<8x8xf32>
    %332 = vector.extract_strided_slice %298 {offsets = [0, 9], sizes = [8, 8], strides = [1, 1]} : vector<8x18xf32> to vector<8x8xf32>
    %333 = vector.extract_strided_slice %298 {offsets = [0, 10], sizes = [8, 8], strides = [1, 1]} : vector<8x18xf32> to vector<8x8xf32>
    %cst_117 = arith.constant 0.000000e+00 : f32
    %334 = vector.shape_cast %305 : vector<1x8xi1> to vector<1x8xi1>
    %335 = vector.broadcast %334 : vector<1x8xi1> to vector<8x8xi1>
    %336 = vector.broadcast %cst_117 : f32 to vector<8x8xf32>
    %337 = arith.select %335, %333, %336 : vector<8x8xi1>, vector<8x8xf32>
    %338 = tpu.concatenate %310, %311, %316, %321, %296, %326, %331, %332, %337 in 0 : vector<8x8xf32>, vector<8x8xf32>, vector<8x8xf32>, vector<8x8xf32>, vector<8x8xf32>, vector<8x8xf32>, vector<8x8xf32>, vector<8x8xf32>, vector<8x8xf32> -> vector<72x8xf32>
    %c0_118 = arith.constant 0 : index
    %c0_119 = arith.constant 0 : index
    %339 = vector.load %arg19[%c0_118, %c0_119] : memref<8x72xbf16, #tpu.memory_space<vmem>>, vector<8x72xbf16>
    %340 = arith.truncf %338 : vector<72x8xf32> to vector<72x8xbf16>
    %cst_120 = arith.constant dense<0.000000e+00> : vector<8x8xf32>
    %341 = tpu.matmul %339, %340, %cst_120 {dimension_numbers = #tpu.dot_dimension_numbers<[1], [0], [0], [1], [0, 0, 1, 1], [], []>} : vector<8x72xbf16>, vector<72x8xbf16>, vector<8x8xf32> -> vector<8x8xf32>
    %c0_121 = arith.constant 0 : index
    %c0_122 = arith.constant 0 : index
    %342 = vector.load %arg20[%c0_121, %c0_122] : memref<8x1xf32, #tpu.memory_space<vmem>>, vector<8x1xf32>
    %343 = vector.broadcast %342 : vector<8x1xf32> to vector<8x8xf32>
    %344 = arith.addf %341, %343 : vector<8x8xf32>
    %cst_123 = arith.constant 0.000000e+00 : f32
    %345 = vector.broadcast %cst_123 : f32 to vector<8x8xf32>
    %346 = arith.maximumf %344, %345 : vector<8x8xf32>
    %347 = arith.addf %346, %208 : vector<8x8xf32>
    %c0_124 = arith.constant 0 : index
    %c0_125 = arith.constant 0 : index
    %348 = vector.load %arg21[%c0_124, %c0_125] : memref<8x32xf32, #tpu.memory_space<vmem>>, vector<8x32xf32>
    %cst_126 = arith.constant dense<0.000000e+00> : vector<8x32xf32>
    %349 = tpu.matmul %347, %348, %cst_126 {dimension_numbers = #tpu.dot_dimension_numbers<[1], [0], [0], [1], [0, 0, 1, 1], [], []>} : vector<8x8xf32>, vector<8x32xf32>, vector<8x32xf32> -> vector<8x32xf32>
    %cst_127 = arith.constant 0.000000e+00 : f32
    %350 = vector.broadcast %cst_127 : f32 to vector<8x9xf32>
    %351 = tpu.concatenate %350, %349, %350 in 1 : vector<8x9xf32>, vector<8x32xf32>, vector<8x9xf32> -> vector<8x50xf32>
    %352 = tpu.iota {dimensions = array<i32: 1>} : vector<1x32xi32>
    %c3_i32_128 = arith.constant 3 : i32
    %353 = vector.broadcast %c3_i32_128 : i32 to vector<1x32xi32>
    %354 = arith.andi %352, %353 : vector<1x32xi32>
    %c1_i32_129 = arith.constant 1 : i32
    %355 = vector.broadcast %c1_i32_129 : i32 to vector<1x32xi32>
    %356 = arith.cmpi sge, %354, %355 : vector<1x32xi32>
    %c3_i32_130 = arith.constant 3 : i32
    %357 = vector.broadcast %c3_i32_130 : i32 to vector<1x32xi32>
    %358 = arith.cmpi slt, %354, %357 : vector<1x32xi32>
    %359 = vector.extract_strided_slice %351 {offsets = [0, 0], sizes = [8, 32], strides = [1, 1]} : vector<8x50xf32> to vector<8x32xf32>
    %cst_131 = arith.constant 0.000000e+00 : f32
    %360 = vector.shape_cast %356 : vector<1x32xi1> to vector<1x32xi1>
    %361 = vector.broadcast %360 : vector<1x32xi1> to vector<8x32xi1>
    %362 = vector.broadcast %cst_131 : f32 to vector<8x32xf32>
    %363 = arith.select %361, %359, %362 : vector<8x32xi1>, vector<8x32xf32>
    %364 = vector.extract_strided_slice %351 {offsets = [0, 1], sizes = [8, 32], strides = [1, 1]} : vector<8x50xf32> to vector<8x32xf32>
    %365 = vector.extract_strided_slice %351 {offsets = [0, 2], sizes = [8, 32], strides = [1, 1]} : vector<8x50xf32> to vector<8x32xf32>
    %cst_132 = arith.constant 0.000000e+00 : f32
    %366 = vector.shape_cast %358 : vector<1x32xi1> to vector<1x32xi1>
    %367 = vector.broadcast %366 : vector<1x32xi1> to vector<8x32xi1>
    %368 = vector.broadcast %cst_132 : f32 to vector<8x32xf32>
    %369 = arith.select %367, %365, %368 : vector<8x32xi1>, vector<8x32xf32>
    %370 = vector.extract_strided_slice %351 {offsets = [0, 8], sizes = [8, 32], strides = [1, 1]} : vector<8x50xf32> to vector<8x32xf32>
    %cst_133 = arith.constant 0.000000e+00 : f32
    %371 = vector.shape_cast %356 : vector<1x32xi1> to vector<1x32xi1>
    %372 = vector.broadcast %371 : vector<1x32xi1> to vector<8x32xi1>
    %373 = vector.broadcast %cst_133 : f32 to vector<8x32xf32>
    %374 = arith.select %372, %370, %373 : vector<8x32xi1>, vector<8x32xf32>
    %375 = vector.extract_strided_slice %351 {offsets = [0, 10], sizes = [8, 32], strides = [1, 1]} : vector<8x50xf32> to vector<8x32xf32>
    %cst_134 = arith.constant 0.000000e+00 : f32
    %376 = vector.shape_cast %358 : vector<1x32xi1> to vector<1x32xi1>
    %377 = vector.broadcast %376 : vector<1x32xi1> to vector<8x32xi1>
    %378 = vector.broadcast %cst_134 : f32 to vector<8x32xf32>
    %379 = arith.select %377, %375, %378 : vector<8x32xi1>, vector<8x32xf32>
    %380 = vector.extract_strided_slice %351 {offsets = [0, 16], sizes = [8, 32], strides = [1, 1]} : vector<8x50xf32> to vector<8x32xf32>
    %cst_135 = arith.constant 0.000000e+00 : f32
    %381 = vector.shape_cast %356 : vector<1x32xi1> to vector<1x32xi1>
    %382 = vector.broadcast %381 : vector<1x32xi1> to vector<8x32xi1>
    %383 = vector.broadcast %cst_135 : f32 to vector<8x32xf32>
    %384 = arith.select %382, %380, %383 : vector<8x32xi1>, vector<8x32xf32>
    %385 = vector.extract_strided_slice %351 {offsets = [0, 17], sizes = [8, 32], strides = [1, 1]} : vector<8x50xf32> to vector<8x32xf32>
    %386 = vector.extract_strided_slice %351 {offsets = [0, 18], sizes = [8, 32], strides = [1, 1]} : vector<8x50xf32> to vector<8x32xf32>
    %cst_136 = arith.constant 0.000000e+00 : f32
    %387 = vector.shape_cast %358 : vector<1x32xi1> to vector<1x32xi1>
    %388 = vector.broadcast %387 : vector<1x32xi1> to vector<8x32xi1>
    %389 = vector.broadcast %cst_136 : f32 to vector<8x32xf32>
    %390 = arith.select %388, %386, %389 : vector<8x32xi1>, vector<8x32xf32>
    %391 = tpu.concatenate %363, %364, %369, %374, %349, %379, %384, %385, %390 in 0 : vector<8x32xf32>, vector<8x32xf32>, vector<8x32xf32>, vector<8x32xf32>, vector<8x32xf32>, vector<8x32xf32>, vector<8x32xf32>, vector<8x32xf32>, vector<8x32xf32> -> vector<72x32xf32>
    %c0_137 = arith.constant 0 : index
    %c0_138 = arith.constant 0 : index
    %392 = vector.load %arg22[%c0_137, %c0_138] : memref<8x72xbf16, #tpu.memory_space<vmem>>, vector<8x72xbf16>
    %393 = arith.truncf %391 : vector<72x32xf32> to vector<72x32xbf16>
    %cst_139 = arith.constant dense<0.000000e+00> : vector<8x32xf32>
    %394 = tpu.matmul %392, %393, %cst_139 {dimension_numbers = #tpu.dot_dimension_numbers<[1], [0], [0], [1], [0, 0, 1, 1], [], []>} : vector<8x72xbf16>, vector<72x32xbf16>, vector<8x32xf32> -> vector<8x32xf32>
    %c0_140 = arith.constant 0 : index
    %c0_141 = arith.constant 0 : index
    %395 = vector.load %arg23[%c0_140, %c0_141] : memref<8x1xf32, #tpu.memory_space<vmem>>, vector<8x1xf32>
    %396 = vector.broadcast %395 : vector<8x1xf32> to vector<8x32xf32>
    %397 = arith.addf %394, %396 : vector<8x32xf32>
    %cst_142 = arith.constant 0.000000e+00 : f32
    %398 = vector.broadcast %cst_142 : f32 to vector<8x32xf32>
    %399 = arith.maximumf %397, %398 : vector<8x32xf32>
    %400 = arith.addf %399, %139 : vector<8x32xf32>
    %c0_143 = arith.constant 0 : index
    %c0_144 = arith.constant 0 : index
    %401 = vector.load %arg24[%c0_143, %c0_144] : memref<32x128xf32, #tpu.memory_space<vmem>>, vector<32x128xf32>
    %cst_145 = arith.constant dense<0.000000e+00> : vector<8x128xf32>
    %402 = tpu.matmul %400, %401, %cst_145 {dimension_numbers = #tpu.dot_dimension_numbers<[1], [0], [0], [1], [0, 0, 1, 1], [], []>} : vector<8x32xf32>, vector<32x128xf32>, vector<8x128xf32> -> vector<8x128xf32>
    %cst_146 = arith.constant 0.000000e+00 : f32
    %403 = vector.broadcast %cst_146 : f32 to vector<8x17xf32>
    %404 = tpu.concatenate %403, %402, %403 in 1 : vector<8x17xf32>, vector<8x128xf32>, vector<8x17xf32> -> vector<8x162xf32>
    %405 = tpu.iota {dimensions = array<i32: 1>} : vector<1x128xi32>
    %c7_i32_147 = arith.constant 7 : i32
    %406 = vector.broadcast %c7_i32_147 : i32 to vector<1x128xi32>
    %407 = arith.andi %405, %406 : vector<1x128xi32>
    %c1_i32_148 = arith.constant 1 : i32
    %408 = vector.broadcast %c1_i32_148 : i32 to vector<1x128xi32>
    %409 = arith.cmpi sge, %407, %408 : vector<1x128xi32>
    %c7_i32_149 = arith.constant 7 : i32
    %410 = vector.broadcast %c7_i32_149 : i32 to vector<1x128xi32>
    %411 = arith.cmpi slt, %407, %410 : vector<1x128xi32>
    %412 = vector.extract_strided_slice %404 {offsets = [0, 0], sizes = [8, 128], strides = [1, 1]} : vector<8x162xf32> to vector<8x128xf32>
    %cst_150 = arith.constant 0.000000e+00 : f32
    %413 = vector.shape_cast %409 : vector<1x128xi1> to vector<1x128xi1>
    %414 = vector.broadcast %413 : vector<1x128xi1> to vector<8x128xi1>
    %415 = vector.broadcast %cst_150 : f32 to vector<8x128xf32>
    %416 = arith.select %414, %412, %415 : vector<8x128xi1>, vector<8x128xf32>
    %417 = vector.extract_strided_slice %404 {offsets = [0, 1], sizes = [8, 128], strides = [1, 1]} : vector<8x162xf32> to vector<8x128xf32>
    %418 = vector.extract_strided_slice %404 {offsets = [0, 2], sizes = [8, 128], strides = [1, 1]} : vector<8x162xf32> to vector<8x128xf32>
    %cst_151 = arith.constant 0.000000e+00 : f32
    %419 = vector.shape_cast %411 : vector<1x128xi1> to vector<1x128xi1>
    %420 = vector.broadcast %419 : vector<1x128xi1> to vector<8x128xi1>
    %421 = vector.broadcast %cst_151 : f32 to vector<8x128xf32>
    %422 = arith.select %420, %418, %421 : vector<8x128xi1>, vector<8x128xf32>
    %423 = vector.extract_strided_slice %404 {offsets = [0, 16], sizes = [8, 128], strides = [1, 1]} : vector<8x162xf32> to vector<8x128xf32>
    %cst_152 = arith.constant 0.000000e+00 : f32
    %424 = vector.shape_cast %409 : vector<1x128xi1> to vector<1x128xi1>
    %425 = vector.broadcast %424 : vector<1x128xi1> to vector<8x128xi1>
    %426 = vector.broadcast %cst_152 : f32 to vector<8x128xf32>
    %427 = arith.select %425, %423, %426 : vector<8x128xi1>, vector<8x128xf32>
    %428 = vector.extract_strided_slice %404 {offsets = [0, 18], sizes = [8, 128], strides = [1, 1]} : vector<8x162xf32> to vector<8x128xf32>
    %cst_153 = arith.constant 0.000000e+00 : f32
    %429 = vector.shape_cast %411 : vector<1x128xi1> to vector<1x128xi1>
    %430 = vector.broadcast %429 : vector<1x128xi1> to vector<8x128xi1>
    %431 = vector.broadcast %cst_153 : f32 to vector<8x128xf32>
    %432 = arith.select %430, %428, %431 : vector<8x128xi1>, vector<8x128xf32>
    %433 = vector.extract_strided_slice %404 {offsets = [0, 32], sizes = [8, 128], strides = [1, 1]} : vector<8x162xf32> to vector<8x128xf32>
    %cst_154 = arith.constant 0.000000e+00 : f32
    %434 = vector.shape_cast %409 : vector<1x128xi1> to vector<1x128xi1>
    %435 = vector.broadcast %434 : vector<1x128xi1> to vector<8x128xi1>
    %436 = vector.broadcast %cst_154 : f32 to vector<8x128xf32>
    %437 = arith.select %435, %433, %436 : vector<8x128xi1>, vector<8x128xf32>
    %438 = vector.extract_strided_slice %404 {offsets = [0, 33], sizes = [8, 128], strides = [1, 1]} : vector<8x162xf32> to vector<8x128xf32>
    %439 = vector.extract_strided_slice %404 {offsets = [0, 34], sizes = [8, 128], strides = [1, 1]} : vector<8x162xf32> to vector<8x128xf32>
    %cst_155 = arith.constant 0.000000e+00 : f32
    %440 = vector.shape_cast %411 : vector<1x128xi1> to vector<1x128xi1>
    %441 = vector.broadcast %440 : vector<1x128xi1> to vector<8x128xi1>
    %442 = vector.broadcast %cst_155 : f32 to vector<8x128xf32>
    %443 = arith.select %441, %439, %442 : vector<8x128xi1>, vector<8x128xf32>
    %444 = tpu.concatenate %416, %417, %422, %427, %402, %432, %437, %438, %443 in 0 : vector<8x128xf32>, vector<8x128xf32>, vector<8x128xf32>, vector<8x128xf32>, vector<8x128xf32>, vector<8x128xf32>, vector<8x128xf32>, vector<8x128xf32>, vector<8x128xf32> -> vector<72x128xf32>
    %c0_156 = arith.constant 0 : index
    %c0_157 = arith.constant 0 : index
    %445 = vector.load %arg25[%c0_156, %c0_157] : memref<8x72xbf16, #tpu.memory_space<vmem>>, vector<8x72xbf16>
    %446 = arith.truncf %444 : vector<72x128xf32> to vector<72x128xbf16>
    %cst_158 = arith.constant dense<0.000000e+00> : vector<8x128xf32>
    %447 = tpu.matmul %445, %446, %cst_158 {dimension_numbers = #tpu.dot_dimension_numbers<[1], [0], [0], [1], [0, 0, 1, 1], [], []>} : vector<8x72xbf16>, vector<72x128xbf16>, vector<8x128xf32> -> vector<8x128xf32>
    %c0_159 = arith.constant 0 : index
    %c0_160 = arith.constant 0 : index
    %448 = vector.load %arg26[%c0_159, %c0_160] : memref<8x1xf32, #tpu.memory_space<vmem>>, vector<8x1xf32>
    %449 = vector.broadcast %448 : vector<8x1xf32> to vector<8x128xf32>
    %450 = arith.addf %447, %449 : vector<8x128xf32>
    %cst_161 = arith.constant 0.000000e+00 : f32
    %451 = vector.broadcast %cst_161 : f32 to vector<8x128xf32>
    %452 = arith.maximumf %450, %451 : vector<8x128xf32>
    %453 = arith.addf %452, %70 : vector<8x128xf32>
    %c0_162 = arith.constant 0 : index
    %c0_163 = arith.constant 0 : index
    %454 = vector.load %arg27[%c0_162, %c0_163] : memref<128x512xf32, #tpu.memory_space<vmem>>, vector<128x512xf32>
    %cst_164 = arith.constant dense<0.000000e+00> : vector<8x512xf32>
    %455 = tpu.matmul %453, %454, %cst_164 {dimension_numbers = #tpu.dot_dimension_numbers<[1], [0], [0], [1], [0, 0, 1, 1], [], []>} : vector<8x128xf32>, vector<128x512xf32>, vector<8x512xf32> -> vector<8x512xf32>
    %cst_165 = arith.constant 0.000000e+00 : f32
    %456 = vector.broadcast %cst_165 : f32 to vector<8x33xf32>
    %457 = tpu.concatenate %456, %455, %456 in 1 : vector<8x33xf32>, vector<8x512xf32>, vector<8x33xf32> -> vector<8x578xf32>
    %458 = tpu.iota {dimensions = array<i32: 1>} : vector<1x512xi32>
    %c15_i32_166 = arith.constant 15 : i32
    %459 = vector.broadcast %c15_i32_166 : i32 to vector<1x512xi32>
    %460 = arith.andi %458, %459 : vector<1x512xi32>
    %c1_i32_167 = arith.constant 1 : i32
    %461 = vector.broadcast %c1_i32_167 : i32 to vector<1x512xi32>
    %462 = arith.cmpi sge, %460, %461 : vector<1x512xi32>
    %c15_i32_168 = arith.constant 15 : i32
    %463 = vector.broadcast %c15_i32_168 : i32 to vector<1x512xi32>
    %464 = arith.cmpi slt, %460, %463 : vector<1x512xi32>
    %465 = vector.extract_strided_slice %457 {offsets = [0, 0], sizes = [8, 512], strides = [1, 1]} : vector<8x578xf32> to vector<8x512xf32>
    %cst_169 = arith.constant 0.000000e+00 : f32
    %466 = vector.shape_cast %462 : vector<1x512xi1> to vector<1x512xi1>
    %467 = vector.broadcast %466 : vector<1x512xi1> to vector<8x512xi1>
    %468 = vector.broadcast %cst_169 : f32 to vector<8x512xf32>
    %469 = arith.select %467, %465, %468 : vector<8x512xi1>, vector<8x512xf32>
    %470 = vector.extract_strided_slice %457 {offsets = [0, 1], sizes = [8, 512], strides = [1, 1]} : vector<8x578xf32> to vector<8x512xf32>
    %471 = vector.extract_strided_slice %457 {offsets = [0, 2], sizes = [8, 512], strides = [1, 1]} : vector<8x578xf32> to vector<8x512xf32>
    %cst_170 = arith.constant 0.000000e+00 : f32
    %472 = vector.shape_cast %464 : vector<1x512xi1> to vector<1x512xi1>
    %473 = vector.broadcast %472 : vector<1x512xi1> to vector<8x512xi1>
    %474 = vector.broadcast %cst_170 : f32 to vector<8x512xf32>
    %475 = arith.select %473, %471, %474 : vector<8x512xi1>, vector<8x512xf32>
    %476 = vector.extract_strided_slice %457 {offsets = [0, 32], sizes = [8, 512], strides = [1, 1]} : vector<8x578xf32> to vector<8x512xf32>
    %cst_171 = arith.constant 0.000000e+00 : f32
    %477 = vector.shape_cast %462 : vector<1x512xi1> to vector<1x512xi1>
    %478 = vector.broadcast %477 : vector<1x512xi1> to vector<8x512xi1>
    %479 = vector.broadcast %cst_171 : f32 to vector<8x512xf32>
    %480 = arith.select %478, %476, %479 : vector<8x512xi1>, vector<8x512xf32>
    %481 = vector.extract_strided_slice %457 {offsets = [0, 34], sizes = [8, 512], strides = [1, 1]} : vector<8x578xf32> to vector<8x512xf32>
    %cst_172 = arith.constant 0.000000e+00 : f32
    %482 = vector.shape_cast %464 : vector<1x512xi1> to vector<1x512xi1>
    %483 = vector.broadcast %482 : vector<1x512xi1> to vector<8x512xi1>
    %484 = vector.broadcast %cst_172 : f32 to vector<8x512xf32>
    %485 = arith.select %483, %481, %484 : vector<8x512xi1>, vector<8x512xf32>
    %486 = vector.extract_strided_slice %457 {offsets = [0, 64], sizes = [8, 512], strides = [1, 1]} : vector<8x578xf32> to vector<8x512xf32>
    %cst_173 = arith.constant 0.000000e+00 : f32
    %487 = vector.shape_cast %462 : vector<1x512xi1> to vector<1x512xi1>
    %488 = vector.broadcast %487 : vector<1x512xi1> to vector<8x512xi1>
    %489 = vector.broadcast %cst_173 : f32 to vector<8x512xf32>
    %490 = arith.select %488, %486, %489 : vector<8x512xi1>, vector<8x512xf32>
    %491 = vector.extract_strided_slice %457 {offsets = [0, 65], sizes = [8, 512], strides = [1, 1]} : vector<8x578xf32> to vector<8x512xf32>
    %492 = vector.extract_strided_slice %457 {offsets = [0, 66], sizes = [8, 512], strides = [1, 1]} : vector<8x578xf32> to vector<8x512xf32>
    %cst_174 = arith.constant 0.000000e+00 : f32
    %493 = vector.shape_cast %464 : vector<1x512xi1> to vector<1x512xi1>
    %494 = vector.broadcast %493 : vector<1x512xi1> to vector<8x512xi1>
    %495 = vector.broadcast %cst_174 : f32 to vector<8x512xf32>
    %496 = arith.select %494, %492, %495 : vector<8x512xi1>, vector<8x512xf32>
    %497 = tpu.concatenate %469, %470, %475, %480, %455, %485, %490, %491, %496 in 0 : vector<8x512xf32>, vector<8x512xf32>, vector<8x512xf32>, vector<8x512xf32>, vector<8x512xf32>, vector<8x512xf32>, vector<8x512xf32>, vector<8x512xf32>, vector<8x512xf32> -> vector<72x512xf32>
    %c0_175 = arith.constant 0 : index
    %c0_176 = arith.constant 0 : index
    %498 = vector.load %arg28[%c0_175, %c0_176] : memref<4x72xbf16, #tpu.memory_space<vmem>>, vector<4x72xbf16>
    %499 = arith.truncf %497 : vector<72x512xf32> to vector<72x512xbf16>
    %cst_177 = arith.constant dense<0.000000e+00> : vector<4x512xf32>
    %500 = tpu.matmul %498, %499, %cst_177 {dimension_numbers = #tpu.dot_dimension_numbers<[1], [0], [0], [1], [0, 0, 1, 1], [], []>} : vector<4x72xbf16>, vector<72x512xbf16>, vector<4x512xf32> -> vector<4x512xf32>
    %c0_178 = arith.constant 0 : index
    %c0_179 = arith.constant 0 : index
    %501 = vector.load %arg29[%c0_178, %c0_179] : memref<4x1xf32, #tpu.memory_space<vmem>>, vector<4x1xf32>
    %502 = vector.broadcast %501 : vector<4x1xf32> to vector<4x512xf32>
    %503 = arith.addf %500, %502 : vector<4x512xf32>
    %cst_180 = arith.constant 0.000000e+00 : f32
    %504 = vector.broadcast %cst_180 : f32 to vector<4x512xf32>
    %505 = arith.maximumf %503, %504 : vector<4x512xf32>
    %c0_181 = arith.constant 0 : index
    %c0_182 = arith.constant 0 : index
    %c0_183 = arith.constant 0 : index
    %506 = vector.load %arg30[%c0_181, %c0_182, %c0_183] : memref<1x4x512xf32, #tpu.memory_space<vmem>>, vector<1x4x512xf32>
    %507 = vector.shape_cast %506 : vector<1x4x512xf32> to vector<4x512xf32>
    %508 = vector.shape_cast %505 : vector<4x512xf32> to vector<1x4x512xf32>
    tpu.vector_store %arg30[%c0_181, %c0_182, %c0_183], %508 {strides = array<i32>} : memref<1x4x512xf32, #tpu.memory_space<vmem>>, vector<1x4x512xf32>,
    return
  }
  func.func @transform_0(%arg0: i32) -> (i32, i32, i32) {
    %c0_i32 = arith.constant 0 : i32
    %c0_i32_0 = arith.constant 0 : i32
    %c0_i32_1 = arith.constant 0 : i32
    return %arg0, %c0_i32, %c0_i32_0 : i32, i32, i32
  }
  func.func @transform_1(%arg0: i32) -> (i32, i32) {
    %c0_i32 = arith.constant 0 : i32
    %c0_i32_0 = arith.constant 0 : i32
    %c0_i32_1 = arith.constant 0 : i32
    return %c0_i32, %c0_i32_0 : i32, i32
  }
  func.func @transform_2(%arg0: i32) -> (i32, i32) {
    %c0_i32 = arith.constant 0 : i32
    %c0_i32_0 = arith.constant 0 : i32
    %c0_i32_1 = arith.constant 0 : i32
    return %c0_i32, %c0_i32_0 : i32, i32
  }
  func.func @transform_3(%arg0: i32) -> (i32, i32) {
    %c0_i32 = arith.constant 0 : i32
    %c0_i32_0 = arith.constant 0 : i32
    %c0_i32_1 = arith.constant 0 : i32
    return %c0_i32, %c0_i32_0 : i32, i32
  }
  func.func @transform_4(%arg0: i32) -> (i32, i32) {
    %c0_i32 = arith.constant 0 : i32
    %c0_i32_0 = arith.constant 0 : i32
    %c0_i32_1 = arith.constant 0 : i32
    return %c0_i32, %c0_i32_0 : i32, i32
  }
  func.func @transform_5(%arg0: i32) -> (i32, i32) {
    %c0_i32 = arith.constant 0 : i32
    %c0_i32_0 = arith.constant 0 : i32
    %c0_i32_1 = arith.constant 0 : i32
    return %c0_i32, %c0_i32_0 : i32, i32
  }
  func.func @transform_6(%arg0: i32) -> (i32, i32) {
    %c0_i32 = arith.constant 0 : i32
    %c0_i32_0 = arith.constant 0 : i32
    %c0_i32_1 = arith.constant 0 : i32
    return %c0_i32, %c0_i32_0 : i32, i32
  }
  func.func @transform_7(%arg0: i32) -> (i32, i32) {
    %c0_i32 = arith.constant 0 : i32
    %c0_i32_0 = arith.constant 0 : i32
    %c0_i32_1 = arith.constant 0 : i32
    return %c0_i32, %c0_i32_0 : i32, i32
  }
  func.func @transform_8(%arg0: i32) -> (i32, i32) {
    %c0_i32 = arith.constant 0 : i32
    %c0_i32_0 = arith.constant 0 : i32
    %c0_i32_1 = arith.constant 0 : i32
    return %c0_i32, %c0_i32_0 : i32, i32
  }
  func.func @transform_9(%arg0: i32) -> (i32, i32) {
    %c0_i32 = arith.constant 0 : i32
    %c0_i32_0 = arith.constant 0 : i32
    %c0_i32_1 = arith.constant 0 : i32
    return %c0_i32, %c0_i32_0 : i32, i32
  }
  func.func @transform_10(%arg0: i32) -> (i32, i32) {
    %c0_i32 = arith.constant 0 : i32
    %c0_i32_0 = arith.constant 0 : i32
    %c0_i32_1 = arith.constant 0 : i32
    return %c0_i32, %c0_i32_0 : i32, i32
  }
  func.func @transform_11(%arg0: i32) -> (i32, i32) {
    %c0_i32 = arith.constant 0 : i32
    %c0_i32_0 = arith.constant 0 : i32
    %c0_i32_1 = arith.constant 0 : i32
    return %c0_i32, %c0_i32_0 : i32, i32
  }
  func.func @transform_12(%arg0: i32) -> (i32, i32) {
    %c0_i32 = arith.constant 0 : i32
    %c0_i32_0 = arith.constant 0 : i32
    %c0_i32_1 = arith.constant 0 : i32
    return %c0_i32, %c0_i32_0 : i32, i32
  }
  func.func @transform_13(%arg0: i32) -> (i32, i32) {
    %c0_i32 = arith.constant 0 : i32
    %c0_i32_0 = arith.constant 0 : i32
    %c0_i32_1 = arith.constant 0 : i32
    return %c0_i32, %c0_i32_0 : i32, i32
  }
  func.func @transform_14(%arg0: i32) -> (i32, i32) {
    %c0_i32 = arith.constant 0 : i32
    %c0_i32_0 = arith.constant 0 : i32
    %c0_i32_1 = arith.constant 0 : i32
    return %c0_i32, %c0_i32_0 : i32, i32
  }
  func.func @transform_15(%arg0: i32) -> (i32, i32) {
    %c0_i32 = arith.constant 0 : i32
    %c0_i32_0 = arith.constant 0 : i32
    %c0_i32_1 = arith.constant 0 : i32
    return %c0_i32, %c0_i32_0 : i32, i32
  }
  func.func @transform_16(%arg0: i32) -> (i32, i32) {
    %c0_i32 = arith.constant 0 : i32
    %c0_i32_0 = arith.constant 0 : i32
    %c0_i32_1 = arith.constant 0 : i32
    return %c0_i32, %c0_i32_0 : i32, i32
  }
  func.func @transform_17(%arg0: i32) -> (i32, i32) {
    %c0_i32 = arith.constant 0 : i32
    %c0_i32_0 = arith.constant 0 : i32
    %c0_i32_1 = arith.constant 0 : i32
    return %c0_i32, %c0_i32_0 : i32, i32
  }
  func.func @transform_18(%arg0: i32) -> (i32, i32) {
    %c0_i32 = arith.constant 0 : i32
    %c0_i32_0 = arith.constant 0 : i32
    %c0_i32_1 = arith.constant 0 : i32
    return %c0_i32, %c0_i32_0 : i32, i32
  }
  func.func @transform_19(%arg0: i32) -> (i32, i32) {
    %c0_i32 = arith.constant 0 : i32
    %c0_i32_0 = arith.constant 0 : i32
    %c0_i32_1 = arith.constant 0 : i32
    return %c0_i32, %c0_i32_0 : i32, i32
  }
  func.func @transform_20(%arg0: i32) -> (i32, i32) {
    %c0_i32 = arith.constant 0 : i32
    %c0_i32_0 = arith.constant 0 : i32
    %c0_i32_1 = arith.constant 0 : i32
    return %c0_i32, %c0_i32_0 : i32, i32
  }
  func.func @transform_21(%arg0: i32) -> (i32, i32) {
    %c0_i32 = arith.constant 0 : i32
    %c0_i32_0 = arith.constant 0 : i32
    %c0_i32_1 = arith.constant 0 : i32
    return %c0_i32, %c0_i32_0 : i32, i32
  }
  func.func @transform_22(%arg0: i32) -> (i32, i32) {
    %c0_i32 = arith.constant 0 : i32
    %c0_i32_0 = arith.constant 0 : i32
    %c0_i32_1 = arith.constant 0 : i32
    return %c0_i32, %c0_i32_0 : i32, i32
  }
  func.func @transform_23(%arg0: i32) -> (i32, i32) {
    %c0_i32 = arith.constant 0 : i32
    %c0_i32_0 = arith.constant 0 : i32
    %c0_i32_1 = arith.constant 0 : i32
    return %c0_i32, %c0_i32_0 : i32, i32
  }
  func.func @transform_24(%arg0: i32) -> (i32, i32) {
    %c0_i32 = arith.constant 0 : i32
    %c0_i32_0 = arith.constant 0 : i32
    %c0_i32_1 = arith.constant 0 : i32
    return %c0_i32, %c0_i32_0 : i32, i32
  }
  func.func @transform_25(%arg0: i32) -> (i32, i32) {
    %c0_i32 = arith.constant 0 : i32
    %c0_i32_0 = arith.constant 0 : i32
    %c0_i32_1 = arith.constant 0 : i32
    return %c0_i32, %c0_i32_0 : i32, i32
  }
  func.func @transform_26(%arg0: i32) -> (i32, i32) {
    %c0_i32 = arith.constant 0 : i32
    %c0_i32_0 = arith.constant 0 : i32
    %c0_i32_1 = arith.constant 0 : i32
    return %c0_i32, %c0_i32_0 : i32, i32
  }
  func.func @transform_27(%arg0: i32) -> (i32, i32) {
    %c0_i32 = arith.constant 0 : i32
    %c0_i32_0 = arith.constant 0 : i32
    %c0_i32_1 = arith.constant 0 : i32
    return %c0_i32, %c0_i32_0 : i32, i32
  }
  func.func @transform_28(%arg0: i32) -> (i32, i32) {
    %c0_i32 = arith.constant 0 : i32
    %c0_i32_0 = arith.constant 0 : i32
    %c0_i32_1 = arith.constant 0 : i32
    return %c0_i32, %c0_i32_0 : i32, i32
  }
  func.func @transform_29(%arg0: i32) -> (i32, i32, i32) {
    %c0_i32 = arith.constant 0 : i32
    %c0_i32_0 = arith.constant 0 : i32
    %c0_i32_1 = arith.constant 0 : i32
    return %arg0, %c0_i32, %c0_i32_0 : i32, i32, i32
  }
}

</mosaic_0001>

<bundles_post_ra>
// kernel: tpu_custom_call.1
= control target key start
LH: loop header
LB: loop body
LE: loop exit
PB: predicated region body
PF: predicated region fallthrough
CT: control target
= control target key end

     0   :  { %6 = vsyncpa [#allocation3], 0  ;;  %s124_s0 = inlined_call_operand.hbm [shape: f32[8,128], index: 0, kind: input, shape index: {}]   ;;  %s125_s1 = inlined_call_operand.hbm [shape: f32[8,128], index: 1, kind: output, shape index: {}]  }
   0x1   :  { %7 = vsyncpa [#allocation4], 0  ;;  %s88_s6 = smov [#allocation2]   ;;  %s40_s10 = scalar_lea.hbm %s124_s0, 128 }
   0x2   :  { %s14_s7 = sshll.u32 %s88_s6, 4  ;;  %p41_p0 = scmp.ne.s32.totalorder %s124_s0, %s40_s10  ;;  %s15_s7 = int_to_ptr.vmem [resolvable:$true] %s14_s7 }
   0x3   :  { %p44_p1 = scmp.lt.u32.totalorder %s40_s10, %s124_s0 }
   0x5   :  { %p46_p2 = pnand %p44_p1, %p41_p0 }
   0x7   :  { %49 = shalt.err (!%p46_p2)
}
   0x8   :  { %s50_s15 = scalar_lea.vmem %s15_s7, 128  ;;  %p55_p4 = scmp.lt.s32.totalorder %s15_s7, %s15_s7 }
   0x9   :  { %p51_p3 = scmp.ne.s32.totalorder %s15_s7, %s50_s15  ;;  %p56_p5 = scmp.lt.s32.totalorder %s50_s15, %s50_s15 }
   0xb   :  { %p57_p6 = por %p56_p5, %p55_p4 }
   0xd   :  { %p58_p7 = pnand %p57_p6, %p51_p3 }
   0xf   :  { %61 = shalt.err (!%p58_p7)
}
  0x10   :  { %17 = dma.hbm_to_vmem [thread:$0]  %s124_s0, 128, %s15_s7, [#allocation3]  }
  0x11   :  { %84 = dma.done.wait [#allocation3], 128  }
  0x12   :  { %85 = vsyncadd [#allocation3], 4294967168  ;;  %s89_s18 = smov [#allocation5]   ;;  %v21_v0 = vld [vmem:[#allocation2] sm:$0xff] }
  0x13   :  { %s29_s19 = sshll.u32 %s89_s18, 4  ;;  %22 = vst [vmem:[#allocation5] sm:$0xff] %v21_v0  ;;  %s30_s19 = int_to_ptr.vmem [resolvable:$true] %s29_s19 }
  0x14   :  { %s62_s20 = scalar_lea.vmem %s30_s19, 128  ;;  %p67_p9 = scmp.lt.s32.totalorder %s30_s19, %s30_s19 }
  0x15   :  { %p63_p8 = scmp.ne.s32.totalorder %s30_s19, %s62_s20  ;;  %p68_p10 = scmp.lt.s32.totalorder %s62_s20, %s62_s20 }
  0x17   :  { %p69_p11 = por %p68_p10, %p67_p9 }
  0x19   :  { %p70_p12 = pnand %p69_p11, %p63_p8 }
  0x1b   :  { %73 = shalt.err (!%p70_p12)
}
  0x1c   :  { %s74_s23 = scalar_lea.hbm %s125_s1, 128 }
  0x1d   :  { %p75_p13 = scmp.ne.s32.totalorder %s125_s1, %s74_s23  ;;  %p78_p0 = scmp.lt.u32.totalorder %s74_s23, %s125_s1 }
  0x1f   :  { %p80_p1 = pnand %p78_p0, %p75_p13 }
  0x21   :  { %83 = shalt.err (!%p80_p1)
}
  0x22   :  { %32 = dma.vmem_to_hbm [thread:$0]  %s30_s19, 128, %s125_s1, [#allocation4]  }
  0x23   :  { %86 = dma.done.wait [#allocation4], 128  }
  0x24   :  { %87 = vsyncadd [#allocation4], 4294967168 }
  0x25   :  { %36 = vsyncpa [#allocation3], 1 }
  0x26   :  { %37 = vsyncpa [#allocation4], 1 }

// kernel: forward.1
= control target key start
LH: loop header
LB: loop body
LE: loop exit
PB: predicated region body
PF: predicated region fallthrough
CT: control target
= control target key end

     0   :  { %s3544_s6 = smov 1   ;;  %s3545_s10 = smov 2   ;;  %s4781_s0 = inlined_call_operand.smem [shape: u32[30], index: -1, kind: input, shape index: {}] }
   0x1   :  { %s3609_s5 = sld [smem:[%s4781_s0]]   ;;  %s3546_s14 = smov 3  }
   0x2   :  { %s3614_s9 = sld [smem:[%s4781_s0 + %s3544_s6]]   ;;  %s3547_s18 = smov 4  }
   0x3   :  { %s3619_s13 = sld [smem:[%s4781_s0 + %s3545_s10]]   ;;  %s3548_s22 = smov 5  }
   0x4   :  { %s3624_s17 = sld [smem:[%s4781_s0 + %s3546_s14]]   ;;  %s3549_s26 = smov 6  }
   0x5   :  { %s3629_s21 = sld [smem:[%s4781_s0 + %s3547_s18]]   ;;  %s3550_s30 = smov 7  }
   0x6   :  { %s3634_s25 = sld [smem:[%s4781_s0 + %s3548_s22]]   ;;  %s3551_s4 = smov 8  }
   0x7   :  { %s3639_s29 = sld [smem:[%s4781_s0 + %s3549_s26]]   ;;  %s3552_s10 = smov 9  }
   0x8   :  { %s3644_s3 = sld [smem:[%s4781_s0 + %s3550_s30]]   ;;  %s3553_s15 = smov 10  }
   0x9   :  { %s3649_s8 = sld [smem:[%s4781_s0 + %s3551_s4]]   ;;  %s3554_s20 = smov 11  }
   0xa   :  { %s3654_s14 = sld [smem:[%s4781_s0 + %s3552_s10]]   ;;  %s3555_s26 = smov 12  }
   0xb   :  { %s3659_s19 = sld [smem:[%s4781_s0 + %s3553_s15]]   ;;  %s3556_s1 = smov 13  }
   0xc   :  { %s3664_s24 = sld [smem:[%s4781_s0 + %s3554_s20]]   ;;  %s3557_s7 = smov 14  }
   0xd   :  { %s3669_s30 = sld [smem:[%s4781_s0 + %s3555_s26]]   ;;  %s3558_s15 = smov 15  }
   0xe   :  { %s3674_s6 = sld [smem:[%s4781_s0 + %s3556_s1]]   ;;  %s3559_s22 = smov 16  }
   0xf   :  { %s3679_s12 = sld [smem:[%s4781_s0 + %s3557_s7]]   ;;  %s3560_s28 = smov 17  }
  0x10   :  { %s3684_s20 = sld [smem:[%s4781_s0 + %s3558_s15]]   ;;  %s3561_s7 = smov 18  }
  0x11   :  { %s3689_s27 = sld [smem:[%s4781_s0 + %s3559_s22]]   ;;  %s3562_s15 = smov 19  }
  0x12   :  { %s3694_s4 = sld [smem:[%s4781_s0 + %s3560_s28]]   ;;  %s3563_s22 = smov 20  }
  0x13   :  { %s3564_s28 = smov 21   ;;  %s3570_s16 = smov 27  }
  0x14   :  { %4831 = sst [smem:[#allocation5_spill]] %s3674_s6  ;;  %s3571_s23 = smov 28  }
  0x15   :  { %s3699_s6 = sld [smem:[%s4781_s0 + %s3561_s7]]   ;;  %s3565_s7 = smov 22  }
  0x16   :  { %4832 = sst [smem:[#allocation6_spill]] %s3684_s20  ;;  %s3572_s1 = smov 29  }
  0x17   :  { %4833 = sst [smem:[#allocation7_spill]] %s3689_s27 }
  0x18   :  { %4834 = sst [smem:[#allocation8_spill]] %s3694_s4 }
  0x19   :  { %s3704_s20 = sld [smem:[%s4781_s0 + %s3562_s15]]   ;;  %s3566_s15 = smov 23  }
  0x1a   :  { %s3709_s27 = sld [smem:[%s4781_s0 + %s3563_s22]]   ;;  %s3567_s22 = smov 24  }
  0x1b   :  { %4835 = sst [smem:[#allocation9_spill]] %s3699_s6 }
  0x1c   :  { %s3714_s4 = sld [smem:[%s4781_s0 + %s3564_s28]]   ;;  %s3568_s28 = smov 25  }
  0x1d   :  { %s3719_s6 = sld [smem:[%s4781_s0 + %s3565_s7]]   ;;  %s3569_s7 = smov 26  }
  0x1f   :  { %4836 = sst [smem:[#allocation10_spill]] %s3704_s20 }
  0x20   :  { %4837 = sst [smem:[#allocation11_spill]] %s3709_s27 }
  0x21   :  { %s3724_s20 = sld [smem:[%s4781_s0 + %s3566_s15]]  }
  0x22   :  { %4838 = sst [smem:[#allocation12_spill]] %s3714_s4 }
  0x23   :  { %4839 = sst [smem:[#allocation13_spill]] %s3719_s6 }
  0x24   :  { %s3729_s27 = sld [smem:[%s4781_s0 + %s3567_s22]]  }
  0x25   :  { %s3734_s4 = sld [smem:[%s4781_s0 + %s3568_s28]]  }
  0x26   :  { %s2588_s6 = sld [smem:[%s4781_s0 + %s3569_s7]]  }
  0x27   :  { %4840 = sst [smem:[#allocation14_spill]] %s3724_s20 }
  0x28   :  { %s3742_s20 = sld [smem:[%s4781_s0 + %s3570_s16]]  }
  0x2a   :  { %4841 = sst [smem:[#allocation15_spill]] %s3729_s27 }
  0x2b   :  { %4842 = sst [smem:[#allocation16_spill]] %s3734_s4 }
  0x2c   :  { %s3747_s27 = sld [smem:[%s4781_s0 + %s3571_s23]]  }
  0x2d   :  { %s3752_s4 = sld [smem:[%s4781_s0 + %s3572_s1]]  }
  0x2e   :  { %64 = vsyncpa [#allocation3], 0  ;;  %s3573_s7 = smov [#allocation2]   ;;  %s3520_s11 = scalar_lea.hbm %s2588_s6, 8192 }
  0x2f   :  { %s122_s10 = sshll.u32 %s3573_s7, 4  ;;  %p3521_p0 = scmp.ne.s32.totalorder %s2588_s6, %s3520_s11  ;;  %s123_s10 = int_to_ptr.vmem [resolvable:$true] %s122_s10 }
  0x30   :  { %p3524_p1 = scmp.lt.u32.totalorder %s3520_s11, %s2588_s6 }
  0x32   :  { %p3526_p2 = pnand %p3524_p1, %p3521_p0 }
  0x34   :  { %3529 = shalt.err (!%p3526_p2)
}
  0x35   :  { %s3530_s16 = scalar_lea.vmem %s123_s10, 8192  ;;  %p3535_p4 = scmp.lt.s32.totalorder %s123_s10, %s123_s10 }
  0x36   :  { %p3531_p3 = scmp.ne.s32.totalorder %s123_s10, %s3530_s16  ;;  %p3536_p5 = scmp.lt.s32.totalorder %s3530_s16, %s3530_s16 }
  0x38   :  { %p3537_p6 = por %p3536_p5, %p3535_p4 }
  0x3a   :  { %p3538_p7 = pnand %p3537_p6, %p3531_p3 }
  0x3c   :  { %3541 = shalt.err (!%p3538_p7)
}
  0x3d   :  { %s3574_s15 = smov 512   ;;  %s3575_s18 = smov 32  }
  0x3e   :  { %128 = dma.hbm_to_vmem [thread:$0]  %s2588_s6, 8192, %s123_s10, [#allocation3], %s3574_s15, %s3574_s15, %s3575_s18  }
  0x3f   :  { %3542 = dma.done.wait [#allocation3], 8192  }
  0x40   :  { %3543 = vsyncadd [#allocation3], 4294959104  ;;  %v3755_v0 = vld [vmem:[%s3609_s5] sm:$0xff]  ;;  %v3758_v1 = vld [vmem:[%s3609_s5 + $0x8] sm:$0xff]  ;;  %s3576_s0 = smov 33   ;;  %vm4783_vm0 = vcmask 269312   ;;  %v162_v29 = vlaneseq }
  0x41   :  { %v3762_v2 = vcombine.high %v3755_v0, %v3755_v0  ;;  %v3766_v3 = vcombine.high %v3758_v1, %v3758_v1  ;;  %s3577_s5 = smov 94   ;;  %s3578_s6 = smov 64   ;;  %v3584_v26 = vmov 0   ;;  %v415_v28 = vld [vmem:[%s3619_s13] sm:$0xff]  ;;  %vm4787_vm1 = vcmask 785408  }
  0x42   :  { %s3579_s23 = smov 96   ;;  %s3580_s22 = smov 126   ;;  %470 = vmatprep.mubr.bf16.mxu1 %v3584_v26  ;;  %3341 = vset.pattern.permute.xlu0 %v3584_v26  ;;  %v3827_v31 = vand.u32 127, %v162_v29  ;;  %vm4786_vm2 = vcmask 1031168   ;;  %v4843_v47 = vmov 0  ;;  %v4845_v49 = vmov 0 }
  0x43   :  { %v3266_v4 = vpack.i.bf16 %v3762_v2, %v3755_v0  ;;  %149 = vrot.lane.b32.xlu1 %v3766_v3, %s3576_s0  ;;  %s3581_s26 = smov 62   ;;  %s3582_s1 = smov 63   ;;  %v4847_v51 = vmov 0  ;;  %vm4785_vm6 = vcmask 769024   ;;  %vm4795_vm7 = vcmask 1043456  }
  0x44   :  { %s3583_s28 = smov 127   ;;  %3402 = vset.pattern.permute.xlu1 %v3584_v26  ;;  %v164_v34 = vadd.s32 128, %v3827_v31  ;;  %v3839_v38 = vadd.s32 256, %v3827_v31  ;;  %v167_v39 = vand.u32 15, %v3827_v31  ;;  %v166_v44 = vadd.s32 384, %v3827_v31  ;;  %s3587_s13 = smov 110  }
  0x45   :  { %3267 = vrot.lane.b32.xlu0 %v3266_v4, %s3576_s0  ;;  %v4849_v62 = vmov 0  ;;  %vm4784_vm9 = vcmask 523264   ;;  %v4851_v63 = vmov 0  ;;  %vm4788_vm11 = vcmask 506880   ;;  %s3589_s2 = smov 95   ;;  %s3596_s7 = smov 111  }
  0x46   :  { %v168_v37 = vand.u32 15, %v164_v34  ;;  %v169_v48 = vand.u32 15, %v3839_v38  ;;  %vm3856_vm4 = vcmp.ge.s32.totalorder %v167_v39, 1  ;;  %v170_v55 = vand.u32 15, %v166_v44  ;;  %s3600_s10 = smov 119   ;;  %s4907_s11 = sld [smem:[#allocation10_spill]] }
  0x47   :  { %v4846_v49 = vsel %vm3856_vm4, 4294967295, %v4845_v49  ;;  %vm3886_vm10 = vcmp.lt.s32.totalorder %v167_v39, 15  ;;  %vm4794_vm12 = vcmask 1039360   ;;  %v4853_v39 = vmov 0  ;;  %s4911_s16 = sld [smem:[#allocation9_spill]]  ;;  %s4912_s15 = sld [smem:[#allocation11_spill]] }
  0x48   :  { %vm3851_vm3 = vcmp.ge.s32.totalorder %v168_v37, 1  ;;  %vm3861_vm5 = vcmp.lt.s32.totalorder %v168_v37, 15  ;;  %vm3882_vm8 = vcmp.ge.s32.totalorder %v169_v48, 1  ;;  %v4852_v63 = vsel %vm3886_vm10, 4294967295, %v4851_v63  ;;  %s4915_s18 = sld [smem:[#allocation13_spill]] }
  0x49   :  { %147 = vrot.lane.b32.xlu0 %v3758_v1, %s3576_s0  ;;  %v4844_v47 = vsel %vm3851_vm3, 4294967295, %v4843_v47  ;;  %v4848_v51 = vsel %vm3861_vm5, 4294967295, %v4847_v51  ;;  %v4850_v62 = vsel %vm3882_vm8, 4294967295, %v4849_v62  ;;  %vm3930_vm13 = vcmp.ge.s32.totalorder %v170_v55, 1 }
  0x4a   :  { %v4854_v39 = vsel %vm3930_vm13, 4294967295, %v4853_v39  ;;  %vm3940_vm14 = vcmp.lt.s32.totalorder %v170_v55, 15  ;;  %vm3944_vm15 = vcmp.lt.s32.totalorder %v169_v48, 15 }
  0xb5   :  { %v150_v9 = vpop.permute.xlu1 %149 }
  0xb6   :  { %v161_v23 = vsel %vm4783_vm0, %v150_v9, 0.0 }
  0xb7   :  { %v3268_v5 = vpop.permute.xlu0 %3267  ;;  %v320_v25 = vrot.slane %v161_v23, 4 }
  0xb8   :  { %v3270_v6 = vunpack.i.h.bf16 %v3268_v5  ;;  %v3269_v7 = vunpack.i.l.bf16 %v3268_v5 }
  0xba   :  { %v3776_v8 = vsel %vm4783_vm0, 0.0, %v3269_v7  ;;  %v3781_v11 = vsel %vm4783_vm0, %v3269_v7, %v3270_v6 }
  0xbb   :  { %v148_v10 = vpop.permute.xlu0 %147  ;;  %247 = vrot.lane.b32.xlu0 %v3776_v8, %s3577_s5  ;;  %v3301_v16 = vpack.i.bf16 %v3781_v11, %v3776_v8  ;;  %v317_v18 = vrot.slane %v3781_v11, 4  ;;  %v316_v19 = vrot.slane %v3776_v8, 4  ;;  %v188_v58 = vsel %vm3851_vm3, %v3781_v11, 0.0 }
  0xbc   :  { %v3784_v12 = vsel %vm4783_vm0, %v3270_v6, %v148_v10  ;;  %v3789_v14 = vsel %vm4783_vm0, %v148_v10, %v150_v9  ;;  %v187_v61 = vsel %vm3856_vm4, %v3776_v8, 0.0  ;;  %vm4791_vm0 = vcmask 1041408  }
  0xbd   :  { %v3271_v13 = vpack.i.bf16 %v3784_v12, %v3781_v11  ;;  %v3276_v15 = vpack.i.bf16 %v3789_v14, %v3776_v8  ;;  %v318_v17 = vrot.slane %v3784_v12, 4  ;;  %v319_v21 = vrot.slane %v3789_v14, 4 }
  0xbe   :  { %v3321_v24 = vpack.i.bf16 %v161_v23, %v3789_v14 }
  0xbf   :  { %270 = vrot.lane.b32.xlu0 %v3776_v8, %s3578_s6  ;;  %3272 = vrot.lane.b32.xlu1 %v3271_v13, %s3579_s23  ;;  %v3306_v20 = vpack.i.bf16 %v318_v17, %v317_v18  ;;  %v3311_v22 = vpack.i.bf16 %v319_v21, %v316_v19  ;;  %v3331_v27 = vpack.i.bf16 %v320_v25, %v319_v21 }
  0xc3   :  { %3277 = vrot.lane.b32.xlu0 %v3276_v15, %s3579_s23  ;;  %3282 = vrot.lane.b32.xlu1 %v3271_v13, %s3580_s22 }
  0xc7   :  { %3287 = vrot.lane.b32.xlu0 %v3276_v15, %s3580_s22  ;;  %3297 = vrot.lane.b32.xlu1 %v3271_v13, %s3578_s6 }
  0xcb   :  { %3292 = vrot.lane.b32.xlu0 %v3271_v13, %s3577_s5  ;;  %3302 = vrot.lane.b32.xlu1 %v3301_v16, %s3581_s26 }
  0xcf   :  { %366 = vrot.lane.b32.xlu0 %v316_v19, %s3582_s1  ;;  %3307 = vrot.lane.b32.xlu1 %v3306_v20, %s3583_s28 }
  0xd3   :  { %297 = vrot.lane.b32.xlu0 %v3784_v12, %s3581_s26  ;;  %3312 = vrot.lane.b32.xlu1 %v3311_v22, %s3583_s28 }
  0xd7   :  { %209 = vrot.lane.b32.xlu0 %v161_v23, %s3580_s22  ;;  %3317 = vrot.lane.b32.xlu1 %v3306_v20, %s3582_s1 }
  0xdb   :  { %3322 = vrot.lane.b32.xlu0 %v3321_v24, %s3577_s5  ;;  %232 = vrot.lane.b32.xlu1 %v161_v23, %s3579_s23 }
  0xdf   :  { %3332 = vrot.lane.b32.xlu0 %v3331_v27, %s3582_s1  ;;  %329 = vrot.lane.b32.xlu1 %v320_v25, %s3583_s28 }
  0xe3   :  { %3327 = vrot.lane.b32.xlu1 %v3321_v24, %s3578_s6  ;;  %418 = vperm.xlu0 %3341, %v415_v28  }
  0xe7   :  { %3337 = vrot.lane.b32.xlu1 %v3321_v24, %s3581_s26 }
 0x12d   :  { %v248_v30 = vpop.permute.xlu0 %247 }
 0x131   :  { %v3829_v32 = vpop.permute.xlu0 %270  ;;  %v3831_v33 = vpop.permute.xlu1 %3272 }
 0x132   :  { %v3275_v40 = vunpack.i.h.bf16 %v3831_v33  ;;  %v3274_v41 = vunpack.i.l.bf16 %v3831_v33 }
 0x134   :  { %v236_v54 = vsel %vm4787_vm1, %v3274_v41, %v3275_v40 }
 0x135   :  { %v3834_v35 = vpop.permute.xlu0 %3277  ;;  %v3836_v36 = vpop.permute.xlu1 %3282  ;;  %v244_v4 = vsel %vm3851_vm3, %v236_v54, 0.0 }
 0x136   :  { %v3285_v45 = vunpack.i.h.bf16 %v3836_v36  ;;  %v3284_v46 = vunpack.i.l.bf16 %v3836_v36  ;;  %v3279_v50 = vunpack.i.l.bf16 %v3834_v35  ;;  %v3280_v5 = vunpack.i.h.bf16 %v3834_v35 }
 0x137   :  { %v345_v18 = vrot.slane %v244_v4, 4 }
 0x138   :  { %v213_v59 = vsel %vm4786_vm2, %v3284_v46, %v3285_v45  ;;  %v235_v6 = vsel %vm4787_vm1, %v3279_v50, %v3274_v41  ;;  %v237_v33 = vsel %vm4787_vm1, %v3275_v40, %v3280_v5  ;;  %v4855_v40 = vmov 0 }
 0x139   :  { %v3844_v42 = vpop.permute.xlu0 %3287  ;;  %v3846_v43 = vpop.permute.xlu1 %3297  ;;  %v221_v8 = vsel %vm3861_vm5, %v213_v59, 0.0  ;;  %v243_v23 = vsel %vm3856_vm4, %v235_v6, 0.0  ;;  %v4856_v40 = vsel %vm3940_vm14, 4294967295, %v4855_v40 }
 0x13a   :  { %v3289_v60 = vunpack.i.l.bf16 %v3844_v42  ;;  %v3300_v16 = vunpack.i.h.bf16 %v3846_v43  ;;  %v3299_v17 = vunpack.i.l.bf16 %v3846_v43  ;;  %v3290_v41 = vunpack.i.h.bf16 %v3844_v42 }
 0x13b   :  { %v344_v50 = vrot.slane %v243_v23, 4 }
 0x13c   :  { %v212_v19 = vsel %vm4786_vm2, %v3289_v60, %v3284_v46  ;;  %v281_v44 = vsel %vm4784_vm9, %v3829_v32, %v3299_v17  ;;  %v282_v46 = vsel %vm4784_vm9, %v3299_v17, %v3300_v16  ;;  %vm4789_vm9 = vcmask 515072  }
 0x13d   :  { %v3865_v52 = vpop.permute.xlu0 %3292  ;;  %v3867_v53 = vpop.permute.xlu1 %3302  ;;  %v220_v38 = vsel %vm3886_vm10, %v212_v19, 0.0 }
 0x13e   :  { %v3295_v56 = vunpack.i.h.bf16 %v3865_v52  ;;  %v3294_v57 = vunpack.i.l.bf16 %v3865_v52  ;;  %v3305_v20 = vunpack.i.h.bf16 %v3867_v53  ;;  %v3304_v21 = vunpack.i.l.bf16 %v3867_v53 }
 0x13f   :  { %v4857_v53 = vmov 0  ;;  %v390_v48 = vsel %vm4795_vm7, %v220_v38, %v344_v50  ;;  %v189_v52 = vsel %vm3882_vm8, %v3784_v12, 0.0 }
 0x140   :  { %v258_v10 = vsel %vm4785_vm6, %v248_v30, %v3294_v57  ;;  %v259_v11 = vsel %vm4785_vm6, %v3294_v57, %v3295_v56  ;;  %v391_v30 = vsel %vm4795_vm7, %v221_v8, %v345_v18  ;;  %v4858_v53 = vsel %vm3944_vm15, 4294967295, %v4857_v53 }
 0x141   :  { %v367_v7 = vpop.permute.xlu0 %366  ;;  %v3894_v9 = vpop.permute.xlu1 %3307  ;;  %v266_v24 = vsel %vm3886_vm10, %v258_v10, 0.0  ;;  %v267_v25 = vsel %vm3861_vm5, %v259_v11, 0.0  ;;  %v304_v32 = vsel %vm4788_vm11, %v3304_v21, %v3305_v20  ;;  %v214_v11 = vsel %vm4786_vm2, %v3285_v45, %v3290_v41 }
 0x142   :  { %v3310_v13 = vunpack.i.h.bf16 %v3894_v9  ;;  %v3309_v15 = vunpack.i.l.bf16 %v3894_v9  ;;  %v358_v54 = vrot.slane %v266_v24, 4  ;;  %v359_v57 = vrot.slane %v267_v25, 4 }
 0x143   :  { %v312_v17 = vsel %vm3886_vm10, %v304_v32, 0.0 }
 0x144   :  { %v333_v22 = vsel %vm4794_vm12, %v3309_v15, %v3310_v13  ;;  %v395_v19 = vsel %vm4795_vm7, %v3762_v2, %v359_v57  ;;  %v394_v45 = vsel %vm4795_vm7, %v3755_v0, %v358_v54 }
 0x145   :  { %v3918_v27 = vpop.permute.xlu0 %297  ;;  %v3920_v28 = vpop.permute.xlu1 %3312  ;;  %v387_v29 = vsel %vm4795_vm7, %v188_v58, %v333_v22  ;;  %v245_v58 = vsel %vm3882_vm8, %v237_v33, 0.0 }
 0x146   :  { %v3314_v34 = vunpack.i.l.bf16 %v3920_v28  ;;  %v404_v37 = vpack.c.bf16 %v391_v30, %v387_v29  ;;  %v305_v4 = vsel %vm4788_vm11, %v3305_v20, %v3918_v27  ;;  %v3315_v21 = vunpack.i.h.bf16 %v3920_v28 }
 0x147   :  { %v313_v20 = vsel %vm3861_vm5, %v305_v4, 0.0  ;;  %v411_v28 = vpack.c.bf16 %v312_v17, %v312_v17 }
 0x148   :  { %438 = vmatprep.subr.bf16.mxu1 %v404_v37  ;;  %v332_v42 = vsel %vm4794_vm12, %v3314_v34, %v3309_v15  ;;  %v290_v15 = vsel %vm3851_vm3, %v282_v46, 0.0  ;;  %v412_v37 = vpack.c.bf16 %v313_v20, %v313_v20  ;;  %v334_v35 = vsel %vm4794_vm12, %v3310_v13, %v3315_v21 }
 0x149   :  { %v210_v55 = vpop.permute.xlu0 %209  ;;  %v3952_v59 = vpop.permute.xlu1 %3317  ;;  %v386_v60 = vsel %vm4795_vm7, %v187_v61, %v332_v42  ;;  %v289_v61 = vsel %vm3856_vm4, %v281_v44, 0.0  ;;  %v427_v12 = vsel %vm4791_vm0, %v411_v28, 0  ;;  %vm4827_vm3 = vcmask 64512  }
 0x14a   :  { %v3320_v6 = vunpack.i.h.bf16 %v3952_v59  ;;  %v3319_v8 = vunpack.i.l.bf16 %v3952_v59  ;;  %v403_v10 = vpack.c.bf16 %v390_v48, %v386_v60  ;;  %v215_v0 = vsel %vm4786_vm2, %v3290_v41, %v210_v55 }
 0x14b   :  { %v190_v41 = vsel %vm3930_vm13, %v3789_v14, 0.0  ;;  %v223_v54 = vsel %vm3940_vm14, %v215_v0, 0.0  ;;  %v222_v14 = vsel %vm3944_vm15, %v214_v11, 0.0  ;;  %v388_v60 = vsel %vm4795_vm7, %v189_v52, %v334_v35 }
 0x14c   :  { %439 = vmatpush1.bf16.msra.mxu1 %v403_v10  ;;  %v378_v18 = vsel %vm4789_vm9, %v3319_v8, %v3320_v6  ;;  %v377_v36 = vsel %vm4789_vm9, %v367_v7, %v3319_v8  ;;  %vm4859_vm2 = vcmask 523264  }
 0x14d   :  { %v3323_v22 = vpop.permute.xlu0 %3322  ;;  %v233_v23 = vpop.permute.xlu1 %232  ;;  %v399_v24 = vsel %vm4795_vm7, %v290_v15, %v378_v18  ;;  %v398_v25 = vsel %vm4795_vm7, %v289_v61, %v377_v36  ;;  %v402_v15 = vld [vmem:[%s3614_s9] sm:$0xf]  ;;  %s3586_s9 = smov 17  }
 0x14e   :  { %v3325_v29 = vunpack.i.h.bf16 %v3323_v22  ;;  %v3324_v30 = vunpack.i.l.bf16 %v3323_v22  ;;  %v238_v2 = vsel %vm4787_vm1, %v3280_v5, %v233_v23  ;;  %v408_v7 = vpack.c.bf16 %v399_v24, %v395_v19  ;;  %vm4860_vm1 = vmmov %vm4859_vm2 }
 0x14f   :  { %v246_v33 = vsel %vm3930_vm13, %v238_v2, 0.0  ;;  %v407_v34 = vpack.c.bf16 %v398_v25, %v394_v45 }
 0x150   :  { %v260_v38 = vsel %vm4785_vm6, %v3295_v56, %v3324_v30  ;;  %v261_v44 = vsel %vm4785_vm6, %v3324_v30, %v3325_v29  ;;  %v347_v46 = vrot.slane %v246_v33, 4  ;;  %440 = vmatprep.subr.bf16.mxu1 %v408_v7  ;;  %v346_v56 = vrot.slane %v245_v58, 4 }
 0x151   :  { %v3333_v5 = vpop.permute.xlu0 %3332  ;;  %v330_v50 = vpop.permute.xlu1 %329  ;;  %441 = vmatpush1.bf16.msra.mxu1 %v407_v34  ;;  %v268_v9 = vsel %vm3944_vm15, %v260_v38, 0.0  ;;  %v269_v13 = vsel %vm3940_vm14, %v261_v44, 0.0  ;;  %vm421_vm6 = vcmask 293888  }
 0x152   :  { %2592 = vmatprep.subr.msk.bf16.mxu1 %vm4791_vm0, %v412_v37  ;;  %v335_v57 = vsel %vm4794_vm12, %v3315_v21, %v330_v50  ;;  %v393_v42 = vsel %vm4795_vm7, %v223_v54, %v347_v46  ;;  %v3335_v32 = vunpack.i.h.bf16 %v3333_v5  ;;  %v3334_v58 = vunpack.i.l.bf16 %v3333_v5 }
 0x153   :  { %v389_v55 = vsel %vm4795_vm7, %v190_v41, %v335_v57  ;;  %v360_v48 = vrot.slane %v268_v9, 4  ;;  %v361_v4 = vrot.slane %v269_v13, 4  ;;  %v392_v17 = vsel %vm4795_vm7, %v222_v14, %v346_v56 }
 0x154   :  { %v406_v10 = vpack.c.bf16 %v393_v42, %v389_v55  ;;  %v405_v18 = vpack.c.bf16 %v392_v17, %v388_v60  ;;  %v379_v19 = vsel %vm4789_vm9, %v3320_v6, %v3334_v58  ;;  %v380_v36 = vsel %vm4789_vm9, %v3334_v58, %v3335_v32  ;;  %v629_v58 = vld [vmem:[%s3624_s17 + $0x180] sm:$0xff]  ;;  %v630_v55 = vld [vmem:[%s3624_s17 + $0x188] sm:$0xff] }
 0x155   :  { %v3328_v8 = vpop.permute.xlu1 %3327  ;;  %443 = vmatpush1.bf16.msra.mxu1 %v427_v12  ;;  %v397_v6 = vsel %vm4795_vm7, %v3766_v3, %v361_v4  ;;  %v396_v43 = vsel %vm4795_vm7, %v3758_v1, %v360_v48  ;;  %v3585_v42 = vmov 0.0   ;;  %v597_v60 = vld [vmem:[%s3624_s17 + $0x80] sm:$0xff]  ;;  %v3077_v48 = vpack.c.bf16 %v630_v55, %v629_v58  ;;  %v598_v4 = vld [vmem:[%s3624_s17 + $0x88] sm:$0xff]  ;;  %v588_v58 = vld [vmem:[%s3624_s17 + $0x38] sm:$0xff] }
 0x156   :  { %v3330_v11 = vunpack.i.h.bf16 %v3328_v8  ;;  %v3329_v61 = vunpack.i.l.bf16 %v3328_v8  ;;  %479 = vmatprep.subr.bf16.mxu1 %v406_v10  ;;  %v613_v8 = vld [vmem:[%s3624_s17 + $0x100] sm:$0xff]  ;;  %v614_v10 = vld [vmem:[%s3624_s17 + $0x108] sm:$0xff] }
 0x157   :  { %v582_v17 = vld [vmem:[%s3624_s17 + $0x8] sm:$0xff]  ;;  %v637_v55 = vld [vmem:[%s3624_s17 + $0x1c0] sm:$0xff] }
 0x158   :  { %v283_v45 = vsel %vm4859_vm2, %v3300_v16, %v3329_v61  ;;  %v284_v20 = vsel %vm4860_vm1, %v3329_v61, %v3330_v11  ;;  %2593 = vmatmul.mubr.msk.bf16.vlgmr.msra.gmra.mrb[0].mxu1 %vm421_vm6, %v402_v15  ;;  %v3079_v11 = vpack.c.bf16 %v614_v10, %v613_v8  ;;  %v581_v61 = vld [vmem:[%s3624_s17] sm:$0xff]  ;;  %vm4861_vm1 = vcmask 785408  }
 0x159   :  { %v291_v21 = vsel %vm3882_vm8, %v283_v45, 0.0  ;;  %v3338_v22 = vpop.permute.xlu1 %3337  ;;  %480 = vmatpush1.bf16.msra.mxu1 %v405_v18  ;;  %v292_v59 = vsel %vm3930_vm13, %v284_v20, 0.0  ;;  %511 = vmatprep.mubr.bf16.mxu1 %v3584_v26  ;;  %v631_v18 = vld [vmem:[%s3624_s17 + $0x190] sm:$0xff]  ;;  %v600_v20 = vld [vmem:[%s3624_s17 + $0x98] sm:$0xff]  ;;  %vm4862_vm2 = vmmov %vm4861_vm1  ;;  %vm4817_vm8 = vcmask 105472  }
 0x15a   :  { %v3340_v16 = vunpack.i.h.bf16 %v3338_v22  ;;  %v3339_v23 = vunpack.i.l.bf16 %v3338_v22  ;;  %v401_v24 = vsel %vm4795_vm7, %v292_v59, %v380_v36  ;;  %v400_v25 = vsel %vm4795_vm7, %v291_v21, %v379_v19  ;;  %v632_v36 = vld [vmem:[%s3624_s17 + $0x198] sm:$0xff]  ;;  %v599_v45 = vld [vmem:[%s3624_s17 + $0x90] sm:$0xff] }
 0x15b   :  { %v410_v29 = vpack.c.bf16 %v401_v24, %v397_v6  ;;  %v409_v30 = vpack.c.bf16 %v400_v25, %v396_v43  ;;  %v3047_v19 = vpack.c.bf16 %v582_v17, %v581_v61  ;;  %v3081_v21 = vpack.c.bf16 %v632_v36, %v631_v18  ;;  %v615_v59 = vld [vmem:[%s3624_s17 + $0x110] sm:$0xff]  ;;  %v616_v6 = vld [vmem:[%s3624_s17 + $0x118] sm:$0xff]  ;;  %v633_v24 = vld [vmem:[%s3624_s17 + $0x1a0] sm:$0xff] }
 0x15c   :  { %v306_v2 = vsel %vm4788_vm11, %v3918_v27, %v3339_v23  ;;  %v307_v7 = vsel %vm4788_vm11, %v3339_v23, %v3340_v16  ;;  %v3049_v22 = vpack.c.bf16 %v600_v20, %v599_v45  ;;  %v583_v43 = vld [vmem:[%s3624_s17 + $0x10] sm:$0xff]  ;;  %v3083_v16 = vpack.c.bf16 %v616_v6, %v615_v59  ;;  %v584_v23 = vld [vmem:[%s3624_s17 + $0x18] sm:$0xff]  ;;  %v634_v25 = vld [vmem:[%s3624_s17 + $0x1a8] sm:$0xff] }
 0x15d   :  { %v315_v3 = vsel %vm3940_vm14, %v307_v7, 0.0  ;;  %481 = vmatprep.subr.bf16.mxu1 %v410_v29  ;;  %v314_v1 = vsel %vm3944_vm15, %v306_v2, 0.0  ;;  %v3051_v29 = vpack.c.bf16 %v584_v23, %v583_v43  ;;  %v601_v2 = vld [vmem:[%s3624_s17 + $0xa0] sm:$0xff]  ;;  %v602_v7 = vld [vmem:[%s3624_s17 + $0xa8] sm:$0xff]  ;;  %v639_v36 = vld [vmem:[%s3624_s17 + $0x1d0] sm:$0xff] }
 0x15e   :  { %482 = vmatpush1.bf16.msra.mxu1 %v409_v30  ;;  %v414_v0 = vpack.c.bf16 %v315_v3, %v315_v3  ;;  %v413_v33 = vpack.c.bf16 %v314_v1, %v314_v1  ;;  %v3085_v30 = vpack.c.bf16 %v634_v25, %v633_v24  ;;  %v617_v3 = vld [vmem:[%s3624_s17 + $0x120] sm:$0xff]  ;;  %v3053_v1 = vpack.c.bf16 %v602_v7, %v601_v2  ;;  %v622_v61 = vld [vmem:[%s3624_s17 + $0x148] sm:$0xff]  ;;  %v640_v45 = vld [vmem:[%s3624_s17 + $0x1d8] sm:$0xff] }
 0x15f   :  { %v589_v17 = vld [vmem:[%s3624_s17 + $0x40] sm:$0xff]  ;;  %v607_v20 = vld [vmem:[%s3624_s17 + $0xd0] sm:$0xff]  ;;  %v3097_v6 = vpack.c.bf16 %v640_v45, %v639_v36  ;;  %v592_v25 = vld [vmem:[%s3624_s17 + $0x58] sm:$0xff] }
 0x160   :  { %2594 = vmatprep.subr.msk.bf16.mxu1 %vm4791_vm0, %v414_v0  ;;  %v433_v34 = vsel %vm4791_vm0, %v413_v33, 0  ;;  %v618_v0 = vld [vmem:[%s3624_s17 + $0x128] sm:$0xff]  ;;  %v585_v33 = vld [vmem:[%s3624_s17 + $0x20] sm:$0xff]  ;;  %v623_v43 = vld [vmem:[%s3624_s17 + $0x150] sm:$0xff]  ;;  %vm4799_vm0 = vcmask 916480  }
 0x161   :  { %v591_v23 = vld [vmem:[%s3624_s17 + $0x50] sm:$0xff]  ;;  %v609_v2 = vld [vmem:[%s3624_s17 + $0xe0] sm:$0xff]  ;;  %v610_v7 = vld [vmem:[%s3624_s17 + $0xe8] sm:$0xff] }
 0x162   :  { %484 = vmatpush1.bf16.msra.mxu1 %v433_v34  ;;  %v419_v27 = vpop.permute.xlu0 %418  ;;  %v586_v34 = vld [vmem:[%s3624_s17 + $0x28] sm:$0xff]  ;;  %vm4864_vm11 = vmmov %vm4861_vm1 }
 0x163   :  { %3078 = vmatprep.subr.bf16.mxu1 %v3077_v48  ;;  %v605_v48 = vld [vmem:[%s3624_s17 + $0xc0] sm:$0xff] }
 0x165   :  { %2595 = vmatmul.mubr.msk.bf16.vlgmr.msra.gmra.mrb[4].mxu1 %vm421_vm6, %v402_v15  ;;  %v3045_v15 = vpack.c.bf16 %v598_v4, %v597_v60  ;;  %v638_v60 = vld [vmem:[%s3624_s17 + $0x1c8] sm:$0xff]  ;;  %vm4863_vm6 = vmmov %vm4861_vm1 }
 0x166   :  { %3080 = vmatpush3.bf16.msra.mxu1 %v3079_v11  ;;  %v606_v4 = vld [vmem:[%s3624_s17 + $0xc8] sm:$0xff]  ;;  %v621_v11 = vld [vmem:[%s3624_s17 + $0x140] sm:$0xff] }
 0x167   :  { %3046 = vmatprep.subr.bf16.mxu0 %v3045_v15  ;;  %3082 = vmatprep.subr.bf16.mxu1 %v3081_v21  ;;  %v3093_v15 = vpack.c.bf16 %v638_v60, %v637_v55  ;;  %v3061_v18 = vpack.c.bf16 %v606_v4, %v605_v48  ;;  %v608_v21 = vld [vmem:[%s3624_s17 + $0xd8] sm:$0xff]  ;;  %v627_v4 = vld [vmem:[%s3624_s17 + $0x170] sm:$0xff] }
 0x168   :  { %3048 = vmatpush3.bf16.msra.mxu0 %v3047_v19  ;;  %v590_v19 = vld [vmem:[%s3624_s17 + $0x48] sm:$0xff]  ;;  %v3065_v24 = vpack.c.bf16 %v608_v21, %v607_v20  ;;  %v612_v48 = vld [vmem:[%s3624_s17 + $0xf8] sm:$0xff] }
 0x169   :  { %3050 = vmatprep.subr.bf16.mxu0 %v3049_v22  ;;  %v3095_v22 = vpack.c.bf16 %v622_v61, %v621_v11  ;;  %v3063_v59 = vpack.c.bf16 %v590_v19, %v589_v17  ;;  %v595_v11 = vld [vmem:[%s3624_s17 + $0x70] sm:$0xff]  ;;  %v596_v61 = vld [vmem:[%s3624_s17 + $0x78] sm:$0xff] }
 0x16a   :  { %3084 = vmatpush3.bf16.msra.mxu1 %v3083_v16  ;;  %v624_v16 = vld [vmem:[%s3624_s17 + $0x158] sm:$0xff]  ;;  %v3075_v36 = vpack.c.bf16 %v596_v61, %v595_v11 }
 0x16b   :  { %3086 = vmatprep.subr.bf16.mxu1 %v3085_v30  ;;  %v642_v30 = vld [vmem:[%s3624_s17 + $0x1e8] sm:$0xff] }
 0x16c   :  { %3052 = vmatpush3.bf16.msra.mxu0 %v3051_v29  ;;  %v641_v29 = vld [vmem:[%s3624_s17 + $0x1e0] sm:$0xff] }
 0x16d   :  { %3054 = vmatprep.subr.bf16.mxu0 %v3053_v1  ;;  %v3067_v1 = vpack.c.bf16 %v592_v25, %v591_v23 }
 0x22b   :  { %v472_v28 = vpop.f32.mrb[0].mxu1 }
 0x22c   :  { %v474_v37 = vpop.f32.mrb[1].mxu1  ;;  %v4047_v38 = vadd.f32 %v472_v28, %v419_v27  ;;  %v635_v28 = vld [vmem:[%s3624_s17 + $0x1b0] sm:$0xff] }
 0x22d   :  { %v476_v44 = vpop.f32.mrb[2].mxu1  ;;  %v4053_v5 = vadd.f32 %v474_v37, %v419_v27  ;;  %v636_v37 = vld [vmem:[%s3624_s17 + $0x1b8] sm:$0xff] }
 0x22e   :  { %v477_v46 = vpop.f32.mrb[3].mxu1  ;;  %v520_v35 = vmax.f32 %v4047_v38, 0.0  ;;  %v603_v44 = vld [vmem:[%s3624_s17 + $0xb0] sm:$0xff] }
 0x22f   :  { %v521_v9 = vmax.f32 %v4053_v5, 0.0  ;;  %v3055_v46 = vpack.c.bf16 %v586_v34, %v585_v33  ;;  %v625_v33 = vld [vmem:[%s3624_s17 + $0x160] sm:$0xff]  ;;  %v626_v34 = vld [vmem:[%s3624_s17 + $0x168] sm:$0xff] }
 0x230   :  { %529 = vrot.lane.b32.xlu0 %v520_v35, %s3583_s28 }
 0x231   :  { %3056 = vmatpush3.bf16.msra.mxu0 %v3055_v46 }
 0x238   :  { %v513_v41 = vpop.f32.mrb[4].mxu1 }
 0x239   :  { %v4055_v50 = vadd.f32 %v513_v41, %v419_v27  ;;  %v515_v52 = vpop.f32.mrb[5].mxu1  ;;  %v3089_v41 = vpack.c.bf16 %v636_v37, %v635_v28  ;;  %v3103_v28 = vpack.c.bf16 %v626_v34, %v625_v33 }
 0x23a   :  { %v4057_v56 = vadd.f32 %v515_v52, %v419_v27  ;;  %v517_v54 = vpop.f32.mrb[6].mxu1  ;;  %v3087_v27 = vpack.c.bf16 %v618_v0, %v617_v3  ;;  %v604_v52 = vld [vmem:[%s3624_s17 + $0xb8] sm:$0xff]  ;;  %v3099_v3 = vpack.c.bf16 %v624_v16, %v623_v43  ;;  %v3101_v0 = vpack.c.bf16 %v642_v30, %v641_v29 }
 0x23b   :  { %v522_v13 = vmax.f32 %v4055_v50, 0.0  ;;  %v518_v14 = vpop.f32.mrb[7].mxu1  ;;  %v619_v54 = vld [vmem:[%s3624_s17 + $0x130] sm:$0xff] }
 0x23c   :  { %v523_v12 = vmax.f32 %v4057_v56, 0.0  ;;  %v620_v14 = vld [vmem:[%s3624_s17 + $0x138] sm:$0xff]  ;;  %3088 = vmatpush3.bf16.msra.mxu1 %v3087_v27  ;;  %v3069_v27 = vpack.c.bf16 %v610_v7, %v609_v2 }
 0x23d   :  { %v3342_v57 = vpack.i.bf16 %v522_v13, %v521_v9  ;;  %v3091_v8 = vpack.c.bf16 %v620_v14, %v619_v54  ;;  %3090 = vmatprep.subr.bf16.mxu1 %v3089_v41  ;;  %v593_v41 = vld [vmem:[%s3624_s17 + $0x60] sm:$0xff] }
 0x23e   :  { %v3347_v32 = vpack.i.bf16 %v3585_v42, %v523_v12 }
 0x23f   :  { %3343 = vrot.lane.b32.xlu1 %v3342_v57, %s3583_s28  ;;  %v3057_v57 = vpack.c.bf16 %v604_v52, %v603_v44  ;;  %v594_v52 = vld [vmem:[%s3624_s17 + $0x68] sm:$0xff] }
 0x240   :  { %3092 = vmatpush3.bf16.msra.mxu1 %v3091_v8  ;;  %v3071_v14 = vpack.c.bf16 %v594_v52, %v593_v41  ;;  %v628_v8 = vld [vmem:[%s3624_s17 + $0x178] sm:$0xff] }
 0x241   :  { %3058 = vmatprep.subr.bf16.mxu0 %v3057_v57  ;;  %3094 = vmatprep.subr.bf16.mxu1 %v3093_v15  ;;  %v643_v57 = vld [vmem:[%s3624_s17 + $0x1f0] sm:$0xff]  ;;  %v3107_v19 = vpack.c.bf16 %v628_v8, %v627_v4 }
 0x243   :  { %3348 = vrot.lane.b32.xlu1 %v3347_v32, %s3583_s28  ;;  %v587_v32 = vld [vmem:[%s3624_s17 + $0x30] sm:$0xff] }
 0x244   :  { %v3059_v10 = vpack.c.bf16 %v588_v58, %v587_v32  ;;  %3096 = vmatpush3.bf16.msra.mxu1 %v3095_v22  ;;  %v644_v32 = vld [vmem:[%s3624_s17 + $0x1f8] sm:$0xff]  ;;  %v611_v58 = vld [vmem:[%s3624_s17 + $0xf0] sm:$0xff]  ;;  %s3588_s17 = smov 112  }
 0x245   :  { %3098 = vmatprep.subr.bf16.mxu1 %v3097_v6  ;;  %v3105_v60 = vpack.c.bf16 %v644_v32, %v643_v57 }
 0x246   :  { %3060 = vmatpush3.bf16.msra.mxu0 %v3059_v10 }
 0x247   :  { %3062 = vmatprep.subr.bf16.mxu0 %v3061_v18  ;;  %v3073_v18 = vpack.c.bf16 %v612_v48, %v611_v58  ;;  %v858_v58 = vld [vmem:[%s3634_s25] sm:$0xff]  ;;  %s3594_s25 = smov 118  }
 0x248   :  { %3100 = vmatpush3.bf16.msra.mxu1 %v3099_v3 }
 0x249   :  { %3102 = vmatprep.subr.bf16.mxu1 %v3101_v0 }
 0x24a   :  { %3064 = vmatpush3.bf16.msra.mxu0 %v3063_v59 }
 0x24b   :  { %3066 = vmatprep.subr.bf16.mxu0 %v3065_v24 }
 0x24c   :  { %3104 = vmatpush3.bf16.msra.mxu1 %v3103_v28 }
 0x24d   :  { %3106 = vmatprep.subr.bf16.mxu1 %v3105_v60  ;;  %v792_v60 = vand.u32 7, %v3827_v31 }
 0x24e   :  { %3068 = vmatpush3.bf16.msra.mxu0 %v3067_v1 }
 0x24f   :  { %3070 = vmatprep.subr.bf16.mxu0 %v3069_v27 }
 0x250   :  { %3108 = vmatpush3.bf16.msra.mxu1 %v3107_v19 }
 0x252   :  { %3072 = vmatpush3.bf16.msra.mxu0 %v3071_v14 }
 0x253   :  { %3074 = vmatprep.subr.bf16.mxu0 %v3073_v18 }
 0x256   :  { %3076 = vmatpush3.bf16.msra.mxu0 %v3075_v36 }
 0x257   :  { %2877 = vmatprep.subr.bf16.mxu0 %v3585_v42 }
 0x2a2   :  { %v530_v21 = vpop.permute.xlu0 %529 }
 0x2b1   :  { %v3344_v37 = vpop.permute.xlu1 %3343 }
 0x2b2   :  { %v3346_v44 = vunpack.i.h.bf16 %v3344_v37  ;;  %v3345_v46 = vunpack.i.l.bf16 %v3344_v37 }
 0x2b4   :  { %v540_v54 = vsel %vm4794_vm12, %v3345_v46, %v3346_v44  ;;  %v539_v23 = vsel %vm4794_vm12, %v530_v21, %v3345_v46 }
 0x2b5   :  { %v4131_v55 = vpop.permute.xlu1 %3348  ;;  %v548_v17 = vsel %vm3861_vm5, %v540_v54, 0.0  ;;  %v547_v29 = vsel %vm3886_vm10, %v539_v23, 0.0  ;;  %vm4890_vm5 = vcmask 588800  }
 0x2b6   :  { %v3351_v10 = vunpack.i.h.bf16 %v4131_v55  ;;  %v3350_v15 = vunpack.i.l.bf16 %v4131_v55  ;;  %v552_v6 = vmax.f32 %v521_v9, %v548_v17  ;;  %v551_v5 = vmax.f32 %v520_v35, %v547_v29 }
 0x2b8   :  { %v541_v45 = vsel %vm4794_vm12, %v3346_v44, %v3350_v15  ;;  %v542_v20 = vsel %vm4794_vm12, %v3350_v15, %v3351_v10 }
 0x2b9   :  { %v549_v22 = vsel %vm3944_vm15, %v541_v45, 0.0  ;;  %v550_v59 = vsel %vm3940_vm14, %v542_v20, 0.0  ;;  %vm4805_vm15 = vcmask 334848  }
 0x2ba   :  { %v553_v43 = vmax.f32 %v522_v13, %v549_v22  ;;  %v554_v16 = vmax.f32 %v523_v12, %v550_v59 }
 0x2bc   :  { %v3352_v24 = vpack.i.bf16 %v553_v43, %v552_v6  ;;  %v3357_v25 = vpack.i.bf16 %v3585_v42, %v554_v16 }
 0x2be   :  { %3353 = vrot.lane.b32.xlu1 %v3352_v24, %s3579_s23  ;;  %3358 = vrot.lane.b32.xlu0 %v3357_v25, %s3579_s23 }
 0x2c2   :  { %559 = vrot.lane.b32.xlu1 %v551_v5, %s3579_s23 }
 0x330   :  { %v3354_v50 = vpop.permute.xlu1 %3353  ;;  %v3359_v56 = vpop.permute.xlu0 %3358 }
 0x331   :  { %v3356_v9 = vunpack.i.h.bf16 %v3354_v50  ;;  %v3355_v13 = vunpack.i.l.bf16 %v3354_v50  ;;  %v3361_v12 = vunpack.i.h.bf16 %v3359_v56  ;;  %v3360_v30 = vunpack.i.l.bf16 %v3359_v56 }
 0x333   :  { %v571_v2 = vsel %vm4861_vm1, %v3356_v9, %v3360_v30  ;;  %v570_v7 = vsel %vm4862_vm2, %v3355_v13, %v3356_v9  ;;  %v572_v3 = vsel %vm4863_vm6, %v3360_v30, %v3361_v12  ;;  %vm4790_vm1 = vcmask 138240   ;;  %v2042_v12 = vld [vmem:[#allocation2 + $0x10] sm:$0xff] }
 0x334   :  { %v579_v1 = vmax.f32 %v553_v43, %v571_v2  ;;  %v560_v0 = vpop.permute.xlu1 %559  ;;  %v578_v33 = vmax.f32 %v552_v6, %v570_v7  ;;  %v580_v34 = vmax.f32 %v554_v16, %v572_v3  ;;  %vm4189_vm2 = vcmp.ge.s32.totalorder %v792_v60, 1 }
 0x335   :  { %v569_v38 = vsel %vm4864_vm11, %v560_v0, %v3355_v13  ;;  %vm4792_vm11 = vmmov 0   ;;  %vm4796_vm6 = vmmov 1  }
 0x336   :  { %v577_v35 = vmax.f32 %v551_v5, %v569_v38  ;;  %709 = vmatprep.mubr.f32.mxu0 %v578_v33  ;;  %779 = vmatprep.mubr.f32.mxu1 %v580_v34  ;;  %vm4197_vm9 = vmpackc.low %vm4796_vm6, %vm4189_vm2  ;;  %vm4801_vm6 = vcmask 777216  }
 0x337   :  { %780 = vmatmul.mubr.f32.vlgmr.msra.gmra.mrb[8].mxu1 %v579_v1 }
 0x338   :  { %710 = vmatmul.mubr.f32.vlgmr.msra.gmra.mrb[0].mxu0 %v577_v35  ;;  %2923 = vmatprep.mubr.msk.f32.mxu1 %vm4792_vm11, %v3585_v42 }
 0x339   :  { %2887 = vmatprep.mubr.msk.bf16.mxu0 %vm4792_vm11, %v3585_v42  ;;  %vm4201_vm11 = vcmp.lt.s32.totalorder %v792_v60, 7 }
 0x33a   :  { %vm4800_vm7 = vmpackc.low %vm4189_vm2, %vm4201_vm11 }
 0x40a   :  { %v2801_v27 = vpop.f32.mrb[8].mxu1 }
 0x40b   :  { %v2766_v28 = vpop.f32.mrb[0].mxu0  ;;  %v2802_v37 = vpop.f32.mrb[9].mxu1 }
 0x40c   :  { %v2803_v44 = vadd.f32 %v2802_v37, %v2801_v27  ;;  %v2767_v46 = vpop.f32.mrb[1].mxu0  ;;  %v927_v37 = vld [vmem:[%s3639_s29] sm:$0xff] }
 0x40d   :  { %v2768_v41 = vadd.f32 %v2767_v46, %v2766_v28  ;;  %v852_v28 = vld [vmem:[%s3629_s21] sm:$0xf]  ;;  %v929_v46 = vld [vmem:[%s3639_s29 + $0x10] sm:$0xff]  ;;  %s3593_s21 = smov 9  }
 0x40f   :  { %v4170_v52 = vadd.f32 %v2803_v44, %v2768_v41  ;;  %v928_v44 = vld [vmem:[%s3639_s29 + $0x8] sm:$0xff]  ;;  %v3592_v41 = vmov 0.0|0.0  }
 0x410   :  { %3109 = vmatprep.subr.bf16.mxu1 %v3592_v41 }
 0x411   :  { %786 = vrot.lane.b32.xlu0 %v4170_v52, %s3586_s9 }
 0x483   :  { %v787_v54 = vpop.permute.xlu0 %786 }
 0x484   :  { %v790_v14 = vsel %vm4790_vm1, 0.0, %v787_v54  ;;  %v791_v57 = vsel %vm4790_vm1, %v787_v54, 0.0  ;;  %vm4798_vm1 = vcmask 900096   ;;  %v3110_v54 = vpack.c.bf16 %v928_v44, %v927_v37 }
 0x485   :  { %v3367_v32 = vpack.i.bf16 %v791_v57, %v790_v14  ;;  %v1021_v37 = vand.u32 3, %v3827_v31 }
 0x486   :  { %3111 = vmatpush3.bf16.msra.mxu1 %v3110_v54 }
 0x487   :  { %3368 = vrot.lane.b32.xlu0 %v3367_v32, %s3580_s22  ;;  %3363 = vrot.lane.b32.xlu1 %v3367_v32, %s3583_s28 }
 0x488   :  { %3112 = vmatprep.subr.bf16.mxu1 %v3592_v41 }
 0x48b   :  { %3378 = vrot.lane.b32.xlu0 %v3367_v32, %s3587_s13  ;;  %3373 = vrot.lane.b32.xlu1 %v3367_v32, %s3588_s17 }
 0x48f   :  { %3388 = vrot.lane.b32.xlu0 %v3367_v32, %s3589_s2  ;;  %3383 = vrot.lane.b32.xlu1 %v3367_v32, %s3579_s23 }
 0x493   :  { %861 = vperm.xlu0 %3341, %v858_v58   ;;  %3393 = vrot.lane.b32.xlu1 %v3367_v32, %s3577_s5 }
 0x4f9   :  { %v3369_v48 = vpop.permute.xlu0 %3368  ;;  %v3364_v4 = vpop.permute.xlu1 %3363 }
 0x4fa   :  { %v3366_v15 = vunpack.i.h.bf16 %v3364_v4  ;;  %v3365_v11 = vunpack.i.l.bf16 %v3364_v4  ;;  %v3371_v61 = vunpack.i.h.bf16 %v3369_v48  ;;  %v3370_v17 = vunpack.i.l.bf16 %v3369_v48 }
 0x4fc   :  { %v843_v18 = vsel %vm4794_vm12, %v3365_v11, %v3366_v15  ;;  %vm4871_vm12 = vcmask 1031168   ;;  %v931_v15 = vld [vmem:[%s3639_s29 + $0x20] sm:$0xff]  ;;  %v932_v11 = vld [vmem:[%s3639_s29 + $0x28] sm:$0xff] }
 0x4fd   :  { %v2597_v36 = vpack.c.bf16 %v843_v18, %v790_v14  ;;  %v3379_v45 = vpop.permute.xlu0 %3378  ;;  %v3374_v20 = vpop.permute.xlu1 %3373  ;;  %v806_v16 = vsel %vm4871_vm12, %v3370_v17, %v3371_v61  ;;  %vm4872_vm12 = vmmov 1   ;;  %v930_v14 = vld [vmem:[%s3639_s29 + $0x18] sm:$0xff]  ;;  %v3116_v18 = vpack.c.bf16 %v932_v11, %v931_v15 }
 0x4fe   :  { %v3381_v22 = vunpack.i.h.bf16 %v3379_v45  ;;  %v3380_v59 = vunpack.i.l.bf16 %v3379_v45  ;;  %v3376_v6 = vunpack.i.h.bf16 %v3374_v20  ;;  %v3375_v43 = vunpack.i.l.bf16 %v3374_v20  ;;  %v934_v45 = vld [vmem:[%s3639_s29 + $0x38] sm:$0xff] }
 0x4ff   :  { %2878 = vmatpush3.bf16.msk.msra.mxu0 %vm4197_vm9, %v2597_v36  ;;  %v3113_v48 = vpack.c.bf16 %v930_v14, %v929_v46  ;;  %v933_v36 = vld [vmem:[%s3639_s29 + $0x30] sm:$0xff] }
 0x500   :  { %v814_v23 = vsel %vm4799_vm0, %v3375_v43, %v3376_v6  ;;  %2879 = vmatprep.subr.bf16.mxu0 %v3585_v42  ;;  %v822_v24 = vsel %vm4798_vm1, %v3380_v59, %v3381_v22  ;;  %vm4224_vm1 = vmpackc.low %vm4201_vm11, %vm4872_vm12  ;;  %vm4875_vm0 = vcmask 785408   ;;  %v3119_v20 = vpack.c.bf16 %v934_v45, %v933_v36  ;;  %v935_v22 = vld [vmem:[%s3639_s29 + $0x40] sm:$0xff]  ;;  %v936_v59 = vld [vmem:[%s3639_s29 + $0x48] sm:$0xff] }
 0x501   :  { %v2600_v25 = vpack.c.bf16 %v814_v23, %v806_v16  ;;  %v3389_v29 = vpop.permute.xlu0 %3388  ;;  %v3384_v5 = vpop.permute.xlu1 %3383  ;;  %v2603_v30 = vpack.c.bf16 %v822_v24, %v4170_v52  ;;  %3114 = vmatpush3.bf16.msra.mxu1 %v3113_v48  ;;  %v3122_v6 = vpack.c.bf16 %v936_v59, %v935_v22  ;;  %v937_v43 = vld [vmem:[%s3639_s29 + $0x50] sm:$0xff]  ;;  %v938_v16 = vld [vmem:[%s3639_s29 + $0x58] sm:$0xff]  ;;  %v939_v24 = vld [vmem:[%s3639_s29 + $0x60] sm:$0xff] }
 0x502   :  { %v3391_v50 = vunpack.i.h.bf16 %v3389_v29  ;;  %v3390_v56 = vunpack.i.l.bf16 %v3389_v29  ;;  %v3386_v9 = vunpack.i.h.bf16 %v3384_v5  ;;  %v3385_v13 = vunpack.i.l.bf16 %v3384_v5  ;;  %3115 = vmatprep.subr.bf16.mxu1 %v3592_v41  ;;  %v941_v5 = vld [vmem:[%s3639_s29 + $0x70] sm:$0xff]  ;;  %v1056_v22 = vld [vmem:[%s3644_s3] sm:$0xf]  ;;  %s3597_s3 = smov 5  }
 0x503   :  { %2880 = vmatpush3.bf16.msk.msra.mxu0 %vm4800_vm7, %v2600_v25  ;;  %vm4876_vm7 = vcmask 769024   ;;  %v3125_v23 = vpack.c.bf16 %v938_v16, %v937_v43  ;;  %v940_v25 = vld [vmem:[%s3639_s29 + $0x68] sm:$0xff]  ;;  %v1129_v59 = vld [vmem:[%s3654_s14] sm:$0xff]  ;;  %v1131_v43 = vld [vmem:[%s3654_s14 + $0x10] sm:$0xff] }
 0x504   :  { %2881 = vmatprep.subr.bf16.mxu0 %v3585_v42  ;;  %v850_v7 = vsel %vm4801_vm6, %v3390_v56, %v3391_v50  ;;  %v829_v3 = vsel %vm4875_vm0, %v3385_v13, %v3386_v9  ;;  %vm4877_vm0 = vcmask 1043456   ;;  %vm4802_vm6 = vcmask 588800   ;;  %v942_v50 = vld [vmem:[%s3639_s29 + $0x78] sm:$0xff]  ;;  %s3595_s29 = smov 120  }
 0x505   :  { %v3394_v2 = vpop.permute.xlu1 %3393  ;;  %v2606_v34 = vpack.c.bf16 %v850_v7, %v829_v3  ;;  %3117 = vmatpush3.bf16.msra.mxu1 %v3116_v18  ;;  %v3128_v29 = vpack.c.bf16 %v940_v25, %v939_v24  ;;  %v3131_v56 = vpack.c.bf16 %v942_v50, %v941_v5  ;;  %v1132_v24 = vld [vmem:[%s3654_s14 + $0x18] sm:$0xff] }
 0x506   :  { %v3396_v1 = vunpack.i.h.bf16 %v3394_v2  ;;  %v3395_v0 = vunpack.i.l.bf16 %v3394_v2  ;;  %3118 = vmatprep.subr.bf16.mxu1 %v3592_v41 }
 0x507   :  { %2882 = vmatpush3.bf16.msk.msra.mxu0 %vm4224_vm1, %v2603_v30 }
 0x508   :  { %v836_v33 = vsel %vm4876_vm7, %v3395_v0, %v3396_v1  ;;  %2883 = vmatprep.subr.bf16.mxu0 %v3585_v42  ;;  %vm4878_vm7 = vmmov 0  }
 0x509   :  { %v838_v38 = vsel %vm4201_vm11, %v836_v33, 0.0  ;;  %3120 = vmatpush3.bf16.msra.mxu1 %v3119_v20 }
 0x50a   :  { %v857_v35 = vpack.c.bf16 %v838_v38, %v838_v38  ;;  %3121 = vmatprep.subr.bf16.mxu1 %v3592_v41 }
 0x50b   :  { %2884 = vmatpush3.bf16.msk.msra.mxu0 %vm4197_vm9, %v2606_v34 }
 0x50c   :  { %2885 = vmatprep.subr.bf16.mxu0 %v3585_v42  ;;  %v869_v27 = vsel %vm4877_vm0, %v857_v35, 0  ;;  %vm4879_vm0 = vcmask 1039360  }
 0x50d   :  { %3123 = vmatpush3.bf16.msra.mxu1 %v3122_v6  ;;  %v1130_v6 = vld [vmem:[%s3654_s14 + $0x8] sm:$0xff]  ;;  %s3599_s14 = smov 124  }
 0x50e   :  { %3124 = vmatprep.subr.bf16.mxu1 %v3592_v41 }
 0x50f   :  { %2886 = vmatpush3.bf16.msra.mxu0 %v869_v27 }
 0x510   :  { %2926 = vmatprep.subr.bf16.mxu0 %v3585_v42 }
 0x511   :  { %3126 = vmatpush3.bf16.msra.mxu1 %v3125_v23  ;;  %v3134_v23 = vpack.c.bf16 %v1130_v6, %v1129_v59 }
 0x512   :  { %2888 = vmatmul.mubr.msk.bf16.vlgmr.msra.gmra.mrb[4].mxu0 %vm4802_vm6, %v852_v28  ;;  %v862_v57 = vpop.permute.xlu0 %861  ;;  %3127 = vmatprep.subr.bf16.mxu1 %v3592_v41  ;;  %vm4880_vm6 = vcmask 916480   ;;  %v1062_v28 = vld [vmem:[%s3649_s8] sm:$0xff]  ;;  %s3598_s8 = smov 122  }
 0x513   :  { %2936 = vmatprep.mubr.msk.bf16.mxu0 %vm4878_vm7, %v3585_v42 }
 0x515   :  { %3129 = vmatpush3.bf16.msra.mxu1 %v3128_v29  ;;  %v3137_v29 = vpack.c.bf16 %v1132_v24, %v1131_v43  ;;  %v1249_v43 = vld [vmem:[%s3659_s19] sm:$0xf]  ;;  %s4902_s19 = sld [smem:[#allocation5_spill]] }
 0x516   :  { %3130 = vmatprep.subr.bf16.mxu1 %v3592_v41 }
 0x519   :  { %3132 = vmatpush3.bf16.msra.mxu1 %v3131_v56 }
 0x51a   :  { %3133 = vmatprep.subr.bf16.mxu1 %v3592_v41 }
 0x5e5   :  { %v905_v32 = vpop.f32.mrb[4].mxu0 }
 0x5e6   :  { %v906_v58 = vadd.f32 %v905_v32, %v862_v57  ;;  %v2889_v60 = vpop.f32.mrb[5].mxu0 }
 0x5e7   :  { %v908_v4 = vpop.f32.mrb[6].mxu0 }
 0x5e8   :  { %v911_v61 = vmax.f32 %v906_v58, 0.0  ;;  %v2890_v17 = vpop.f32.mrb[7].mxu0 }
 0x5ea   :  { %913 = vrot.lane.b32.xlu1 %v911_v61, %s3583_s28 }
 0x65c   :  { %v914_v9 = vpop.permute.xlu1 %913 }
 0x65d   :  { %v915_v13 = vsel %vm4879_vm0, %v914_v9, %v3351_v10  ;;  %vm4806_vm0 = vcmask 72704  }
 0x65e   :  { %v917_v30 = vsel %vm4201_vm11, %v915_v13, 0.0 }
 0x65f   :  { %v918_v2 = vmax.f32 %v911_v61, %v917_v30 }
 0x661   :  { %v3397_v7 = vpack.i.bf16 %v3585_v42, %v918_v2 }
 0x663   :  { %3398 = vrot.lane.b32.xlu0 %v3397_v7, %s3588_s17 }
 0x6d5   :  { %v3399_v3 = vpop.permute.xlu0 %3398 }
 0x6d6   :  { %v3401_v1 = vunpack.i.h.bf16 %v3399_v3  ;;  %v3400_v0 = vunpack.i.l.bf16 %v3399_v3 }
 0x6d8   :  { %v924_v33 = vsel %vm4880_vm6, %v3400_v0, %v3401_v1  ;;  %vm4297_vm6 = vcmp.ge.s32.totalorder %v1021_v37, 1 }
 0x6d9   :  { %v926_v34 = vmax.f32 %v918_v2, %v924_v33 }
 0x6db   :  { %2924 = vmatmul.mubr.f32.vlgmr.msra.gmra.mrb[10].mxu1 %v926_v34 }
 0x6dc   :  { %2948 = vmatprep.mubr.msk.f32.mxu1 %vm4878_vm7, %v3585_v42  ;;  %3135 = vmatpush3.bf16.msra.mxu1 %v3134_v23 }
 0x6dd   :  { %3136 = vmatprep.subr.bf16.mxu1 %v3592_v41 }
 0x6e0   :  { %3138 = vmatpush3.bf16.msra.mxu1 %v3137_v29 }
 0x6e1   :  { %2965 = vmatprep.subr.mxu1 %v3585_v42 }
 0x7ae   :  { %v4282_v55 = vpop.f32.mrb[10].mxu1 }
 0x7af   :  { %1014 = vrot.lane.b32.xlu1 %v4282_v55, %s3593_s21  ;;  %v2925_v10 = vpop.f32.mrb[11].mxu1 }
 0x821   :  { %v1015_v38 = vpop.permute.xlu1 %1014 }
 0x822   :  { %v1018_v35 = vsel %vm4806_vm0, 0.0, %v1015_v38  ;;  %vm4308_vm0 = vcmp.lt.s32.totalorder %v1021_v37, 3  ;;  %v1214_v37 = vand.u32 1, %v3827_v31 }
 0x823   :  { %v1020_v27 = vsel %vm4805_vm15, %v1018_v35, 0.0  ;;  %vm4304_vm15 = vmpackc.low %vm4872_vm12, %vm4297_vm6 }
 0x824   :  { %1030 = vrot.lane.b32.xlu1 %v1020_v27, %s3580_s22  ;;  %1050 = vrot.lane.b32.xlu0 %v1020_v27, %s3583_s28  ;;  %vm4811_vm10 = vmpackc.low %vm4297_vm6, %vm4308_vm0 }
 0x825   :  { %vm4328_vm14 = vmpackc.low %vm4308_vm0, %vm4872_vm12 }
 0x828   :  { %1038 = vrot.lane.b32.xlu1 %v1020_v27, %s3594_s25  ;;  %1034 = vrot.lane.b32.xlu0 %v1020_v27, %s3595_s29 }
 0x82c   :  { %1053 = vrot.lane.b32.xlu1 %v1020_v27, %s3596_s7  ;;  %1042 = vrot.lane.b32.xlu0 %v1020_v27, %s3588_s17 }
 0x830   :  { %1046 = vrot.lane.b32.xlu0 %v1020_v27, %s3587_s13  ;;  %1065 = vperm.xlu1 %3402, %v1062_v28   ;;  %v1255_v28 = vld [vmem:[%s3664_s24] sm:$0xff]  ;;  %s4901_s24 = sld [smem:[#allocation7_spill]] }
 0x896   :  { %v1031_v46 = vpop.permute.xlu1 %1030  ;;  %v1051_v54 = vpop.permute.xlu0 %1050 }
 0x897   :  { %v2610_v57 = vpack.c.bf16 %v1051_v54, %v1020_v27 }
 0x899   :  { %2927 = vmatpush3.bf16.msk.msra.mxu0 %vm4304_vm15, %v2610_v57 }
 0x89a   :  { %v1039_v58 = vpop.permute.xlu1 %1038  ;;  %v1035_v60 = vpop.permute.xlu0 %1034  ;;  %2928 = vmatprep.subr.bf16.mxu0 %v3585_v42 }
 0x89b   :  { %v2613_v48 = vpack.c.bf16 %v1035_v60, %v1031_v46  ;;  %v2616_v11 = vpack.c.bf16 %v1039_v58, %v4282_v55 }
 0x89d   :  { %2929 = vmatpush3.bf16.msk.msra.mxu0 %vm4811_vm10, %v2613_v48  ;;  %vm4889_vm10 = vcmask 1043456  }
 0x89e   :  { %v1043_v4 = vpop.permute.xlu0 %1042  ;;  %2930 = vmatprep.subr.bf16.mxu0 %v3585_v42  ;;  %v1054_v61 = vpop.permute.xlu1 %1053 }
 0x89f   :  { %v2619_v18 = vpack.c.bf16 %v1054_v61, %v1043_v4 }
 0x8a1   :  { %2931 = vmatpush3.bf16.msk.msra.mxu0 %vm4328_vm14, %v2616_v11 }
 0x8a2   :  { %v1047_v17 = vpop.permute.xlu0 %1046  ;;  %2932 = vmatprep.subr.bf16.mxu0 %v3585_v42 }
 0x8a3   :  { %v1049_v36 = vsel %vm4308_vm0, %v1047_v17, 0.0  ;;  %v1679_v17 = vld [vmem:[%s4912_s15] sm:$0xff] }
 0x8a4   :  { %v1061_v45 = vpack.c.bf16 %v1049_v36, %v1049_v36 }
 0x8a5   :  { %2933 = vmatpush3.bf16.msk.msra.mxu0 %vm4304_vm15, %v2619_v18 }
 0x8a6   :  { %2934 = vmatprep.subr.bf16.mxu0 %v3585_v42  ;;  %v1072_v20 = vsel %vm4889_vm10, %v1061_v45, 0  ;;  %vm4816_vm10 = vcmask 261120  }
 0x8a9   :  { %2935 = vmatpush3.bf16.msra.mxu0 %v1072_v20 }
 0x8aa   :  { %2951 = vmatprep.subr.bf16.mxu0 %v3585_v42 }
 0x8ac   :  { %2937 = vmatmul.mubr.msk.bf16.vlgmr.msra.gmra.mrb[8].mxu0 %vm4890_vm5, %v1056_v22  ;;  %vm4818_vm5 = vcmask 39936  }
 0x8ad   :  { %2961 = vmatprep.mubr.msk.bf16.mxu0 %vm4878_vm7, %v3585_v42 }
 0x8af   :  { %v1066_v16 = vpop.permute.xlu1 %1065 }
 0x97f   :  { %v1108_v25 = vpop.f32.mrb[8].mxu0 }
 0x980   :  { %v1109_v5 = vadd.f32 %v1108_v25, %v1066_v16  ;;  %v2938_v50 = vpop.f32.mrb[9].mxu0 }
 0x981   :  { %v1111_v56 = vpop.f32.mrb[10].mxu0 }
 0x982   :  { %v1114_v9 = vmax.f32 %v1109_v5, 0.0  ;;  %v2939_v13 = vpop.f32.mrb[11].mxu0 }
 0x983   :  { %v1322_v13 = vld [vmem:[%s3669_s30] sm:$0xff]  ;;  %s4903_s30 = sld [smem:[#allocation6_spill]] }
 0x984   :  { %v1116_v30 = vsel %vm4816_vm10, %v1114_v9, 0.0 }
 0x985   :  { %1118 = vrot.lane.b32.xlu0 %v1116_v30, %s3583_s28 }
 0x9f7   :  { %v1119_v2 = vpop.permute.xlu0 %1118 }
 0x9f8   :  { %v1121_v7 = vsel %vm4308_vm0, %v1119_v2, 0.0 }
 0x9f9   :  { %v1122_v3 = vmax.f32 %v1114_v9, %v1121_v7  ;;  %v1398_v9 = vld [vmem:[%s3679_s12] sm:$0xff]  ;;  %s4904_s12 = sld [smem:[#allocation8_spill]] }
 0x9fb   :  { %v1123_v1 = vsel %vm4816_vm10, %v1122_v3, 0.0 }
 0x9fc   :  { %1125 = vrot.lane.b32.xlu1 %v1123_v1, %s3595_s29  ;;  %v1453_v1 = vld [vmem:[%s4901_s24] sm:$0xff] }
 0xa6e   :  { %v1126_v0 = vpop.permute.xlu1 %1125 }
 0xa6f   :  { %v1128_v33 = vmax.f32 %v1122_v3, %v1126_v0 }
 0xa71   :  { %2949 = vmatmul.mubr.msk.f32.vlgmr.msra.gmra.mrb[12].mxu1 %vm4816_vm10, %v1128_v33  ;;  %vm4377_vm10 = vcmp.ge.s32.totalorder %v1214_v37, 1 }
 0xa72   :  { %2967 = vmatprep.mubr.msk.f32.mxu1 %vm4878_vm7, %v3585_v42  ;;  %2966 = vmatpush3.msra.mxu1 %v1322_v13 }
 0xa73   :  { %2970 = vmatprep.subr.bf16.mxu1 %v3585_v42 }
 0xb44   :  { %v4362_v34 = vpop.f32.mrb[12].mxu1 }
 0xb45   :  { %1207 = vrot.lane.b32.xlu0 %v4362_v34, %s3597_s3  ;;  %v2950_v10 = vpop.f32.mrb[13].mxu1 }
 0xbb7   :  { %v1208_v38 = vpop.permute.xlu0 %1207 }
 0xbb8   :  { %v1211_v35 = vsel %vm4818_vm5, 0.0, %v1208_v38  ;;  %vm4388_vm5 = vcmp.lt.s32.totalorder %v1214_v37, 1 }
 0xbb9   :  { %v1213_v27 = vsel %vm4817_vm8, %v1211_v35, 0.0  ;;  %vm4384_vm8 = vmpackc.low %vm4872_vm12, %vm4377_vm10 }
 0xbba   :  { %1223 = vrot.lane.b32.xlu0 %v1213_v27, %s3580_s22  ;;  %1243 = vrot.lane.b32.xlu1 %v1213_v27, %s3583_s28  ;;  %vm4823_vm4 = vmpackc.low %vm4377_vm10, %vm4388_vm5 }
 0xbbb   :  { %vm4408_vm13 = vmpackc.low %vm4388_vm5, %vm4872_vm12  ;;  %vm4900_vm12 = vcmask 588800  }
 0xbbe   :  { %1231 = vrot.lane.b32.xlu0 %v1213_v27, %s3598_s8  ;;  %1227 = vrot.lane.b32.xlu1 %v1213_v27, %s3599_s14 }
 0xbc2   :  { %1246 = vrot.lane.b32.xlu0 %v1213_v27, %s3600_s10  ;;  %1235 = vrot.lane.b32.xlu1 %v1213_v27, %s3595_s29 }
 0xbc6   :  { %1258 = vperm.xlu0 %3341, %v1255_v28   ;;  %1239 = vrot.lane.b32.xlu1 %v1213_v27, %s3594_s25  ;;  %v1396_v28 = vld [vmem:[%s4902_s19] sm:$0xf] }
 0xc2c   :  { %v1224_v54 = vpop.permute.xlu0 %1223  ;;  %v1244_v57 = vpop.permute.xlu1 %1243 }
 0xc2d   :  { %v2624_v60 = vpack.c.bf16 %v1244_v57, %v1213_v27 }
 0xc2f   :  { %2952 = vmatpush3.bf16.msk.msra.mxu0 %vm4384_vm8, %v2624_v60 }
 0xc30   :  { %v1232_v31 = vpop.permute.xlu0 %1231  ;;  %v1228_v4 = vpop.permute.xlu1 %1227  ;;  %2953 = vmatprep.subr.bf16.mxu0 %v3585_v42 }
 0xc31   :  { %v2627_v11 = vpack.c.bf16 %v1228_v4, %v1224_v54  ;;  %v2630_v18 = vpack.c.bf16 %v1232_v31, %v4362_v34 }
 0xc33   :  { %2954 = vmatpush3.bf16.msk.msra.mxu0 %vm4823_vm4, %v2627_v11  ;;  %vm4899_vm4 = vcmask 1043456  }
 0xc34   :  { %v1236_v61 = vpop.permute.xlu1 %1235  ;;  %2955 = vmatprep.subr.bf16.mxu0 %v3585_v42  ;;  %v1247_v36 = vpop.permute.xlu0 %1246 }
 0xc35   :  { %v2633_v20 = vpack.c.bf16 %v1247_v36, %v1236_v61  ;;  %v1451_v36 = vld [vmem:[%s4903_s30] sm:$0xf] }
 0xc37   :  { %2956 = vmatpush3.bf16.msk.msra.mxu0 %vm4408_vm13, %v2630_v18 }
 0xc38   :  { %v1240_v45 = vpop.permute.xlu1 %1239  ;;  %2957 = vmatprep.subr.bf16.mxu0 %v3585_v42 }
 0xc39   :  { %v1242_v22 = vsel %vm4388_vm5, %v1240_v45, 0.0  ;;  %v1507_v45 = vld [vmem:[%s4904_s12] sm:$0x3] }
 0xc3a   :  { %v1254_v59 = vpack.c.bf16 %v1242_v22, %v1242_v22 }
 0xc3b   :  { %2958 = vmatpush3.bf16.msk.msra.mxu0 %vm4384_vm8, %v2633_v20 }
 0xc3c   :  { %2959 = vmatprep.subr.bf16.mxu0 %v3585_v42  ;;  %v1265_v6 = vsel %vm4899_vm4, %v1254_v59, 0 }
 0xc3f   :  { %2960 = vmatpush3.bf16.msra.mxu0 %v1265_v6 }
 0xc40   :  { %2987 = vmatprep.subr.bf16.mxu0 %v3585_v42 }
 0xc42   :  { %2962 = vmatmul.mubr.msk.bf16.vlgmr.msra.gmra.mrb[12].mxu0 %vm4900_vm12, %v1249_v43  ;;  %vm4905_vm12 = vmmov %vm4899_vm4 }
 0xc43   :  { %2997 = vmatprep.mubr.msk.bf16.mxu0 %vm4878_vm7, %v3585_v42 }
 0xc45   :  { %v1259_v16 = vpop.permute.xlu0 %1258 }
 0xd15   :  { %v1301_v23 = vpop.f32.mrb[12].mxu0 }
 0xd16   :  { %v1302_v24 = vadd.f32 %v1301_v23, %v1259_v16  ;;  %v2963_v25 = vpop.f32.mrb[13].mxu0 }
 0xd17   :  { %v1304_v29 = vpop.f32.mrb[14].mxu0 }
 0xd18   :  { %v1307_v5 = vmax.f32 %v1302_v24, 0.0  ;;  %v2964_v50 = vpop.f32.mrb[15].mxu0 }
 0xd1a   :  { %v1309_v56 = vsel %vm4827_vm3, %v1307_v5, 0.0 }
 0xd1b   :  { %1311 = vrot.lane.b32.xlu1 %v1309_v56, %s3583_s28 }
 0xd1f   :  { %1401 = vperm.xlu1 %3402, %v1398_v9   ;;  %v1625_v9 = vld [vmem:[%s4907_s11] sm:$0xff] }
 0xd8d   :  { %v1312_v30 = vpop.permute.xlu1 %1311 }
 0xd8e   :  { %v1314_v2 = vsel %vm4388_vm5, %v1312_v30, 0.0 }
 0xd8f   :  { %v1315_v7 = vmax.f32 %v1307_v5, %v1314_v2 }
 0xd91   :  { %v1316_v3 = vsel %vm4827_vm3, %v1315_v7, 0.0 }
 0xd92   :  { %1318 = vrot.lane.b32.xlu0 %v1316_v3, %s3599_s14 }
 0xd96   :  { %1456 = vperm.xlu0 %3341, %v1453_v1  }
 0xd9e   :  { %v1402_v37 = vpop.permute.xlu1 %1401 }
 0xe04   :  { %v1319_v0 = vpop.permute.xlu0 %1318 }
 0xe05   :  { %v1321_v33 = vmax.f32 %v1315_v7, %v1319_v0 }
 0xe07   :  { %2968 = vmatmul.mubr.msk.f32.vlgmr.msra.gmra.mrb[14].mxu1 %vm4827_vm3, %v1321_v33 }
 0xe08   :  { %2972 = vmatprep.mubr.msk.bf16.mxu1 %vm4878_vm7, %v3585_v42 }
 0xe15   :  { %v1457_v20 = vpop.permute.xlu0 %1456 }
 0xeda   :  { %v1392_v10 = vpop.f32.mrb[14].mxu1 }
 0xedb   :  { %v1397_v38 = vpack.c.bf16 %v1392_v10, %v1392_v10  ;;  %v2969_v35 = vpop.f32.mrb[15].mxu1 }
 0xedd   :  { %v1408_v27 = vsel %vm4899_vm4, %v1397_v38, 0  ;;  %vm4906_vm4 = vcmask 1041408  }
 0xede   :  { %2971 = vmatpush3.bf16.msra.mxu1 %v1408_v27 }
 0xedf   :  { %2976 = vmatprep.subr.bf16.mxu1 %v3585_v42 }
 0xee1   :  { %2973 = vmatmul.mubr.msk.bf16.vlgmr.msra.gmra.mrb[16].mxu1 %vm4827_vm3, %v1396_v28 }
 0xee2   :  { %2978 = vmatprep.mubr.msk.bf16.mxu1 %vm4878_vm7, %v3585_v42 }
 0xfb4   :  { %v1444_v54 = vpop.f32.mrb[16].mxu1 }
 0xfb5   :  { %v1445_v57 = vadd.f32 %v1444_v54, %v1402_v37  ;;  %v2974_v60 = vpop.f32.mrb[17].mxu1  ;;  %v1619_v37 = vld [vmem:[%s4911_s16] sm:$0xf] }
 0xfb6   :  { %v1447_v31 = vpop.f32.mrb[18].mxu1 }
 0xfb7   :  { %v1450_v4 = vmax.f32 %v1445_v57, 0.0  ;;  %v2975_v11 = vpop.f32.mrb[19].mxu1 }
 0xfb9   :  { %v1452_v61 = vpack.c.bf16 %v1450_v4, %v1450_v4 }
 0xfbb   :  { %v1463_v18 = vsel %vm4905_vm12, %v1452_v61, 0  ;;  %vm1508_vm12 = vcmask 15360  }
 0xfbc   :  { %2977 = vmatpush3.bf16.msra.mxu1 %v1463_v18 }
 0xfbd   :  { %2982 = vmatprep.subr.mxu1 %v3585_v42 }
 0xfbf   :  { %2979 = vmatmul.mubr.msk.bf16.vlgmr.msra.gmra.mrb[20].mxu1 %vm4827_vm3, %v1451_v36  ;;  %vm4909_vm3 = vcmask 105472  }
 0xfc0   :  { %2984 = vmatprep.mubr.msk.f32.mxu1 %vm4878_vm7, %v3585_v42  ;;  %2983 = vmatpush3.msk.msra.mxu1 %vm4906_vm4, %v1507_v45  ;;  %vm4908_vm4 = vcmask 39936  }
 0xfc1   :  { %3001 = vmatprep.subr.mxu1 %v3585_v42 }
0x1092   :  { %v1499_v22 = vpop.f32.mrb[20].mxu1 }
0x1093   :  { %v1500_v59 = vadd.f32 %v1499_v22, %v1457_v20  ;;  %v2980_v6 = vpop.f32.mrb[21].mxu1 }
0x1094   :  { %v1502_v43 = vpop.f32.mrb[22].mxu1 }
0x1095   :  { %v1505_v16 = vmax.f32 %v1500_v59, 0.0  ;;  %v2981_v23 = vpop.f32.mrb[23].mxu1 }
0x1097   :  { %v1506_v24 = vadd.f32 %v1505_v16, %v1392_v10 }
0x1099   :  { %2985 = vmatmul.mubr.msk.f32.vlgmr.msra.gmra.mrb[24].mxu1 %vm1508_vm12, %v1506_v24  ;;  %vm4918_vm12 = vcmask 334848  }
0x109a   :  { %3003 = vmatprep.mubr.msk.f32.mxu1 %vm4878_vm7, %v3585_v42  ;;  %3002 = vmatpush3.msra.mxu1 %v1679_v17 }
0x109b   :  { %3006 = vmatprep.subr.bf16.mxu1 %v3585_v42 }
0x116c   :  { %v1581_v25 = vpop.f32.mrb[24].mxu1 }
0x116d   :  { %1586 = vrot.lane.b32.xlu1 %v1581_v25, %s3597_s3  ;;  %v2986_v29 = vpop.f32.mrb[25].mxu1 }
0x11df   :  { %v1587_v5 = vpop.permute.xlu1 %1586 }
0x11e0   :  { %v1589_v50 = vsel %vm4908_vm4, 0.0, %v1587_v5  ;;  %vm4919_vm4 = vmpackc.low %vm4297_vm6, %vm4308_vm0 }
0x11e1   :  { %v1590_v56 = vsel %vm4909_vm3, %v1589_v50, 0.0  ;;  %vm4910_vm3 = vmpackc.low %vm4377_vm10, %vm4388_vm5  ;;  %vm4913_vm10 = vcmask 1043456  }
0x11e2   :  { %1593 = vrot.lane.b32.xlu1 %v1590_v56, %s3580_s22  ;;  %1613 = vrot.lane.b32.xlu0 %v1590_v56, %s3583_s28  ;;  %vm4922_vm6 = vmmov %vm4913_vm10 }
0x11e6   :  { %1601 = vrot.lane.b32.xlu1 %v1590_v56, %s3598_s8  ;;  %1597 = vrot.lane.b32.xlu0 %v1590_v56, %s3599_s14 }
0x11ea   :  { %1616 = vrot.lane.b32.xlu1 %v1590_v56, %s3600_s10  ;;  %1605 = vrot.lane.b32.xlu0 %v1590_v56, %s3595_s29 }
0x11ee   :  { %1628 = vperm.xlu1 %3402, %v1625_v9   ;;  %1609 = vrot.lane.b32.xlu0 %v1590_v56, %s3594_s25 }
0x1254   :  { %v1594_v13 = vpop.permute.xlu1 %1593  ;;  %v1614_v30 = vpop.permute.xlu0 %1613 }
0x1255   :  { %v2642_v2 = vpack.c.bf16 %v1614_v30, %v1590_v56 }
0x1257   :  { %2988 = vmatpush3.bf16.msk.msra.mxu0 %vm4384_vm8, %v2642_v2 }
0x1258   :  { %v1602_v7 = vpop.permute.xlu1 %1601  ;;  %v1598_v3 = vpop.permute.xlu0 %1597  ;;  %2989 = vmatprep.subr.bf16.mxu0 %v3585_v42 }
0x1259   :  { %v2645_v1 = vpack.c.bf16 %v1598_v3, %v1594_v13  ;;  %v2648_v33 = vpack.c.bf16 %v1602_v7, %v1581_v25 }
0x125b   :  { %2990 = vmatpush3.bf16.msk.msra.mxu0 %vm4910_vm3, %v2645_v1 }
0x125c   :  { %v1606_v0 = vpop.permute.xlu0 %1605  ;;  %2991 = vmatprep.subr.bf16.mxu0 %v3585_v42  ;;  %v1617_v10 = vpop.permute.xlu1 %1616 }
0x125d   :  { %v2651_v35 = vpack.c.bf16 %v1617_v10, %v1606_v0 }
0x125f   :  { %2992 = vmatpush3.bf16.msk.msra.mxu0 %vm4408_vm13, %v2648_v33  ;;  %vm4914_vm13 = vcmask 588800  }
0x1260   :  { %v1610_v38 = vpop.permute.xlu0 %1609  ;;  %2993 = vmatprep.subr.bf16.mxu0 %v3585_v42 }
0x1261   :  { %v1612_v46 = vsel %vm4388_vm5, %v1610_v38, 0.0  ;;  %vm4917_vm5 = vcmask 72704  }
0x1262   :  { %v1624_v27 = vpack.c.bf16 %v1612_v46, %v1612_v46 }
0x1263   :  { %2994 = vmatpush3.bf16.msk.msra.mxu0 %vm4384_vm8, %v2651_v35  ;;  %vm4916_vm8 = vcmask 64512  }
0x1264   :  { %2995 = vmatprep.subr.bf16.mxu0 %v3585_v42  ;;  %v1635_v28 = vsel %vm4913_vm10, %v1624_v27, 0  ;;  %vm4929_vm10 = vcmask 1031168  }
0x1267   :  { %2996 = vmatpush3.bf16.msra.mxu0 %v1635_v28 }
0x1268   :  { %3139 = vmatprep.subr.bf16.mxu0 %v3592_v41 }
0x126a   :  { %2998 = vmatmul.mubr.msk.bf16.vlgmr.msra.gmra.mrb[16].mxu0 %vm4914_vm13, %v1619_v37 }
0x126b   :  { %3028 = vmatprep.mubr.msk.f32.mxu0 %vm4878_vm7, %v3585_v42 }
0x126d   :  { %v1629_v48 = vpop.permute.xlu1 %1628 }
0x133d   :  { %v1671_v58 = vpop.f32.mrb[16].mxu0 }
0x133e   :  { %v1672_v54 = vadd.f32 %v1671_v58, %v1629_v48  ;;  %v2999_v57 = vpop.f32.mrb[17].mxu0  ;;  %v2041_v58 = vld [vmem:[#allocation2 + $0x8] sm:$0xff] }
0x133f   :  { %v1674_v60 = vpop.f32.mrb[18].mxu0 }
0x1340   :  { %v1677_v31 = vmax.f32 %v1672_v54, 0.0  ;;  %v3000_v4 = vpop.f32.mrb[19].mxu0  ;;  %v2045_v54 = vld [vmem:[#allocation2 + $0x28] sm:$0xff]  ;;  %v2040_v60 = vld [vmem:[#allocation2] sm:$0xff] }
0x1341   :  { %v3145_v57 = vpack.c.bf16 %v2045_v54, %v2041_v58 }
0x1342   :  { %v1678_v11 = vadd.f32 %v1677_v31, %v4362_v34  ;;  %v1793_v34 = vld [vmem:[%s4915_s18] sm:$0xff] }
0x1343   :  { %v2044_v31 = vld [vmem:[#allocation2 + $0x20] sm:$0xff] }
0x1344   :  { %3004 = vmatmul.mubr.msk.f32.vlgmr.msra.gmra.mrb[26].mxu1 %vm4916_vm8, %v1678_v11  ;;  %v3147_v4 = vpack.c.bf16 %v2044_v31, %v2040_v60  ;;  %v2049_v11 = vld [vmem:[#allocation2 + $0x48] sm:$0xff]  ;;  %vm4931_vm8 = vcmask 900096  }
0x1345   :  { %3016 = vmatprep.mubr.msk.bf16.mxu1 %vm4878_vm7, %v3585_v42 }
0x1417   :  { %v1749_v61 = vpop.f32.mrb[26].mxu1 }
0x1418   :  { %1754 = vrot.lane.b32.xlu0 %v1749_v61, %s3593_s21  ;;  %v3005_v18 = vpop.f32.mrb[27].mxu1  ;;  %s4920_s21 = sld [smem:[#allocation12_spill]] }
0x141e   :  { %v1787_v15 = vld [vmem:[%s4920_s21] sm:$0xf] }
0x148a   :  { %v1755_v36 = vpop.permute.xlu0 %1754 }
0x148b   :  { %v1757_v45 = vsel %vm4917_vm5, 0.0, %v1755_v36  ;;  %v2048_v36 = vld [vmem:[#allocation2 + $0x40] sm:$0xff]  ;;  %vm4932_vm5 = vmpackc.low %vm4189_vm2, %vm4201_vm11 }
0x148c   :  { %v1758_v20 = vsel %vm4918_vm12, %v1757_v45, 0.0  ;;  %v2052_v45 = vld [vmem:[#allocation2 + $0x60] sm:$0xff]  ;;  %vm4933_vm12 = vcmask 777216  }
0x148d   :  { %1761 = vrot.lane.b32.xlu0 %v1758_v20, %s3580_s22  ;;  %1781 = vrot.lane.b32.xlu1 %v1758_v20, %s3583_s28 }
0x1491   :  { %1769 = vrot.lane.b32.xlu0 %v1758_v20, %s3594_s25  ;;  %1765 = vrot.lane.b32.xlu1 %v1758_v20, %s3595_s29  ;;  %s4921_s25 = sld [smem:[#allocation14_spill]]  ;;  %s4925_s29 = sld [smem:[#allocation16_spill]] }
0x1495   :  { %1784 = vrot.lane.b32.xlu0 %v1758_v20, %s3596_s7  ;;  %1773 = vrot.lane.b32.xlu1 %v1758_v20, %s3588_s17 }
0x1497   :  { %v1847_v13 = vld [vmem:[%s4921_s25] sm:$0xff]  ;;  %v1848_v30 = vld [vmem:[%s4921_s25 + $0x8] sm:$0xff]  ;;  %v1849_v32 = vld [vmem:[%s4921_s25 + $0x10] sm:$0xff] }
0x1498   :  { %v3140_v2 = vpack.c.bf16 %v1848_v30, %v1847_v13  ;;  %v1850_v7 = vld [vmem:[%s4921_s25 + $0x18] sm:$0xff]  ;;  %v1986_v48 = vld [vmem:[%s4925_s29] sm:$0xff] }
0x1499   :  { %1796 = vperm.xlu0 %3341, %v1793_v34   ;;  %1777 = vrot.lane.b32.xlu1 %v1758_v20, %s3587_s13  ;;  %v3143_v14 = vpack.c.bf16 %v1850_v7, %v1849_v32  ;;  %v2057_v34 = vld [vmem:[#allocation2 + $0x88] sm:$0xff]  ;;  %v2076_v13 = vld [vmem:[#allocation2 + $0x120] sm:$0xff] }
0x149a   :  { %3141 = vmatpush3.bf16.msra.mxu0 %v3140_v2  ;;  %v2081_v2 = vld [vmem:[#allocation2 + $0x148] sm:$0xff] }
0x149b   :  { %3142 = vmatprep.subr.bf16.mxu0 %v3592_v41  ;;  %v2085_v32 = vld [vmem:[#allocation2 + $0x168] sm:$0xff] }
0x149c   :  { %v3165_v7 = vpack.c.bf16 %v2085_v32, %v2081_v2 }
0x149e   :  { %3144 = vmatpush3.bf16.msra.mxu0 %v3143_v14  ;;  %v2080_v14 = vld [vmem:[#allocation2 + $0x140] sm:$0xff] }
0x149f   :  { %3031 = vmatprep.subr.bf16.mxu0 %v3585_v42 }
0x14ff   :  { %v1762_v22 = vpop.permute.xlu0 %1761  ;;  %v1782_v59 = vpop.permute.xlu1 %1781 }
0x1500   :  { %v2656_v6 = vpack.c.bf16 %v1782_v59, %v1758_v20  ;;  %v3151_v20 = vpack.c.bf16 %v2052_v45, %v2048_v36 }
0x1502   :  { %3007 = vmatpush3.bf16.msk.msra.mxu1 %vm4304_vm15, %v2656_v6  ;;  %v2056_v6 = vld [vmem:[#allocation2 + $0x80] sm:$0xff] }
0x1503   :  { %v1770_v43 = vpop.permute.xlu0 %1769  ;;  %v1766_v16 = vpop.permute.xlu1 %1765  ;;  %3008 = vmatprep.subr.bf16.mxu1 %v3585_v42 }
0x1504   :  { %v2659_v23 = vpack.c.bf16 %v1766_v16, %v1762_v22  ;;  %v2662_v25 = vpack.c.bf16 %v1770_v43, %v1749_v61  ;;  %v2053_v61 = vld [vmem:[#allocation2 + $0x68] sm:$0xff]  ;;  %v2060_v43 = vld [vmem:[#allocation2 + $0xa0] sm:$0xff] }
0x1505   :  { %v3149_v18 = vpack.c.bf16 %v2053_v61, %v2049_v11  ;;  %v2061_v22 = vld [vmem:[#allocation2 + $0xa8] sm:$0xff]  ;;  %v3155_v16 = vpack.c.bf16 %v2060_v43, %v2056_v6 }
0x1506   :  { %3009 = vmatpush3.bf16.msk.msra.mxu1 %vm4919_vm4, %v2659_v23  ;;  %v3153_v59 = vpack.c.bf16 %v2061_v22, %v2057_v34  ;;  %v2065_v23 = vld [vmem:[#allocation2 + $0xc8] sm:$0xff]  ;;  %vm4934_vm4 = vcmask 785408  }
0x1507   :  { %v1774_v24 = vpop.permute.xlu1 %1773  ;;  %3010 = vmatprep.subr.bf16.mxu1 %v3585_v42  ;;  %v1785_v29 = vpop.permute.xlu0 %1784 }
0x1508   :  { %v2665_v44 = vpack.c.bf16 %v1785_v29, %v1774_v24  ;;  %v2069_v24 = vld [vmem:[#allocation2 + $0xe8] sm:$0xff]  ;;  %v2064_v29 = vld [vmem:[#allocation2 + $0xc0] sm:$0xff] }
0x150a   :  { %3011 = vmatpush3.bf16.msk.msra.mxu1 %vm4328_vm14, %v2662_v25  ;;  %vm4923_vm14 = vmmov %vm4914_vm13  ;;  %v3157_v25 = vpack.c.bf16 %v2069_v24, %v2065_v23  ;;  %vm4930_vm13 = vcmask 916480  }
0x150b   :  { %v1778_v5 = vpop.permute.xlu1 %1777  ;;  %3012 = vmatprep.subr.bf16.mxu1 %v3585_v42 }
0x150c   :  { %v1780_v50 = vsel %vm4308_vm0, %v1778_v5, 0.0  ;;  %vm4926_vm0 = vcmask 138240   ;;  %v2068_v5 = vld [vmem:[#allocation2 + $0xe0] sm:$0xff] }
0x150d   :  { %v1792_v56 = vpack.c.bf16 %v1780_v50, %v1780_v50  ;;  %vm4927_vm3 = vmmov %vm4926_vm0  ;;  %v2073_v50 = vld [vmem:[#allocation2 + $0x108] sm:$0xff] }
0x150e   :  { %3013 = vmatpush3.bf16.msk.msra.mxu1 %vm4304_vm15, %v2665_v44  ;;  %vm4924_vm15 = vcmask 261120   ;;  %v3159_v44 = vpack.c.bf16 %v2068_v5, %v2064_v29 }
0x150f   :  { %3014 = vmatprep.subr.bf16.mxu1 %v3585_v42  ;;  %v1803_v9 = vsel %vm4922_vm6, %v1792_v56, 0  ;;  %v2077_v56 = vld [vmem:[#allocation2 + $0x128] sm:$0xff]  ;;  %vm4935_vm6 = vcmask 769024  }
0x1512   :  { %3015 = vmatpush3.bf16.msra.mxu1 %v1803_v9  ;;  %v3161_v9 = vpack.c.bf16 %v2077_v56, %v2073_v50 }
0x1513   :  { %3146 = vmatprep.subr.bf16.mxu1 %v3145_v57 }
0x1515   :  { %3017 = vmatmul.mubr.msk.bf16.vlgmr.msra.gmra.mrb[28].mxu1 %vm4923_vm14, %v1787_v15  ;;  %v2072_v15 = vld [vmem:[#allocation2 + $0x100] sm:$0xff] }
0x1516   :  { %2168 = vmatprep.mubr.f32.mxu1 %v3585_v42  ;;  %3148 = vmatpush1.bf16.msra.mxu1 %v3147_v4  ;;  %v3163_v30 = vpack.c.bf16 %v2076_v13, %v2072_v15  ;;  %v2051_v15 = vld [vmem:[#allocation2 + $0x58] sm:$0xff] }
0x1517   :  { %3150 = vmatprep.subr.bf16.mxu1 %v3149_v18  ;;  %v2055_v13 = vld [vmem:[#allocation2 + $0x78] sm:$0xff] }
0x1518   :  { %v1797_v3 = vpop.permute.xlu0 %1796  ;;  %v3181_v21 = vpack.c.bf16 %v2055_v13, %v2051_v15 }
0x151a   :  { %3152 = vmatpush1.bf16.msra.mxu1 %v3151_v20 }
0x151b   :  { %3154 = vmatprep.subr.bf16.mxu1 %v3153_v59 }
0x151e   :  { %3156 = vmatpush1.bf16.msra.mxu1 %v3155_v16 }
0x151f   :  { %3158 = vmatprep.subr.bf16.mxu1 %v3157_v25 }
0x1522   :  { %3160 = vmatpush1.bf16.msra.mxu1 %v3159_v44  ;;  %v2047_v44 = vld [vmem:[#allocation2 + $0x38] sm:$0xff] }
0x1523   :  { %3162 = vmatprep.subr.bf16.mxu1 %v3161_v9  ;;  %v2046_v9 = vld [vmem:[#allocation2 + $0x30] sm:$0xff] }
0x1524   :  { %v3179_v32 = vpack.c.bf16 %v2046_v9, %v2042_v12  ;;  %v2102_v12 = vld [vmem:[#allocation2 + $0x1f0] sm:$0xff] }
0x1526   :  { %3164 = vmatpush1.bf16.msra.mxu1 %v3163_v30 }
0x1527   :  { %3166 = vmatprep.subr.bf16.mxu1 %v3165_v7  ;;  %v2050_v7 = vld [vmem:[#allocation2 + $0x50] sm:$0xff] }
0x15e8   :  { %v1839_v1 = vpop.f32.mrb[28].mxu1 }
0x15e9   :  { %v1840_v0 = vadd.f32 %v1839_v1, %v1797_v3  ;;  %v3018_v33 = vpop.f32.mrb[29].mxu1  ;;  %v2084_v3 = vld [vmem:[#allocation2 + $0x160] sm:$0xff] }
0x15ea   :  { %v1842_v10 = vpop.f32.mrb[30].mxu1  ;;  %v3167_v1 = vpack.c.bf16 %v2084_v3, %v2080_v14  ;;  %v2093_v33 = vld [vmem:[#allocation2 + $0x1a8] sm:$0xff]  ;;  %v2054_v14 = vld [vmem:[#allocation2 + $0x70] sm:$0xff]  ;;  %v2059_v3 = vld [vmem:[#allocation2 + $0x98] sm:$0xff] }
0x15eb   :  { %v1845_v38 = vmax.f32 %v1840_v0, 0.0  ;;  %v3019_v35 = vpop.f32.mrb[31].mxu1  ;;  %v2089_v0 = vld [vmem:[#allocation2 + $0x188] sm:$0xff]  ;;  %v3183_v19 = vpack.c.bf16 %v2054_v14, %v2050_v7 }
0x15ec   :  { %v3169_v10 = vpack.c.bf16 %v2093_v33, %v2089_v0  ;;  %3168 = vmatpush1.bf16.msra.mxu1 %v3167_v1  ;;  %v2063_v1 = vld [vmem:[#allocation2 + $0xb8] sm:$0xff]  ;;  %v2058_v33 = vld [vmem:[#allocation2 + $0x90] sm:$0xff] }
0x15ed   :  { %v1846_v46 = vadd.f32 %v1845_v38, %v4282_v55  ;;  %v3185_v0 = vpack.c.bf16 %v2063_v1, %v2059_v3 }
0x15ee   :  { %3170 = vmatprep.subr.bf16.mxu1 %v3169_v10  ;;  %v2062_v10 = vld [vmem:[#allocation2 + $0xb0] sm:$0xff] }
0x15ef   :  { %3029 = vmatmul.mubr.msk.f32.vlgmr.msra.gmra.mrb[2].mxu0 %vm4924_vm15, %v1846_v46 }
0x15f0   :  { %3041 = vmatprep.mubr.msk.bf16.mxu0 %vm4878_vm7, %v3585_v42  ;;  %vm4928_vm7 = vcmask 1039360  }
0x16c2   :  { %v4539_v41 = vpop.f32.mrb[2].mxu0 }
0x16c3   :  { %1925 = vrot.lane.b32.xlu1 %v4539_v41, %s3586_s9  ;;  %v3030_v27 = vpop.f32.mrb[3].mxu0  ;;  %s4936_s9 = sld [smem:[#allocation15_spill]] }
0x16c9   :  { %v1980_v2 = vld [vmem:[%s4936_s9] sm:$0xf] }
0x1735   :  { %v1926_v28 = vpop.permute.xlu1 %1925 }
0x1736   :  { %v4544_v37 = vsel %vm4926_vm0, 0.0, %v1926_v28  ;;  %v1929_v17 = vsel %vm4927_vm3, %v1926_v28, 0.0  ;;  %vm4944_vm3 = vnez %v4844_v47 }
0x1737   :  { %v3408_v55 = vpack.i.bf16 %v1929_v17, %v4544_v37 }
0x1739   :  { %3409 = vrot.lane.b32.xlu1 %v3408_v55, %s3580_s22  ;;  %3404 = vrot.lane.b32.xlu0 %v3408_v55, %s3583_s28 }
0x173d   :  { %3419 = vrot.lane.b32.xlu1 %v3408_v55, %s3587_s13  ;;  %3414 = vrot.lane.b32.xlu0 %v3408_v55, %s3588_s17 }
0x1741   :  { %3429 = vrot.lane.b32.xlu1 %v3408_v55, %s3589_s2  ;;  %3424 = vrot.lane.b32.xlu0 %v3408_v55, %s3579_s23 }
0x1745   :  { %1989 = vperm.xlu1 %3402, %v1986_v48   ;;  %3434 = vrot.lane.b32.xlu0 %v3408_v55, %s3577_s5 }
0x17ab   :  { %v3410_v38 = vpop.permute.xlu1 %3409  ;;  %v3405_v35 = vpop.permute.xlu0 %3404 }
0x17ac   :  { %v3407_v46 = vunpack.i.h.bf16 %v3405_v35  ;;  %v3406_v27 = vunpack.i.l.bf16 %v3405_v35  ;;  %v3412_v28 = vunpack.i.h.bf16 %v3410_v38  ;;  %v3411_v17 = vunpack.i.l.bf16 %v3410_v38  ;;  %v2067_v38 = vld [vmem:[#allocation2 + $0xd8] sm:$0xff] }
0x17ad   :  { %v2071_v35 = vld [vmem:[#allocation2 + $0xf8] sm:$0xff] }
0x17ae   :  { %v1972_v55 = vsel %vm4928_vm7, %v3406_v27, %v3407_v46  ;;  %v1937_v11 = vsel %vm4929_vm10, %v3411_v17, %v3412_v28  ;;  %v3187_v46 = vpack.c.bf16 %v2062_v10, %v2058_v33  ;;  %v3189_v27 = vpack.c.bf16 %v2071_v35, %v2067_v38  ;;  %v2066_v28 = vld [vmem:[#allocation2 + $0xd0] sm:$0xff] }
0x17af   :  { %v2670_v48 = vpack.c.bf16 %v1972_v55, %v4544_v37  ;;  %v3420_v58 = vpop.permute.xlu1 %3419  ;;  %v3415_v54 = vpop.permute.xlu0 %3414  ;;  %v2070_v17 = vld [vmem:[#allocation2 + $0xf0] sm:$0xff]  ;;  %v2075_v55 = vld [vmem:[#allocation2 + $0x118] sm:$0xff]  ;;  %vm4945_vm7 = vmmov 1  }
0x17b0   :  { %v3422_v57 = vunpack.i.h.bf16 %v3420_v58  ;;  %v3421_v60 = vunpack.i.l.bf16 %v3420_v58  ;;  %v3417_v31 = vunpack.i.h.bf16 %v3415_v54  ;;  %v3416_v4 = vunpack.i.l.bf16 %v3415_v54  ;;  %vm4648_vm10 = vmpackc.low %vm4945_vm7, %vm4944_vm3 }
0x17b1   :  { %3032 = vmatpush3.bf16.msk.msra.mxu0 %vm4197_vm9, %v2670_v48  ;;  %v2079_v48 = vld [vmem:[#allocation2 + $0x138] sm:$0xff]  ;;  %v3191_v58 = vpack.c.bf16 %v2070_v17, %v2066_v28 }
0x17b2   :  { %v1944_v61 = vsel %vm4930_vm13, %v3416_v4, %v3417_v31  ;;  %3033 = vmatprep.subr.bf16.mxu0 %v3585_v42  ;;  %v1951_v18 = vsel %vm4931_vm8, %v3421_v60, %v3422_v57  ;;  %v3193_v54 = vpack.c.bf16 %v2079_v48, %v2075_v55  ;;  %v2074_v57 = vld [vmem:[#allocation2 + $0x110] sm:$0xff]  ;;  %v2083_v60 = vld [vmem:[#allocation2 + $0x158] sm:$0xff]  ;;  %vm4948_vm13 = vcmask 1039360  }
0x17b3   :  { %v2673_v36 = vpack.c.bf16 %v1944_v61, %v1937_v11  ;;  %v3430_v45 = vpop.permute.xlu1 %3429  ;;  %v3425_v37 = vpop.permute.xlu0 %3424  ;;  %v2676_v6 = vpack.c.bf16 %v1951_v18, %v4539_v41  ;;  %v2043_v41 = vld [vmem:[#allocation2 + $0x18] sm:$0xff]  ;;  %v2082_v61 = vld [vmem:[#allocation2 + $0x150] sm:$0xff]  ;;  %vm4949_vm8 = vmmov %vm4948_vm13 }
0x17b4   :  { %v3432_v20 = vunpack.i.h.bf16 %v3430_v45  ;;  %v3431_v34 = vunpack.i.l.bf16 %v3430_v45  ;;  %v3427_v22 = vunpack.i.h.bf16 %v3425_v37  ;;  %v3426_v59 = vunpack.i.l.bf16 %v3425_v37  ;;  %v2087_v31 = vld [vmem:[#allocation2 + $0x178] sm:$0xff]  ;;  %v2086_v18 = vld [vmem:[#allocation2 + $0x170] sm:$0xff] }
0x17b5   :  { %3034 = vmatpush3.bf16.msk.msra.mxu0 %vm4932_vm5, %v2673_v36  ;;  %v3177_v56 = vpack.c.bf16 %v2047_v44, %v2043_v41  ;;  %v3197_v11 = vpack.c.bf16 %v2087_v31, %v2083_v60  ;;  %v2091_v36 = vld [vmem:[#allocation2 + $0x198] sm:$0xff]  ;;  %v3199_v37 = vpack.c.bf16 %v2086_v18, %v2082_v61  ;;  %v2100_v41 = vld [vmem:[#allocation2 + $0x1e0] sm:$0xff]  ;;  %vm4950_vm5 = vmmov %vm4949_vm8 }
0x17b6   :  { %3035 = vmatprep.subr.bf16.mxu0 %v3585_v42  ;;  %v1978_v16 = vsel %vm4933_vm12, %v3431_v34, %v3432_v20  ;;  %v1958_v23 = vsel %vm4934_vm4, %v3426_v59, %v3427_v22  ;;  %v2095_v45 = vld [vmem:[#allocation2 + $0x1b8] sm:$0xff]  ;;  %v2088_v34 = vld [vmem:[#allocation2 + $0x180] sm:$0xff]  ;;  %v2090_v59 = vld [vmem:[#allocation2 + $0x190] sm:$0xff]  ;;  %vm4952_vm4 = vnez %v4854_v39 }
0x17b7   :  { %v3435_v43 = vpop.permute.xlu0 %3434  ;;  %v2679_v29 = vpack.c.bf16 %v1978_v16, %v1958_v23  ;;  %v3201_v20 = vpack.c.bf16 %v2095_v45, %v2091_v36  ;;  %v2092_v22 = vld [vmem:[#allocation2 + $0x1a0] sm:$0xff]  ;;  %v2097_v23 = vld [vmem:[#allocation2 + $0x1c8] sm:$0xff]  ;;  %vm4951_vm12 = vmmov %vm4950_vm5 }
0x17b8   :  { %v3437_v24 = vunpack.i.h.bf16 %v3435_v43  ;;  %v3436_v25 = vunpack.i.l.bf16 %v3435_v43  ;;  %v2094_v43 = vld [vmem:[#allocation2 + $0x1b0] sm:$0xff]  ;;  %v2441_v31 = vld [vmem:[%s3747_s27] sm:$0xf] }
0x17b9   :  { %3036 = vmatpush3.bf16.msk.msra.mxu0 %vm4224_vm1, %v2676_v6  ;;  %vm4937_vm1 = vcmask 1043456   ;;  %v3171_v6 = vpack.c.bf16 %v2092_v22, %v2088_v34  ;;  %v3203_v16 = vpack.c.bf16 %v2094_v43, %v2090_v59 }
0x17ba   :  { %v1965_v8 = vsel %vm4935_vm6, %v3436_v25, %v3437_v24  ;;  %3037 = vmatprep.subr.bf16.mxu0 %v3585_v42  ;;  %v2101_v24 = vld [vmem:[#allocation2 + $0x1e8] sm:$0xff]  ;;  %v2099_v25 = vld [vmem:[#allocation2 + $0x1d8] sm:$0xff]  ;;  %vm4659_vm6 = vmpackc.low %vm4945_vm7, %vm4952_vm4 }
0x17bb   :  { %v1967_v5 = vsel %vm4201_vm11, %v1965_v8, 0.0  ;;  %vm4938_vm11 = vmmov %vm4923_vm14  ;;  %3172 = vmatpush1.bf16.msra.mxu1 %v3171_v6  ;;  %v3173_v8 = vpack.c.bf16 %v2101_v24, %v2097_v23 }
0x17bc   :  { %v1985_v50 = vpack.c.bf16 %v1967_v5, %v1967_v5  ;;  %v2096_v5 = vld [vmem:[#allocation2 + $0x1c0] sm:$0xff] }
0x17bd   :  { %3038 = vmatpush3.bf16.msk.msra.mxu0 %vm4197_vm9, %v2679_v29  ;;  %v2103_v29 = vld [vmem:[#allocation2 + $0x1f8] sm:$0xff]  ;;  %3174 = vmatprep.subr.bf16.mxu1 %v3173_v8  ;;  %vm4939_vm9 = vcmask 269312   ;;  %v4953_v8 = vmov 0 }
0x17be   :  { %3039 = vmatprep.subr.bf16.mxu0 %v3585_v42  ;;  %v1996_v30 = vsel %vm4937_vm1, %v1985_v50, 0  ;;  %v3205_v44 = vpack.c.bf16 %v2103_v29, %v2099_v25  ;;  %v3175_v50 = vpack.c.bf16 %v2100_v41, %v2096_v5  ;;  %vm4940_vm2 = vmmov %vm4939_vm9  ;;  %v4954_v8 = vsel %vm4659_vm6, 4294967295, %v4953_v8 }
0x17bf   :  { %vm4941_vm14 = vmmov %vm4940_vm2  ;;  %vm4955_vm1 = vnez %v4846_v49 }
0x17c0   :  { %3176 = vmatpush1.bf16.msra.mxu1 %v3175_v50  ;;  %vm4942_vm15 = vmmov %vm4940_vm2 }
0x17c1   :  { %3040 = vmatpush3.bf16.msra.mxu0 %v1996_v30  ;;  %vm4943_vm0 = vmmov %vm4940_vm2 }
0x17c2   :  { %3178 = vmatprep.subr.bf16.mxu0 %v3177_v56  ;;  %v2098_v56 = vld [vmem:[#allocation2 + $0x1d0] sm:$0xff] }
0x17c3   :  { %v3207_v9 = vpack.c.bf16 %v2102_v12, %v2098_v56  ;;  %v4956_v12 = vmov 0 }
0x17c4   :  { %3042 = vmatmul.mubr.msk.bf16.vlgmr.msra.gmra.mrb[20].mxu0 %vm4938_vm11, %v1980_v2  ;;  %v1990_v15 = vpop.permute.xlu1 %1989  ;;  %vm4667_vm11 = vmpackc.low %vm4945_vm7, %vm4955_vm1 }
0x17c5   :  { %3180 = vmatpush1.bf16.msra.mxu0 %v3179_v32  ;;  %2239 = vmatprep.mubr.f32.mxu0 %v3585_v42  ;;  %v2078_v42 = vld [vmem:[#allocation2 + $0x130] sm:$0xff]  ;;  %v4957_v12 = vsel %vm4667_vm11, 4294967295, %v4956_v12 }
0x17c6   :  { %3182 = vmatprep.subr.bf16.mxu0 %v3181_v21  ;;  %v3195_v4 = vpack.c.bf16 %v2078_v42, %v2074_v57 }
0x17c9   :  { %3184 = vmatpush1.bf16.msra.mxu0 %v3183_v19 }
0x17ca   :  { %3186 = vmatprep.subr.bf16.mxu0 %v3185_v0 }
0x17cd   :  { %3188 = vmatpush1.bf16.msra.mxu0 %v3187_v46 }
0x17ce   :  { %3190 = vmatprep.subr.bf16.mxu0 %v3189_v27 }
0x17d1   :  { %3192 = vmatpush1.bf16.msra.mxu0 %v3191_v58 }
0x17d2   :  { %3194 = vmatprep.subr.bf16.mxu0 %v3193_v54 }
0x17d5   :  { %3196 = vmatpush1.bf16.msra.mxu0 %v3195_v4 }
0x17d6   :  { %3198 = vmatprep.subr.bf16.mxu0 %v3197_v11 }
0x17d9   :  { %3200 = vmatpush1.bf16.msra.mxu0 %v3199_v37 }
0x17da   :  { %3202 = vmatprep.subr.bf16.mxu0 %v3201_v20 }
0x17dd   :  { %3204 = vmatpush1.bf16.msra.mxu0 %v3203_v16 }
0x17de   :  { %3206 = vmatprep.subr.bf16.mxu0 %v3205_v44 }
0x17e1   :  { %3208 = vmatpush1.bf16.msra.mxu0 %v3207_v9  ;;  %v4959_v9 = vmov 0 }
0x1897   :  { %v2032_v13 = vpop.f32.mrb[20].mxu0 }
0x1898   :  { %v2033_v30 = vadd.f32 %v2032_v13, %v1990_v15  ;;  %v3043_v2 = vpop.f32.mrb[21].mxu0 }
0x1899   :  { %v2035_v32 = vpop.f32.mrb[22].mxu0 }
0x189a   :  { %v2038_v21 = vmax.f32 %v2033_v30, 0.0  ;;  %v3044_v7 = vpop.f32.mrb[23].mxu0 }
0x189c   :  { %v2039_v14 = vadd.f32 %v2038_v21, %v4170_v52 }
0x189e   :  { %2169 = vmatmul.mubr.f32.vlgmr.msra.gmra.mrb[32].mxu1 %v2039_v14  ;;  %2240 = vmatmul.mubr.f32.vlgmr.msra.gmra.mrb[24].mxu0 %v2039_v14 }
0x189f   :  { %2494 = vmatprep.mubr.bf16.mxu1 %v3584_v26  ;;  %2535 = vmatprep.mubr.bf16.mxu0 %v3584_v26 }
0x1971   :  { %v4589_v3 = vpop.f32.mrb[32].mxu1  ;;  %v4591_v1 = vpop.f32.mrb[24].mxu0 }
0x1972   :  { %v4593_v19 = vpop.f32.mrb[33].mxu1  ;;  %v4595_v0 = vpop.f32.mrb[25].mxu0 }
0x1973   :  { %v3438_v33 = vpack.i.bf16 %v4593_v19, %v4589_v3  ;;  %v3443_v52 = vpack.i.bf16 %v4595_v0, %v4591_v1 }
0x1975   :  { %3439 = vrot.lane.b32.xlu0 %v3438_v33, %s3576_s0  ;;  %3444 = vrot.lane.b32.xlu1 %v3443_v52, %s3576_s0 }
0x19e7   :  { %v3440_v10 = vpop.permute.xlu0 %3439  ;;  %v3445_v35 = vpop.permute.xlu1 %3444 }
0x19e8   :  { %v3441_v26 = vunpack.i.l.bf16 %v3440_v10  ;;  %v3442_v46 = vunpack.i.h.bf16 %v3440_v10  ;;  %v3447_v27 = vunpack.i.h.bf16 %v3445_v35  ;;  %v3446_v28 = vunpack.i.l.bf16 %v3445_v35 }
0x19ea   :  { %v4604_v38 = vsel %vm4939_vm9, 0.0, %v3441_v26  ;;  %v2258_v17 = vsel %vm4940_vm2, %v3441_v26, %v3442_v46  ;;  %v2267_v55 = vsel %vm4941_vm14, %v3447_v27, 0.0  ;;  %v2259_v48 = vsel %vm4942_vm15, %v3442_v46, %v3446_v28 }
0x19eb   :  { %2384 = vrot.lane.b32.xlu0 %v4604_v38, %s3583_s28  ;;  %2274 = vrot.lane.b32.xlu1 %v4604_v38, %s3580_s22  ;;  %v2260_v58 = vsel %vm4943_vm0, %v3446_v28, %v3447_v27  ;;  %v3448_v57 = vpack.i.bf16 %v2259_v48, %v2258_v17  ;;  %v3508_v60 = vpack.i.bf16 %v2258_v17, %v4604_v38  ;;  %vm4961_vm14 = vcmask 1031168  }
0x19ec   :  { %v3453_v54 = vpack.i.bf16 %v2267_v55, %v2260_v58  ;;  %v3513_v42 = vpack.i.bf16 %v2260_v58, %v2259_v48  ;;  %vm4958_vm9 = vnez %v4850_v62  ;;  %vm4962_vm15 = vmmov %vm4961_vm14 }
0x19ed   :  { %vm4674_vm2 = vmpackc.low %vm4945_vm7, %vm4958_vm9 }
0x19ee   :  { %v4960_v9 = vsel %vm4674_vm2, 4294967295, %v4959_v9  ;;  %vm4963_vm0 = vmmov %vm4961_vm14 }
0x19ef   :  { %2296 = vrot.lane.b32.xlu0 %v4604_v38, %s3579_s23  ;;  %2318 = vrot.lane.b32.xlu1 %v4604_v38, %s3577_s5 }
0x19f3   :  { %2340 = vrot.lane.b32.xlu0 %v4604_v38, %s3578_s6  ;;  %2402 = vrot.lane.b32.xlu1 %v4604_v38, %s3582_s1 }
0x19f7   :  { %3454 = vrot.lane.b32.xlu1 %v3453_v54, %s3583_s28  ;;  %3449 = vrot.lane.b32.xlu0 %v3448_v57, %s3583_s28 }
0x19fb   :  { %3459 = vrot.lane.b32.xlu1 %v3448_v57, %s3580_s22  ;;  %3464 = vrot.lane.b32.xlu0 %v3453_v54, %s3580_s22 }
0x19ff   :  { %3469 = vrot.lane.b32.xlu1 %v3448_v57, %s3579_s23  ;;  %3474 = vrot.lane.b32.xlu0 %v3453_v54, %s3579_s23 }
0x1a03   :  { %3479 = vrot.lane.b32.xlu1 %v3448_v57, %s3577_s5  ;;  %3484 = vrot.lane.b32.xlu0 %v3453_v54, %s3577_s5 }
0x1a07   :  { %3494 = vrot.lane.b32.xlu1 %v3453_v54, %s3578_s6  ;;  %3489 = vrot.lane.b32.xlu0 %v3448_v57, %s3578_s6 }
0x1a0b   :  { %3504 = vrot.lane.b32.xlu1 %v3453_v54, %s3582_s1  ;;  %3499 = vrot.lane.b32.xlu0 %v3448_v57, %s3582_s1 }
0x1a0f   :  { %3514 = vrot.lane.b32.xlu1 %v3513_v42, %s3581_s26  ;;  %3509 = vrot.lane.b32.xlu0 %v3508_v60, %s3581_s26 }
0x1a13   :  { %2444 = vperm.xlu1 %3402, %v2441_v31   ;;  %2370 = vrot.lane.b32.xlu0 %v2267_v55, %s3581_s26 }
0x1a5d   :  { %v2385_v4 = vpop.permute.xlu0 %2384  ;;  %v2275_v11 = vpop.permute.xlu1 %2274 }
0x1a61   :  { %v2297_v61 = vpop.permute.xlu0 %2296  ;;  %v4639_v18 = vpop.permute.xlu1 %2318 }
0x1a65   :  { %v4641_v36 = vpop.permute.xlu0 %2340  ;;  %v4643_v45 = vpop.permute.xlu1 %2402 }
0x1a69   :  { %v3455_v37 = vpop.permute.xlu1 %3454  ;;  %v3450_v20 = vpop.permute.xlu0 %3449 }
0x1a6a   :  { %v3457_v34 = vunpack.i.h.bf16 %v3455_v37  ;;  %v3456_v22 = vunpack.i.l.bf16 %v3455_v37  ;;  %v3452_v59 = vunpack.i.h.bf16 %v3450_v20  ;;  %v3451_v6 = vunpack.i.l.bf16 %v3450_v20 }
0x1a6c   :  { %v2397_v16 = vsel %vm4948_vm13, %v3456_v22, %v3457_v34  ;;  %v2396_v23 = vsel %vm4949_vm8, %v3452_v59, %v3456_v22  ;;  %v2394_v24 = vsel %vm4950_vm5, %v2385_v4, %v3451_v6  ;;  %v2395_v25 = vsel %vm4951_vm12, %v3451_v6, %v3452_v59  ;;  %vm4964_vm13 = vmmov %vm4963_vm0 }
0x1a6d   :  { %v2709_v29 = vpack.c.bf16 %v2397_v16, %v2260_v58  ;;  %v2712_v5 = vpack.c.bf16 %v2396_v23, %v2259_v48  ;;  %v2683_v41 = vpack.c.bf16 %v2395_v25, %v2258_v17  ;;  %v2686_v44 = vpack.c.bf16 %v2394_v24, %v4604_v38  ;;  %v3460_v50 = vpop.permute.xlu1 %3459  ;;  %v3465_v56 = vpop.permute.xlu0 %3464 }
0x1a6e   :  { %v3462_v15 = vunpack.i.h.bf16 %v3460_v50  ;;  %v3461_v13 = vunpack.i.l.bf16 %v3460_v50  ;;  %v3467_v30 = vunpack.i.h.bf16 %v3465_v56  ;;  %v3466_v2 = vunpack.i.l.bf16 %v3465_v56 }
0x1a6f   :  { %2684 = vmatprep.subr.msk.bf16.mxu1 %vm4648_vm10, %v2683_v41  ;;  %2710 = vmatprep.subr.msk.bf16.mxu0 %vm4659_vm6, %v2709_v29  ;;  %vm4965_vm8 = vnez %v4848_v51  ;;  %vm4966_vm12 = vcmask 785408  }
0x1a70   :  { %2687 = vmatpush1.bf16.msk.msra.mxu1 %vm4667_vm11, %v2686_v44  ;;  %2713 = vmatpush1.bf16.msk.msra.mxu0 %vm4674_vm2, %v2712_v5  ;;  %v2284_v10 = vsel %vm4961_vm14, %v2275_v11, %v3461_v13  ;;  %v2285_v26 = vsel %vm4962_vm15, %v3461_v13, %v3462_v15  ;;  %v2286_v38 = vsel %vm4963_vm0, %v3462_v15, %v3466_v2  ;;  %vm2688_vm5 = vmpackc.low %vm4944_vm3, %vm4965_vm8 }
0x1a71   :  { %v3470_v32 = vpop.permute.xlu1 %3469  ;;  %v3475_v21 = vpop.permute.xlu0 %3474  ;;  %v2287_v35 = vsel %vm4964_vm13, %v3466_v2, %v3467_v30  ;;  %vm4967_vm2 = vmmov %vm4966_vm12  ;;  %vm4970_vm14 = vnez %v4856_v40  ;;  %vm4971_vm0 = vnez %v4852_v63 }
0x1a72   :  { %v3472_v7 = vunpack.i.h.bf16 %v3470_v32  ;;  %v3471_v14 = vunpack.i.l.bf16 %v3470_v32  ;;  %v3477_v33 = vunpack.i.h.bf16 %v3475_v21  ;;  %v3476_v52 = vunpack.i.l.bf16 %v3475_v21  ;;  %vm4968_vm11 = vmmov %vm4967_vm2 }
0x1a73   :  { %vm4969_vm6 = vmmov %vm4967_vm2 }
0x1a74   :  { %v2306_v46 = vsel %vm4966_vm12, %v2297_v61, %v3471_v14  ;;  %v2307_v27 = vsel %vm4967_vm2, %v3471_v14, %v3472_v7  ;;  %v2308_v28 = vsel %vm4968_vm11, %v3472_v7, %v3476_v52  ;;  %v2309_v17 = vsel %vm4969_vm6, %v3476_v52, %v3477_v33  ;;  %vm2714_vm15 = vmpackc.low %vm4952_vm4, %vm4970_vm14 }
0x1a75   :  { %v2689_v55 = vpack.c.bf16 %v2307_v27, %v2285_v26  ;;  %v2692_v48 = vpack.c.bf16 %v2306_v46, %v2284_v10  ;;  %v2715_v58 = vpack.c.bf16 %v2309_v17, %v2287_v35  ;;  %v2718_v54 = vpack.c.bf16 %v2308_v28, %v2286_v38  ;;  %v3480_v57 = vpop.permute.xlu1 %3479  ;;  %v3485_v42 = vpop.permute.xlu0 %3484  ;;  %vm2691_vm2 = vmpackc.low %vm4955_vm1, %vm4971_vm0 }
0x1a76   :  { %v3482_v60 = vunpack.i.h.bf16 %v3480_v57  ;;  %v3481_v31 = vunpack.i.l.bf16 %v3480_v57  ;;  %v3487_v4 = vunpack.i.h.bf16 %v3485_v42  ;;  %v3486_v11 = vunpack.i.l.bf16 %v3485_v42  ;;  %vm4718_vm1 = vmpackc.low %vm4965_vm8, %vm4945_vm7 }
0x1a77   :  { %vm4972_vm6 = vnez %v4858_v53  ;;  %2690 = vmatprep.subr.msk.bf16.mxu1 %vm2688_vm5, %v2689_v55  ;;  %2716 = vmatprep.subr.msk.bf16.mxu0 %vm2714_vm15, %v2715_v58  ;;  %vm4975_vm11 = vcmask 769024   ;;  %vm2720_vm3 = vmpackc.low %vm4970_vm14, %vm4945_vm7  ;;  %v2420_v58 = vld [vmem:[%s3742_s20] sm:$0x3] }
0x1a78   :  { %vm2717_vm4 = vmpackc.low %vm4958_vm9, %vm4972_vm6  ;;  %v2328_v39 = vsel %vm4975_vm11, %v4639_v18, %v3481_v31  ;;  %2693 = vmatpush1.bf16.msk.msra.mxu1 %vm2691_vm2, %v2692_v48  ;;  %vm4979_vm2 = vcmask 523264  }
0x1a79   :  { %vm4976_vm13 = vmmov %vm4975_vm11  ;;  %v2698_v20 = vpack.c.bf16 %v2328_v39, %v4589_v3  ;;  %2719 = vmatpush1.bf16.msk.msra.mxu0 %vm2717_vm4, %v2718_v54  ;;  %v3495_v18 = vpop.permute.xlu1 %3494  ;;  %v3490_v59 = vpop.permute.xlu0 %3489 }
0x1a7a   :  { %v2329_v62 = vsel %vm4976_vm13, %v3481_v31, %v3482_v60  ;;  %vm4977_vm9 = vmmov %vm4975_vm11  ;;  %v3497_v6 = vunpack.i.h.bf16 %v3495_v18  ;;  %v3496_v16 = vunpack.i.l.bf16 %v3495_v18  ;;  %v3491_v23 = vunpack.i.l.bf16 %v3490_v59 }
0x1a7b   :  { %v2330_v61 = vsel %vm4977_vm9, %v3482_v60, %v3486_v11  ;;  %vm4978_vm12 = vmmov %vm4977_vm9  ;;  %v2695_v37 = vpack.c.bf16 %v2329_v62, %v4593_v19  ;;  %v3492_v19 = vunpack.i.h.bf16 %v3490_v59  ;;  %vm4983_vm13 = vcmask 515072  }
0x1a7c   :  { %v2331_v47 = vsel %vm4978_vm12, %v3486_v11, %v3487_v4  ;;  %v2724_v22 = vpack.c.bf16 %v2330_v61, %v4591_v1  ;;  %vm2697_vm5 = vmpackc.low %vm4971_vm0, %vm4945_vm7  ;;  %v2353_v5 = vsel %vm4979_vm2, %v3496_v16, %v3497_v6 }
0x1a7d   :  { %v2721_v34 = vpack.c.bf16 %v2331_v47, %v4595_v0  ;;  %vm2723_vm15 = vmpackc.low %vm4972_vm6, %vm4945_vm7  ;;  %2696 = vmatprep.subr.msk.bf16.mxu1 %vm4718_vm1, %v2695_v37  ;;  %v3505_v3 = vpop.permute.xlu1 %3504  ;;  %v3500_v1 = vpop.permute.xlu0 %3499 }
0x1a7e   :  { %2699 = vmatpush1.bf16.msk.msra.mxu1 %vm2697_vm5, %v2698_v20  ;;  %v3507_v0 = vunpack.i.h.bf16 %v3505_v3  ;;  %v3506_v24 = vunpack.i.l.bf16 %v3505_v3  ;;  %v3502_v25 = vunpack.i.h.bf16 %v3500_v1  ;;  %v3501_v29 = vunpack.i.l.bf16 %v3500_v1  ;;  %vm4980_vm4 = vmmov %vm4979_vm2 }
0x1a7f   :  { %2722 = vmatprep.subr.msk.bf16.mxu0 %vm2720_vm3, %v2721_v34  ;;  %v2352_v41 = vsel %vm4980_vm4, %v3492_v19, %v3496_v16  ;;  %vm4981_vm7 = vmmov %vm4979_vm2  ;;  %vm4987_vm3 = vnez %v4954_v8  ;;  %vm4988_vm5 = vcmask 506880   ;;  %vm4991_vm4 = vnez %v4957_v12 }
0x1a80   :  { %2725 = vmatpush1.bf16.msk.msra.mxu0 %vm2723_vm15, %v2724_v22  ;;  %v2350_v44 = vsel %vm4981_vm7, %v4641_v36, %v3491_v23  ;;  %vm4982_vm11 = vmmov %vm4979_vm2  ;;  %v2415_v56 = vsel %vm4983_vm13, %v3506_v24, %v3507_v0  ;;  %vm4992_vm7 = vnez %v4960_v9 }
0x1a81   :  { %v2351_v50 = vsel %vm4982_vm11, %v3491_v23, %v3492_v19  ;;  %vm4984_vm1 = vmmov %vm4983_vm13  ;;  %v2727_v2 = vpack.c.bf16 %v2415_v56, %v2353_v5  ;;  %v3515_v14 = vpop.permute.xlu1 %3514  ;;  %v3510_v33 = vpop.permute.xlu0 %3509  ;;  %vm4994_vm11 = vcmask 1043456  }
0x1a82   :  { %v2414_v15 = vsel %vm4984_vm1, %v3502_v25, %v3506_v24  ;;  %vm4985_vm9 = vmmov %vm4984_vm1  ;;  %v3517_v52 = vunpack.i.h.bf16 %v3515_v14  ;;  %v3516_v10 = vunpack.i.l.bf16 %v3515_v14  ;;  %v3512_v36 = vunpack.i.h.bf16 %v3510_v33 }
0x1a83   :  { %v2412_v13 = vsel %vm4985_vm9, %v4643_v45, %v3501_v29  ;;  %vm4986_vm12 = vmmov %vm4984_vm1  ;;  %v2730_v7 = vpack.c.bf16 %v2414_v15, %v2352_v41  ;;  %v3511_v26 = vunpack.i.l.bf16 %v3510_v33  ;;  %2728 = vmatprep.subr.msk.bf16.mxu0 %vm4987_vm3, %v2727_v2 }
0x1a84   :  { %v2413_v30 = vsel %vm4986_vm12, %v3501_v29, %v3502_v25  ;;  %v2704_v21 = vpack.c.bf16 %v2412_v13, %v2350_v44  ;;  %v2374_v45 = vsel %vm4988_vm5, %v3516_v10, %v3517_v52  ;;  %vm4989_vm15 = vmmov %vm4988_vm5 }
0x1a85   :  { %v2701_v32 = vpack.c.bf16 %v2413_v30, %v2351_v50  ;;  %v2373_v38 = vsel %vm4989_vm15, %v3512_v36, %v3516_v10  ;;  %vm4990_vm2 = vmmov %vm4988_vm5  ;;  %2731 = vmatpush1.bf16.msk.msra.mxu0 %vm4992_vm7, %v2730_v7  ;;  %v2371_v46 = vpop.permute.xlu0 %2370  ;;  %v2382_v27 = vsel %vm4972_vm6, %v2374_v45, 0.0  ;;  %vm4998_vm6 = vcmask 588800  }
0x1a86   :  { %v2372_v35 = vsel %vm4990_vm2, %v3511_v26, %v3512_v36  ;;  %v2381_v43 = vsel %vm4965_vm8, %v2373_v38, 0.0  ;;  %v2439_v12 = vpack.c.bf16 %v2382_v27, %v2382_v27  ;;  %vm4995_vm13 = vmmov %vm4994_vm11 }
0x1a87   :  { %2702 = vmatprep.subr.msk.bf16.mxu1 %vm4648_vm10, %v2701_v32  ;;  %v2380_v8 = vsel %vm4971_vm0, %v2372_v35, 0.0  ;;  %vm4993_vm10 = vmmov %vm4990_vm2  ;;  %v2438_v17 = vpack.c.bf16 %v2381_v43, %v2381_v43 }
0x1a88   :  { %2705 = vmatpush1.bf16.msk.msra.mxu1 %vm4991_vm4, %v2704_v21  ;;  %v2375_v28 = vsel %vm4993_vm10, %v3517_v52, %v2371_v46  ;;  %v2437_v55 = vpack.c.bf16 %v2380_v8, %v2380_v8  ;;  %vm4996_vm8 = vmmov %vm4994_vm11 }
0x1a89   :  { %v2383_v48 = vsel %vm4970_vm14, %v2375_v28, 0.0  ;;  %2706 = vmatprep.subr.msk.bf16.mxu1 %vm4994_vm11, %v2438_v17  ;;  %vm4997_vm0 = vmmov %vm4996_vm8 }
0x1a8a   :  { %v2440_v9 = vpack.c.bf16 %v2383_v48, %v2383_v48  ;;  %v2451_v51 = vsel %vm4995_vm13, %v2437_v55, 0  ;;  %v2457_v63 = vsel %vm4997_vm0, %v2439_v12, 0  ;;  %vm4999_vm1 = vmmov %vm4998_vm6 }
0x1a8c   :  { %2471 = vmatpush1.bf16.msra.mxu1 %v2451_v51  ;;  %2732 = vmatprep.subr.msk.bf16.mxu0 %vm4996_vm8, %v2440_v9 }
0x1a8d   :  { %2512 = vmatpush1.bf16.msra.mxu0 %v2457_v63 }
0x1a8f   :  { %2707 = vmatmul.mubr.msk.bf16.vlgmr.msra.gmra.mrb[36].mxu1 %vm4998_vm6, %v2420_v58 }
0x1a90   :  { %2733 = vmatmul.mubr.msk.bf16.vlgmr.msra.gmra.mrb[28].mxu0 %vm4999_vm1, %v2420_v58 }
0x1a92   :  { %v2445_v53 = vpop.permute.xlu1 %2444 }
0x1b62   :  { %v2496_v54 = vpop.f32.mrb[36].mxu1 }
0x1b63   :  { %v2497_v40 = vadd.f32 %v2496_v54, %v2445_v53  ;;  %v2498_v57 = vpop.f32.mrb[37].mxu1  ;;  %v2537_v60 = vpop.f32.mrb[28].mxu0 }
0x1b64   :  { %v2499_v42 = vadd.f32 %v2498_v57, %v2445_v53  ;;  %v2500_v31 = vpop.f32.mrb[38].mxu1  ;;  %v2538_v11 = vadd.f32 %v2537_v60, %v2445_v53  ;;  %v2539_v49 = vpop.f32.mrb[29].mxu0 }
0x1b65   :  { %v2544_v4 = vmax.f32 %v2497_v40, 0.0  ;;  %v2501_v39 = vpop.f32.mrb[39].mxu1  ;;  %v2540_v61 = vadd.f32 %v2539_v49, %v2445_v53  ;;  %v2541_v47 = vpop.f32.mrb[30].mxu0 }
0x1b66   :  { %v2545_v62 = vmax.f32 %v2499_v42, 0.0  ;;  %v2546_v37 = vmax.f32 %v2538_v11, 0.0  ;;  %v2542_v20 = vpop.f32.mrb[31].mxu0 }
0x1b67   :  { %v2547_v22 = vmax.f32 %v2540_v61, 0.0 }
0x1b68   :  { %v2552_v34 = vcombine.low %v2544_v4, %v2545_v62 }
0x1b69   :  { %v2553_v18 = vcombine.low %v2546_v37, %v2547_v22 }
0x1b6a   :  { %2556 = vst [vmem:[%s3752_s4] sm:$0xff] %v2552_v34 }
0x1b6b   :  { %2557 = vst [vmem:[%s3752_s4 + $0x8] sm:$0xff] %v2553_v18 }
0x1b6c   :  { %2562 = vsyncpa [#allocation3], 1 }

</bundles_post_ra>
